<compile_context>
chip_gen: v6e
topology: v6e:2x2x1
jax: 0.10.0
libtpu: 0.0.40
codegen_flags: <defaults>
</compile_context>

<pallas_src>
import functools
import math

import jax
import jax.numpy as jnp
from jax import lax
from jax.experimental import pallas as pl
from jax.experimental.pallas import tpu as pltpu

_EPS = 1e-5
_NEG_INF = -1e9


def _batchnorm1d(x):
    # x: (B, S, D).  BatchNorm1d(num_features=S) on an (N, C, L) tensor: per-channel
    # (dim 1) mean / biased variance over (batch, last dim).
    mean = jnp.mean(x, axis=(0, 2), keepdims=True)
    var = jnp.mean(jnp.square(x - mean), axis=(0, 2), keepdims=True)
    return (x - mean) * lax.rsqrt(var + _EPS)


def _proj(x, w, b):
    # (B, S, Din) @ (Din, Dout), batch folded into the matmul M dimension.
    B, S, Din = x.shape
    y = jnp.dot(x.reshape(B * S, Din), w, preferred_element_type=jnp.float32) + b
    return y.reshape(B, S, w.shape[-1])


def _ffn(x, w1, b1, w2, b2):
    B, S, D = x.shape
    h = jnp.maximum(
        jnp.dot(x.reshape(B * S, D), w1, preferred_element_type=jnp.float32) + b1, 0.0)
    y = jnp.dot(h, w2, preferred_element_type=jnp.float32) + b2
    return y.reshape(B, S, D)


def _mha(q, k_heads, v_heads, bias, wo, bo):
    """Multi-head attention, batch-parallel, heads kept lane-packed.

    q:        (B, Sq, D)
    k_heads:  list of H tensors (B, Sk, D), head-h feature block kept / others zeroed
    v_heads:  same per-head masking
    bias:     (H, B, Sq, Sk) additive mask (-1e9 at masked positions, 0 elsewhere)
    wo, bo:   output projection (D, D), (1, D)

    Because K is zero outside head h's feature block, the full-D contraction q . k_h
    equals the per-head dk contraction exactly; likewise P @ V_h lands each head's
    context in its own lane block, so summing over heads == concat(heads).
    """
    num_heads = len(k_heads)
    B, Sq, D = q.shape
    dk = D // num_heads
    qs = q * (1.0 / math.sqrt(dk))

    # Per-head scores, each a B-batched einsum (single batch dim -> Mosaic-native).
    scores = jnp.stack(
        [jnp.einsum('bqd,bkd->bqk', qs, k_heads[h],
                    preferred_element_type=jnp.float32)
         for h in range(num_heads)],
        axis=0)                                           # (H, B, Sq, Sk)
    scores = scores + bias                                # additive mask, single add
    scores = scores - jnp.max(scores, axis=-1, keepdims=True)
    p = jnp.exp(scores)
    p = p * pl.reciprocal(jnp.sum(p, axis=-1, keepdims=True), approx=True)

    # Context: per-head masked V keeps each head's output in its own lane block, so the
    # running sum over heads is exactly concat(heads); finish with one output matmul.
    ctx = jnp.einsum('bqk,bkd->bqd', p[0], v_heads[0],
                     preferred_element_type=jnp.float32)
    for h in range(1, num_heads):
        ctx = ctx + jnp.einsum('bqk,bkd->bqd', p[h], v_heads[h],
                               preferred_element_type=jnp.float32)
    out = jnp.dot(ctx.reshape(B * Sq, D), wo,
                  preferred_element_type=jnp.float32) + bo
    return out.reshape(B, Sq, D)


def composite_decoder_kernel(values_ref, memory_ref, tgt_bias_ref, src_bias_ref,
                             head_sel_ref,
                             w_sa_qkv_ref, b_sa_qkv_ref, w_sa_o_ref, b_sa_o_ref,
                             w_xa_q_ref, b_xa_q_ref, w_xa_kv_ref, b_xa_kv_ref,
                             w_xa_o_ref, b_xa_o_ref,
                             w1_ref, b1_ref, w2_ref, b2_ref,
                             out_ref, *, num_layers, num_heads):
    B, S, D = values_ref.shape

    x = values_ref[...].astype(jnp.float32)
    mem = memory_ref[...].astype(jnp.float32)
    tgt_bias = tgt_bias_ref[...]
    src_bias = src_bias_ref[...]
    head_sel = head_sel_ref[...]            # (H, 1, D) per-head feature selectors

    w_sa_qkv = w_sa_qkv_ref[...]; b_sa_qkv = b_sa_qkv_ref[...]
    w_sa_o = w_sa_o_ref[...];     b_sa_o = b_sa_o_ref[...]
    w_xa_q = w_xa_q_ref[...];     b_xa_q = b_xa_q_ref[...]
    w_xa_kv = w_xa_kv_ref[...];   b_xa_kv = b_xa_kv_ref[...]
    w_xa_o = w_xa_o_ref[...];     b_xa_o = b_xa_o_ref[...]
    w1 = w1_ref[...]; b1 = b1_ref[...]
    w2 = w2_ref[...]; b2 = b2_ref[...]

    # Hoisted out of the layer loop: weights are shared across layers and `mem` never
    # changes, so source-attention K/V projections (and head packing) are loop-invariant.
    kv_mem = _proj(mem, w_xa_kv, b_xa_kv)                 # (B, S_kv, 2D), one fused matmul
    k_mem, v_mem = kv_mem[..., :D], kv_mem[..., D:]
    k_mem_h = [k_mem * head_sel[h] for h in range(num_heads)]
    v_mem_h = [v_mem * head_sel[h] for h in range(num_heads)]

    # Identical weights every layer: CompositeDecoder uses [deepcopy(layer)] * num_layers.
    for _ in range(num_layers):
        # --- self-attention sublayer (fused QKV projection) ---
        xn = _batchnorm1d(x)
        qkv = _proj(xn, w_sa_qkv, b_sa_qkv)               # (B, S, 3D), one fused matmul
        q, k, v = qkv[..., :D], qkv[..., D:2 * D], qkv[..., 2 * D:]
        k_h = [k * head_sel[h] for h in range(num_heads)]
        v_h = [v * head_sel[h] for h in range(num_heads)]
        x = x + _mha(q, k_h, v_h, tgt_bias, w_sa_o, b_sa_o)

        # --- source-attention sublayer (memory K/V hoisted above) ---
        xn = _batchnorm1d(x)
        q = _proj(xn, w_xa_q, b_xa_q)
        x = x + _mha(q, k_mem_h, v_mem_h, src_bias, w_xa_o, b_xa_o)

        # --- position-wise feed-forward sublayer ---
        xn = _batchnorm1d(x)
        x = x + _ffn(xn, w1, b1, w2, b2)

    out_ref[...] = _batchnorm1d(x).astype(out_ref.dtype)


def composite_decoder(values, memory, src_mask, tgt_mask, params, *,
                      num_layers, num_heads):
    attn_w, attn_b, w1, b1, w2, b2 = params
    B, S, D = values.shape
    S_kv = memory.shape[1]
    dk = D // num_heads

    # --- restack weights (wrapper-side, plain XLA): fused QKV / fused memory-KV ---
    w_sa_qkv = jnp.concatenate([attn_w[0, 0], attn_w[0, 1], attn_w[0, 2]], axis=1)  # (D,3D)
    b_sa_qkv = jnp.concatenate([attn_b[0, 0], attn_b[0, 1], attn_b[0, 2]], axis=1)  # (1,3D)
    w_sa_o, b_sa_o = attn_w[0, 3], attn_b[0, 3]
    w_xa_q, b_xa_q = attn_w[1, 0], attn_b[1, 0]
    w_xa_kv = jnp.concatenate([attn_w[1, 1], attn_w[1, 2]], axis=1)                 # (D,2D)
    b_xa_kv = jnp.concatenate([attn_b[1, 1], attn_b[1, 2]], axis=1)                 # (1,2D)
    w_xa_o, b_xa_o = attn_w[1, 3], attn_b[1, 3]

    # --- additive attention-mask biases, pre-broadcast over heads & query rows ---
    def to_bias(mask, s_kv):
        bias = jnp.where(mask == 0, _NEG_INF, 0.0).astype(jnp.float32)   # (B, Sm, s_kv)
        return jnp.broadcast_to(bias[None, :, :, :], (num_heads, B, S, s_kv))

    tgt_bias = to_bias(tgt_mask, S)        # (H, B, S, S)
    src_bias = to_bias(src_mask, S_kv)     # (H, B, S, S_kv)

    # Per-head feature selector: head_sel[h, 0, d] = 1.0 iff feature d belongs to head h.
    head_sel = (jnp.arange(D)[None, :] // dk == jnp.arange(num_heads)[:, None]
                ).astype(jnp.float32)[:, None, :]                        # (H, 1, D)

    inputs = (values, memory, tgt_bias, src_bias, head_sel,
              w_sa_qkv, b_sa_qkv, w_sa_o, b_sa_o,
              w_xa_q, b_xa_q, w_xa_kv, b_xa_kv, w_xa_o, b_xa_o,
              w1, b1, w2, b2)

    kernel = functools.partial(
        composite_decoder_kernel, num_layers=num_layers, num_heads=num_heads)

    # Tiny problem (~100 KB working set): grid=(1,), every operand is one full-array
    # VMEM block — no tiling / pipelining needed on any TPU generation.
    in_specs = [
        pl.BlockSpec(a.shape, (lambda i, nd=a.ndim: (0,) * nd)) for a in inputs
    ]
    out_spec = pl.BlockSpec((B, S, D), lambda i: (0, 0, 0))

    return pl.pallas_call(
        kernel,
        out_shape=jax.ShapeDtypeStruct((B, S, D), jnp.float32),
        grid=(1,),
        in_specs=in_specs,
        out_specs=out_spec,
        compiler_params=pltpu.CompilerParams(
            dimension_semantics=("arbitrary",)),
    )(*inputs)


def init_params(key, d_model, d_ff):
    ks = jax.random.split(key, 6)
    attn_w = 0.1 * jax.random.normal(ks[0], (2, 4, d_model, d_model), jnp.float32)
    attn_b = 0.02 * jax.random.normal(ks[1], (2, 4, 1, d_model), jnp.float32)
    w1 = 0.1 * jax.random.normal(ks[2], (d_model, d_ff), jnp.float32)
    b1 = 0.02 * jax.random.normal(ks[3], (1, d_ff), jnp.float32)
    w2 = 0.1 * jax.random.normal(ks[4], (d_ff, d_model), jnp.float32)
    b2 = 0.02 * jax.random.normal(ks[5], (1, d_model), jnp.float32)
    return attn_w, attn_b, w1, b1, w2, b2


if __name__ == "__main__":
    B, S, D = 2, 16, 16          # S == D == `size` (required by the BatchNorm1d quirk)
    H = 4                        # heads, d_k = 4
    F = 32                       # FFN hidden dim
    NUM_LAYERS = 2

    key = jax.random.PRNGKey(0)
    k_v, k_m, k_p = jax.random.split(key, 3)

    values = jax.random.normal(k_v, (B, S, D), jnp.float32)
    memory = jax.random.normal(k_m, (B, S, D), jnp.float32)

    # tgt_mask: causal (B, S, S); src_mask: padding (B, 1, S), batch 1 pads last 4.
    causal = jnp.tril(jnp.ones((S, S), jnp.float32))
    tgt_mask = jnp.broadcast_to(causal[None, :, :], (B, S, S)).astype(jnp.float32)
    pos = jnp.arange(S)[None, None, :]
    valid_len = jnp.array([S, S - 4])[:, None, None]
    src_mask = (pos < valid_len).astype(jnp.float32)            # (B, 1, S)

    params = init_params(k_p, D, F)

    out = composite_decoder(values, memory, src_mask, tgt_mask, params,
                            num_layers=NUM_LAYERS, num_heads=H)
    out = jax.block_until_ready(out)

    assert out.shape == (B, S, D)
    assert bool(jnp.all(jnp.isfinite(out)))
    print("KERNEL_OK")
</pallas_src>

<mosaic_0001>
module attributes {stable_mosaic.version = 11 : i64} {
  func.func @composite_decoder_kernel(%arg0: i32, %arg1: memref<2x16x16xf32, #tpu.memory_space<vmem>>, %arg2: memref<2x16x16xf32, #tpu.memory_space<vmem>>, %arg3: memref<4x2x16x16xf32, #tpu.memory_space<vmem>>, %arg4: memref<4x2x16x16xf32, #tpu.memory_space<vmem>>, %arg5: memref<4x1x16xf32, #tpu.memory_space<vmem>>, %arg6: memref<16x48xf32, #tpu.memory_space<vmem>>, %arg7: memref<1x48xf32, #tpu.memory_space<vmem>>, %arg8: memref<16x16xf32, #tpu.memory_space<vmem>>, %arg9: memref<1x16xf32, #tpu.memory_space<vmem>>, %arg10: memref<16x16xf32, #tpu.memory_space<vmem>>, %arg11: memref<1x16xf32, #tpu.memory_space<vmem>>, %arg12: memref<16x32xf32, #tpu.memory_space<vmem>>, %arg13: memref<1x32xf32, #tpu.memory_space<vmem>>, %arg14: memref<16x16xf32, #tpu.memory_space<vmem>>, %arg15: memref<1x16xf32, #tpu.memory_space<vmem>>, %arg16: memref<16x32xf32, #tpu.memory_space<vmem>>, %arg17: memref<1x32xf32, #tpu.memory_space<vmem>>, %arg18: memref<32x16xf32, #tpu.memory_space<vmem>>, %arg19: memref<1x16xf32, #tpu.memory_space<vmem>>, %arg20: memref<2x16x16xf32, #tpu.memory_space<vmem>>) attributes {dimension_semantics = [#tpu.dimension_semantics<arbitrary>], iteration_bounds = array<i64: 1>, scalar_prefetch = 0 : i64, scratch_operands = 0 : i64, tpu.core_type = #tpu.core_type<tc>, window_params = [{pipeline_mode = #tpu.pipeline_mode<synchronous>, transform_indices = @transform_0, window_bounds = array<i64: 2, 16, 16>}, {pipeline_mode = #tpu.pipeline_mode<synchronous>, transform_indices = @transform_1, window_bounds = array<i64: 2, 16, 16>}, {pipeline_mode = #tpu.pipeline_mode<synchronous>, transform_indices = @transform_2, window_bounds = array<i64: 4, 2, 16, 16>}, {pipeline_mode = #tpu.pipeline_mode<synchronous>, transform_indices = @transform_3, window_bounds = array<i64: 4, 2, 16, 16>}, {pipeline_mode = #tpu.pipeline_mode<synchronous>, transform_indices = @transform_4, window_bounds = array<i64: 4, 1, 16>}, {pipeline_mode = #tpu.pipeline_mode<synchronous>, transform_indices = @transform_5, window_bounds = array<i64: 16, 48>}, {pipeline_mode = #tpu.pipeline_mode<synchronous>, transform_indices = @transform_6, window_bounds = array<i64: 1, 48>}, {pipeline_mode = #tpu.pipeline_mode<synchronous>, transform_indices = @transform_7, window_bounds = array<i64: 16, 16>}, {pipeline_mode = #tpu.pipeline_mode<synchronous>, transform_indices = @transform_8, window_bounds = array<i64: 1, 16>}, {pipeline_mode = #tpu.pipeline_mode<synchronous>, transform_indices = @transform_9, window_bounds = array<i64: 16, 16>}, {pipeline_mode = #tpu.pipeline_mode<synchronous>, transform_indices = @transform_10, window_bounds = array<i64: 1, 16>}, {pipeline_mode = #tpu.pipeline_mode<synchronous>, transform_indices = @transform_11, window_bounds = array<i64: 16, 32>}, {pipeline_mode = #tpu.pipeline_mode<synchronous>, transform_indices = @transform_12, window_bounds = array<i64: 1, 32>}, {pipeline_mode = #tpu.pipeline_mode<synchronous>, transform_indices = @transform_13, window_bounds = array<i64: 16, 16>}, {pipeline_mode = #tpu.pipeline_mode<synchronous>, transform_indices = @transform_14, window_bounds = array<i64: 1, 16>}, {pipeline_mode = #tpu.pipeline_mode<synchronous>, transform_indices = @transform_15, window_bounds = array<i64: 16, 32>}, {pipeline_mode = #tpu.pipeline_mode<synchronous>, transform_indices = @transform_16, window_bounds = array<i64: 1, 32>}, {pipeline_mode = #tpu.pipeline_mode<synchronous>, transform_indices = @transform_17, window_bounds = array<i64: 32, 16>}, {pipeline_mode = #tpu.pipeline_mode<synchronous>, transform_indices = @transform_18, window_bounds = array<i64: 1, 16>}, {pipeline_mode = #tpu.pipeline_mode<synchronous>, transform_indices = @transform_19, window_bounds = array<i64: 2, 16, 16>}]} {
    %c0 = arith.constant 0 : index
    %c0_0 = arith.constant 0 : index
    %c0_1 = arith.constant 0 : index
    %0 = vector.load %arg1[%c0, %c0_0, %c0_1] : memref<2x16x16xf32, #tpu.memory_space<vmem>>, vector<2x16x16xf32>
    %c0_2 = arith.constant 0 : index
    %c0_3 = arith.constant 0 : index
    %c0_4 = arith.constant 0 : index
    %1 = vector.load %arg2[%c0_2, %c0_3, %c0_4] : memref<2x16x16xf32, #tpu.memory_space<vmem>>, vector<2x16x16xf32>
    %c0_5 = arith.constant 0 : index
    %c0_6 = arith.constant 0 : index
    %c0_7 = arith.constant 0 : index
    %c0_8 = arith.constant 0 : index
    %2 = vector.load %arg3[%c0_5, %c0_6, %c0_7, %c0_8] : memref<4x2x16x16xf32, #tpu.memory_space<vmem>>, vector<4x2x16x16xf32>
    %c0_9 = arith.constant 0 : index
    %c0_10 = arith.constant 0 : index
    %c0_11 = arith.constant 0 : index
    %c0_12 = arith.constant 0 : index
    %3 = vector.load %arg4[%c0_9, %c0_10, %c0_11, %c0_12] : memref<4x2x16x16xf32, #tpu.memory_space<vmem>>, vector<4x2x16x16xf32>
    %c0_13 = arith.constant 0 : index
    %c0_14 = arith.constant 0 : index
    %c0_15 = arith.constant 0 : index
    %4 = vector.load %arg5[%c0_13, %c0_14, %c0_15] : memref<4x1x16xf32, #tpu.memory_space<vmem>>, vector<4x1x16xf32>
    %c0_16 = arith.constant 0 : index
    %c0_17 = arith.constant 0 : index
    %5 = vector.load %arg6[%c0_16, %c0_17] : memref<16x48xf32, #tpu.memory_space<vmem>>, vector<16x48xf32>
    %c0_18 = arith.constant 0 : index
    %c0_19 = arith.constant 0 : index
    %6 = vector.load %arg7[%c0_18, %c0_19] : memref<1x48xf32, #tpu.memory_space<vmem>>, vector<1x48xf32>
    %c0_20 = arith.constant 0 : index
    %c0_21 = arith.constant 0 : index
    %7 = vector.load %arg8[%c0_20, %c0_21] : memref<16x16xf32, #tpu.memory_space<vmem>>, vector<16x16xf32>
    %c0_22 = arith.constant 0 : index
    %c0_23 = arith.constant 0 : index
    %8 = vector.load %arg9[%c0_22, %c0_23] : memref<1x16xf32, #tpu.memory_space<vmem>>, vector<1x16xf32>
    %c0_24 = arith.constant 0 : index
    %c0_25 = arith.constant 0 : index
    %9 = vector.load %arg10[%c0_24, %c0_25] : memref<16x16xf32, #tpu.memory_space<vmem>>, vector<16x16xf32>
    %c0_26 = arith.constant 0 : index
    %c0_27 = arith.constant 0 : index
    %10 = vector.load %arg11[%c0_26, %c0_27] : memref<1x16xf32, #tpu.memory_space<vmem>>, vector<1x16xf32>
    %c0_28 = arith.constant 0 : index
    %c0_29 = arith.constant 0 : index
    %11 = vector.load %arg12[%c0_28, %c0_29] : memref<16x32xf32, #tpu.memory_space<vmem>>, vector<16x32xf32>
    %c0_30 = arith.constant 0 : index
    %c0_31 = arith.constant 0 : index
    %12 = vector.load %arg13[%c0_30, %c0_31] : memref<1x32xf32, #tpu.memory_space<vmem>>, vector<1x32xf32>
    %c0_32 = arith.constant 0 : index
    %c0_33 = arith.constant 0 : index
    %13 = vector.load %arg14[%c0_32, %c0_33] : memref<16x16xf32, #tpu.memory_space<vmem>>, vector<16x16xf32>
    %c0_34 = arith.constant 0 : index
    %c0_35 = arith.constant 0 : index
    %14 = vector.load %arg15[%c0_34, %c0_35] : memref<1x16xf32, #tpu.memory_space<vmem>>, vector<1x16xf32>
    %c0_36 = arith.constant 0 : index
    %c0_37 = arith.constant 0 : index
    %15 = vector.load %arg16[%c0_36, %c0_37] : memref<16x32xf32, #tpu.memory_space<vmem>>, vector<16x32xf32>
    %c0_38 = arith.constant 0 : index
    %c0_39 = arith.constant 0 : index
    %16 = vector.load %arg17[%c0_38, %c0_39] : memref<1x32xf32, #tpu.memory_space<vmem>>, vector<1x32xf32>
    %c0_40 = arith.constant 0 : index
    %c0_41 = arith.constant 0 : index
    %17 = vector.load %arg18[%c0_40, %c0_41] : memref<32x16xf32, #tpu.memory_space<vmem>>, vector<32x16xf32>
    %c0_42 = arith.constant 0 : index
    %c0_43 = arith.constant 0 : index
    %18 = vector.load %arg19[%c0_42, %c0_43] : memref<1x16xf32, #tpu.memory_space<vmem>>, vector<1x16xf32>
    %19 = vector.shape_cast %1 : vector<2x16x16xf32> to vector<32x16xf32>
    %cst = arith.constant dense<0.000000e+00> : vector<32x32xf32>
    %20 = tpu.matmul %19, %11, %cst {dimension_numbers = #tpu.dot_dimension_numbers<[1], [0], [0], [1], [0, 0, 1, 1], [], []>} : vector<32x16xf32>, vector<16x32xf32>, vector<32x32xf32> -> vector<32x32xf32>
    %21 = vector.broadcast %12 : vector<1x32xf32> to vector<32x32xf32>
    %22 = arith.addf %20, %21 : vector<32x32xf32>
    %23 = vector.shape_cast %22 : vector<32x32xf32> to vector<2x16x32xf32>
    %24 = vector.extract_strided_slice %23 {offsets = [0, 0, 0], sizes = [2, 16, 16], strides = [1, 1, 1]} : vector<2x16x32xf32> to vector<2x16x16xf32>
    %25 = vector.extract_strided_slice %23 {offsets = [0, 0, 16], sizes = [2, 16, 16], strides = [1, 1, 1]} : vector<2x16x32xf32> to vector<2x16x16xf32>
    %26 = vector.extract_strided_slice %4 {offsets = [0, 0, 0], sizes = [1, 1, 16], strides = [1, 1, 1]} : vector<4x1x16xf32> to vector<1x1x16xf32>
    %27 = vector.shape_cast %26 : vector<1x1x16xf32> to vector<1x16xf32>
    %28 = vector.shape_cast %27 : vector<1x16xf32> to vector<1x1x16xf32>
    %29 = vector.broadcast %28 : vector<1x1x16xf32> to vector<2x16x16xf32>
    %30 = arith.mulf %24, %29 : vector<2x16x16xf32>
    %31 = vector.extract_strided_slice %4 {offsets = [1, 0, 0], sizes = [1, 1, 16], strides = [1, 1, 1]} : vector<4x1x16xf32> to vector<1x1x16xf32>
    %32 = vector.shape_cast %31 : vector<1x1x16xf32> to vector<1x16xf32>
    %33 = vector.shape_cast %32 : vector<1x16xf32> to vector<1x1x16xf32>
    %34 = vector.broadcast %33 : vector<1x1x16xf32> to vector<2x16x16xf32>
    %35 = arith.mulf %24, %34 : vector<2x16x16xf32>
    %36 = vector.extract_strided_slice %4 {offsets = [2, 0, 0], sizes = [1, 1, 16], strides = [1, 1, 1]} : vector<4x1x16xf32> to vector<1x1x16xf32>
    %37 = vector.shape_cast %36 : vector<1x1x16xf32> to vector<1x16xf32>
    %38 = vector.shape_cast %37 : vector<1x16xf32> to vector<1x1x16xf32>
    %39 = vector.broadcast %38 : vector<1x1x16xf32> to vector<2x16x16xf32>
    %40 = arith.mulf %24, %39 : vector<2x16x16xf32>
    %41 = vector.extract_strided_slice %4 {offsets = [3, 0, 0], sizes = [1, 1, 16], strides = [1, 1, 1]} : vector<4x1x16xf32> to vector<1x1x16xf32>
    %42 = vector.shape_cast %41 : vector<1x1x16xf32> to vector<1x16xf32>
    %43 = vector.shape_cast %42 : vector<1x16xf32> to vector<1x1x16xf32>
    %44 = vector.broadcast %43 : vector<1x1x16xf32> to vector<2x16x16xf32>
    %45 = arith.mulf %24, %44 : vector<2x16x16xf32>
    %46 = vector.extract_strided_slice %4 {offsets = [0, 0, 0], sizes = [1, 1, 16], strides = [1, 1, 1]} : vector<4x1x16xf32> to vector<1x1x16xf32>
    %47 = vector.shape_cast %46 : vector<1x1x16xf32> to vector<1x16xf32>
    %48 = vector.shape_cast %47 : vector<1x16xf32> to vector<1x1x16xf32>
    %49 = vector.broadcast %48 : vector<1x1x16xf32> to vector<2x16x16xf32>
    %50 = arith.mulf %25, %49 : vector<2x16x16xf32>
    %51 = vector.extract_strided_slice %4 {offsets = [1, 0, 0], sizes = [1, 1, 16], strides = [1, 1, 1]} : vector<4x1x16xf32> to vector<1x1x16xf32>
    %52 = vector.shape_cast %51 : vector<1x1x16xf32> to vector<1x16xf32>
    %53 = vector.shape_cast %52 : vector<1x16xf32> to vector<1x1x16xf32>
    %54 = vector.broadcast %53 : vector<1x1x16xf32> to vector<2x16x16xf32>
    %55 = arith.mulf %25, %54 : vector<2x16x16xf32>
    %56 = vector.extract_strided_slice %4 {offsets = [2, 0, 0], sizes = [1, 1, 16], strides = [1, 1, 1]} : vector<4x1x16xf32> to vector<1x1x16xf32>
    %57 = vector.shape_cast %56 : vector<1x1x16xf32> to vector<1x16xf32>
    %58 = vector.shape_cast %57 : vector<1x16xf32> to vector<1x1x16xf32>
    %59 = vector.broadcast %58 : vector<1x1x16xf32> to vector<2x16x16xf32>
    %60 = arith.mulf %25, %59 : vector<2x16x16xf32>
    %61 = vector.extract_strided_slice %4 {offsets = [3, 0, 0], sizes = [1, 1, 16], strides = [1, 1, 1]} : vector<4x1x16xf32> to vector<1x1x16xf32>
    %62 = vector.shape_cast %61 : vector<1x1x16xf32> to vector<1x16xf32>
    %63 = vector.shape_cast %62 : vector<1x16xf32> to vector<1x1x16xf32>
    %64 = vector.broadcast %63 : vector<1x1x16xf32> to vector<2x16x16xf32>
    %65 = arith.mulf %25, %64 : vector<2x16x16xf32>
    %cst_44 = arith.constant dense<0.000000e+00> : vector<16xf32>
    %66 = vector.multi_reduction <add>, %0, %cst_44 [0, 2] : vector<2x16x16xf32> to vector<16xf32>
    %67 = vector.shape_cast %66 : vector<16xf32> to vector<1x16x1xf32>
    %cst_45 = arith.constant 3.200000e+01 : f32
    %68 = vector.broadcast %cst_45 : f32 to vector<1x16x1xf32>
    %69 = arith.divf %67, %68 : vector<1x16x1xf32>
    %70 = vector.broadcast %69 : vector<1x16x1xf32> to vector<2x16x16xf32>
    %71 = arith.subf %0, %70 : vector<2x16x16xf32>
    %72 = arith.mulf %71, %71 : vector<2x16x16xf32>
    %cst_46 = arith.constant dense<0.000000e+00> : vector<16xf32>
    %73 = vector.multi_reduction <add>, %72, %cst_46 [0, 2] : vector<2x16x16xf32> to vector<16xf32>
    %74 = vector.shape_cast %73 : vector<16xf32> to vector<1x16x1xf32>
    %cst_47 = arith.constant 3.200000e+01 : f32
    %75 = vector.broadcast %cst_47 : f32 to vector<1x16x1xf32>
    %76 = arith.divf %74, %75 : vector<1x16x1xf32>
    %77 = vector.broadcast %69 : vector<1x16x1xf32> to vector<2x16x16xf32>
    %78 = arith.subf %0, %77 : vector<2x16x16xf32>
    %cst_48 = arith.constant 9.99999974E-6 : f32
    %79 = vector.broadcast %cst_48 : f32 to vector<1x16x1xf32>
    %80 = arith.addf %76, %79 : vector<1x16x1xf32>
    %81 = math.rsqrt %80 : vector<1x16x1xf32>
    %82 = vector.broadcast %81 : vector<1x16x1xf32> to vector<2x16x16xf32>
    %83 = arith.mulf %78, %82 : vector<2x16x16xf32>
    %84 = vector.shape_cast %83 : vector<2x16x16xf32> to vector<32x16xf32>
    %cst_49 = arith.constant dense<0.000000e+00> : vector<32x48xf32>
    %85 = tpu.matmul %84, %5, %cst_49 {dimension_numbers = #tpu.dot_dimension_numbers<[1], [0], [0], [1], [0, 0, 1, 1], [], []>} : vector<32x16xf32>, vector<16x48xf32>, vector<32x48xf32> -> vector<32x48xf32>
    %86 = vector.broadcast %6 : vector<1x48xf32> to vector<32x48xf32>
    %87 = arith.addf %85, %86 : vector<32x48xf32>
    %88 = vector.shape_cast %87 : vector<32x48xf32> to vector<2x16x48xf32>
    %89 = vector.extract_strided_slice %88 {offsets = [0, 0, 0], sizes = [2, 16, 16], strides = [1, 1, 1]} : vector<2x16x48xf32> to vector<2x16x16xf32>
    %90 = vector.extract_strided_slice %88 {offsets = [0, 0, 16], sizes = [2, 16, 16], strides = [1, 1, 1]} : vector<2x16x48xf32> to vector<2x16x16xf32>
    %91 = vector.extract_strided_slice %88 {offsets = [0, 0, 32], sizes = [2, 16, 16], strides = [1, 1, 1]} : vector<2x16x48xf32> to vector<2x16x16xf32>
    %92 = vector.extract_strided_slice %4 {offsets = [0, 0, 0], sizes = [1, 1, 16], strides = [1, 1, 1]} : vector<4x1x16xf32> to vector<1x1x16xf32>
    %93 = vector.shape_cast %92 : vector<1x1x16xf32> to vector<1x16xf32>
    %94 = vector.shape_cast %93 : vector<1x16xf32> to vector<1x1x16xf32>
    %95 = vector.broadcast %94 : vector<1x1x16xf32> to vector<2x16x16xf32>
    %96 = arith.mulf %90, %95 : vector<2x16x16xf32>
    %97 = vector.extract_strided_slice %4 {offsets = [1, 0, 0], sizes = [1, 1, 16], strides = [1, 1, 1]} : vector<4x1x16xf32> to vector<1x1x16xf32>
    %98 = vector.shape_cast %97 : vector<1x1x16xf32> to vector<1x16xf32>
    %99 = vector.shape_cast %98 : vector<1x16xf32> to vector<1x1x16xf32>
    %100 = vector.broadcast %99 : vector<1x1x16xf32> to vector<2x16x16xf32>
    %101 = arith.mulf %90, %100 : vector<2x16x16xf32>
    %102 = vector.extract_strided_slice %4 {offsets = [2, 0, 0], sizes = [1, 1, 16], strides = [1, 1, 1]} : vector<4x1x16xf32> to vector<1x1x16xf32>
    %103 = vector.shape_cast %102 : vector<1x1x16xf32> to vector<1x16xf32>
    %104 = vector.shape_cast %103 : vector<1x16xf32> to vector<1x1x16xf32>
    %105 = vector.broadcast %104 : vector<1x1x16xf32> to vector<2x16x16xf32>
    %106 = arith.mulf %90, %105 : vector<2x16x16xf32>
    %107 = vector.extract_strided_slice %4 {offsets = [3, 0, 0], sizes = [1, 1, 16], strides = [1, 1, 1]} : vector<4x1x16xf32> to vector<1x1x16xf32>
    %108 = vector.shape_cast %107 : vector<1x1x16xf32> to vector<1x16xf32>
    %109 = vector.shape_cast %108 : vector<1x16xf32> to vector<1x1x16xf32>
    %110 = vector.broadcast %109 : vector<1x1x16xf32> to vector<2x16x16xf32>
    %111 = arith.mulf %90, %110 : vector<2x16x16xf32>
    %112 = vector.extract_strided_slice %4 {offsets = [0, 0, 0], sizes = [1, 1, 16], strides = [1, 1, 1]} : vector<4x1x16xf32> to vector<1x1x16xf32>
    %113 = vector.shape_cast %112 : vector<1x1x16xf32> to vector<1x16xf32>
    %114 = vector.shape_cast %113 : vector<1x16xf32> to vector<1x1x16xf32>
    %115 = vector.broadcast %114 : vector<1x1x16xf32> to vector<2x16x16xf32>
    %116 = arith.mulf %91, %115 : vector<2x16x16xf32>
    %117 = vector.extract_strided_slice %4 {offsets = [1, 0, 0], sizes = [1, 1, 16], strides = [1, 1, 1]} : vector<4x1x16xf32> to vector<1x1x16xf32>
    %118 = vector.shape_cast %117 : vector<1x1x16xf32> to vector<1x16xf32>
    %119 = vector.shape_cast %118 : vector<1x16xf32> to vector<1x1x16xf32>
    %120 = vector.broadcast %119 : vector<1x1x16xf32> to vector<2x16x16xf32>
    %121 = arith.mulf %91, %120 : vector<2x16x16xf32>
    %122 = vector.extract_strided_slice %4 {offsets = [2, 0, 0], sizes = [1, 1, 16], strides = [1, 1, 1]} : vector<4x1x16xf32> to vector<1x1x16xf32>
    %123 = vector.shape_cast %122 : vector<1x1x16xf32> to vector<1x16xf32>
    %124 = vector.shape_cast %123 : vector<1x16xf32> to vector<1x1x16xf32>
    %125 = vector.broadcast %124 : vector<1x1x16xf32> to vector<2x16x16xf32>
    %126 = arith.mulf %91, %125 : vector<2x16x16xf32>
    %127 = vector.extract_strided_slice %4 {offsets = [3, 0, 0], sizes = [1, 1, 16], strides = [1, 1, 1]} : vector<4x1x16xf32> to vector<1x1x16xf32>
    %128 = vector.shape_cast %127 : vector<1x1x16xf32> to vector<1x16xf32>
    %129 = vector.shape_cast %128 : vector<1x16xf32> to vector<1x1x16xf32>
    %130 = vector.broadcast %129 : vector<1x1x16xf32> to vector<2x16x16xf32>
    %131 = arith.mulf %91, %130 : vector<2x16x16xf32>
    %cst_50 = arith.constant 5.000000e-01 : f32
    %132 = vector.broadcast %cst_50 : f32 to vector<2x16x16xf32>
    %133 = arith.mulf %89, %132 : vector<2x16x16xf32>
    "tpu.trace_start"() <{level = 10 : i32, message = "bqd,bkd->bqk"}> : () -> ()
    %cst_51 = arith.constant dense<0.000000e+00> : vector<2x16x16xf32>
    %134 = tpu.matmul %133, %96, %cst_51 {dimension_numbers = #tpu.dot_dimension_numbers<[2], [2], [1], [1], [0, 0, 0, 1, 1, 1], [0], [0]>} : vector<2x16x16xf32>, vector<2x16x16xf32>, vector<2x16x16xf32> -> vector<2x16x16xf32>
    %cst_52 = arith.constant dense<0.000000e+00> : vector<2x16x16xf32>
    %135 = tpu.matmul %133, %101, %cst_52 {dimension_numbers = #tpu.dot_dimension_numbers<[2], [2], [1], [1], [0, 0, 0, 1, 1, 1], [0], [0]>} : vector<2x16x16xf32>, vector<2x16x16xf32>, vector<2x16x16xf32> -> vector<2x16x16xf32>
    %cst_53 = arith.constant dense<0.000000e+00> : vector<2x16x16xf32>
    %136 = tpu.matmul %133, %106, %cst_53 {dimension_numbers = #tpu.dot_dimension_numbers<[2], [2], [1], [1], [0, 0, 0, 1, 1, 1], [0], [0]>} : vector<2x16x16xf32>, vector<2x16x16xf32>, vector<2x16x16xf32> -> vector<2x16x16xf32>
    %cst_54 = arith.constant dense<0.000000e+00> : vector<2x16x16xf32>
    %137 = tpu.matmul %133, %111, %cst_54 {dimension_numbers = #tpu.dot_dimension_numbers<[2], [2], [1], [1], [0, 0, 0, 1, 1, 1], [0], [0]>} : vector<2x16x16xf32>, vector<2x16x16xf32>, vector<2x16x16xf32> -> vector<2x16x16xf32>
    "tpu.trace_stop"() : () -> ()
    %138 = vector.shape_cast %134 : vector<2x16x16xf32> to vector<1x2x16x16xf32>
    %139 = vector.shape_cast %135 : vector<2x16x16xf32> to vector<1x2x16x16xf32>
    %140 = vector.shape_cast %136 : vector<2x16x16xf32> to vector<1x2x16x16xf32>
    %141 = vector.shape_cast %137 : vector<2x16x16xf32> to vector<1x2x16x16xf32>
    %142 = tpu.concatenate %138, %139, %140, %141 in 0 : vector<1x2x16x16xf32>, vector<1x2x16x16xf32>, vector<1x2x16x16xf32>, vector<1x2x16x16xf32> -> vector<4x2x16x16xf32>
    %143 = arith.addf %142, %2 : vector<4x2x16x16xf32>
    %cst_55 = arith.constant dense<0xFF800000> : vector<4x2x16xf32>
    %144 = vector.multi_reduction <maximumf>, %143, %cst_55 [3] : vector<4x2x16x16xf32> to vector<4x2x16xf32>
    %145 = vector.shape_cast %144 : vector<4x2x16xf32> to vector<4x2x16x1xf32>
    %146 = vector.broadcast %145 : vector<4x2x16x1xf32> to vector<4x2x16x16xf32>
    %147 = arith.subf %143, %146 : vector<4x2x16x16xf32>
    %148 = math.exp %147 : vector<4x2x16x16xf32>
    %cst_56 = arith.constant dense<0.000000e+00> : vector<4x2x16xf32>
    %149 = vector.multi_reduction <add>, %148, %cst_56 [3] : vector<4x2x16x16xf32> to vector<4x2x16xf32>
    %150 = vector.shape_cast %149 : vector<4x2x16xf32> to vector<4x2x16x1xf32>
    %151 = tpu.reciprocal %150 {approx = true} : vector<4x2x16x1xf32> -> vector<4x2x16x1xf32>
    %152 = vector.broadcast %151 : vector<4x2x16x1xf32> to vector<4x2x16x16xf32>
    %153 = arith.mulf %148, %152 : vector<4x2x16x16xf32>
    %154 = vector.extract_strided_slice %153 {offsets = [0, 0, 0, 0], sizes = [1, 2, 16, 16], strides = [1, 1, 1, 1]} : vector<4x2x16x16xf32> to vector<1x2x16x16xf32>
    %155 = vector.shape_cast %154 : vector<1x2x16x16xf32> to vector<2x16x16xf32>
    "tpu.trace_start"() <{level = 10 : i32, message = "bqk,bkd->bqd"}> : () -> ()
    %cst_57 = arith.constant dense<0.000000e+00> : vector<2x16x16xf32>
    %156 = tpu.matmul %155, %116, %cst_57 {dimension_numbers = #tpu.dot_dimension_numbers<[2], [1], [1], [2], [0, 0, 0, 1, 1, 2], [0], [0]>} : vector<2x16x16xf32>, vector<2x16x16xf32>, vector<2x16x16xf32> -> vector<2x16x16xf32>
    "tpu.trace_stop"() : () -> ()
    %157 = vector.extract_strided_slice %153 {offsets = [1, 0, 0, 0], sizes = [1, 2, 16, 16], strides = [1, 1, 1, 1]} : vector<4x2x16x16xf32> to vector<1x2x16x16xf32>
    %158 = vector.shape_cast %157 : vector<1x2x16x16xf32> to vector<2x16x16xf32>
    "tpu.trace_start"() <{level = 10 : i32, message = "bqk,bkd->bqd"}> : () -> ()
    %cst_58 = arith.constant dense<0.000000e+00> : vector<2x16x16xf32>
    %159 = tpu.matmul %158, %121, %cst_58 {dimension_numbers = #tpu.dot_dimension_numbers<[2], [1], [1], [2], [0, 0, 0, 1, 1, 2], [0], [0]>} : vector<2x16x16xf32>, vector<2x16x16xf32>, vector<2x16x16xf32> -> vector<2x16x16xf32>
    "tpu.trace_stop"() : () -> ()
    %160 = arith.addf %156, %159 : vector<2x16x16xf32>
    %161 = vector.extract_strided_slice %153 {offsets = [2, 0, 0, 0], sizes = [1, 2, 16, 16], strides = [1, 1, 1, 1]} : vector<4x2x16x16xf32> to vector<1x2x16x16xf32>
    %162 = vector.shape_cast %161 : vector<1x2x16x16xf32> to vector<2x16x16xf32>
    "tpu.trace_start"() <{level = 10 : i32, message = "bqk,bkd->bqd"}> : () -> ()
    %cst_59 = arith.constant dense<0.000000e+00> : vector<2x16x16xf32>
    %163 = tpu.matmul %162, %126, %cst_59 {dimension_numbers = #tpu.dot_dimension_numbers<[2], [1], [1], [2], [0, 0, 0, 1, 1, 2], [0], [0]>} : vector<2x16x16xf32>, vector<2x16x16xf32>, vector<2x16x16xf32> -> vector<2x16x16xf32>
    "tpu.trace_stop"() : () -> ()
    %164 = arith.addf %160, %163 : vector<2x16x16xf32>
    %165 = vector.extract_strided_slice %153 {offsets = [3, 0, 0, 0], sizes = [1, 2, 16, 16], strides = [1, 1, 1, 1]} : vector<4x2x16x16xf32> to vector<1x2x16x16xf32>
    %166 = vector.shape_cast %165 : vector<1x2x16x16xf32> to vector<2x16x16xf32>
    "tpu.trace_start"() <{level = 10 : i32, message = "bqk,bkd->bqd"}> : () -> ()
    %cst_60 = arith.constant dense<0.000000e+00> : vector<2x16x16xf32>
    %167 = tpu.matmul %166, %131, %cst_60 {dimension_numbers = #tpu.dot_dimension_numbers<[2], [1], [1], [2], [0, 0, 0, 1, 1, 2], [0], [0]>} : vector<2x16x16xf32>, vector<2x16x16xf32>, vector<2x16x16xf32> -> vector<2x16x16xf32>
    "tpu.trace_stop"() : () -> ()
    %168 = arith.addf %164, %167 : vector<2x16x16xf32>
    %169 = vector.shape_cast %168 : vector<2x16x16xf32> to vector<32x16xf32>
    %cst_61 = arith.constant dense<0.000000e+00> : vector<32x16xf32>
    %170 = tpu.matmul %169, %7, %cst_61 {dimension_numbers = #tpu.dot_dimension_numbers<[1], [0], [0], [1], [0, 0, 1, 1], [], []>} : vector<32x16xf32>, vector<16x16xf32>, vector<32x16xf32> -> vector<32x16xf32>
    %171 = vector.broadcast %8 : vector<1x16xf32> to vector<32x16xf32>
    %172 = arith.addf %170, %171 : vector<32x16xf32>
    %173 = vector.shape_cast %172 : vector<32x16xf32> to vector<2x16x16xf32>
    %174 = arith.addf %0, %173 : vector<2x16x16xf32>
    %cst_62 = arith.constant dense<0.000000e+00> : vector<16xf32>
    %175 = vector.multi_reduction <add>, %174, %cst_62 [0, 2] : vector<2x16x16xf32> to vector<16xf32>
    %176 = vector.shape_cast %175 : vector<16xf32> to vector<1x16x1xf32>
    %cst_63 = arith.constant 3.200000e+01 : f32
    %177 = vector.broadcast %cst_63 : f32 to vector<1x16x1xf32>
    %178 = arith.divf %176, %177 : vector<1x16x1xf32>
    %179 = vector.broadcast %178 : vector<1x16x1xf32> to vector<2x16x16xf32>
    %180 = arith.subf %174, %179 : vector<2x16x16xf32>
    %181 = arith.mulf %180, %180 : vector<2x16x16xf32>
    %cst_64 = arith.constant dense<0.000000e+00> : vector<16xf32>
    %182 = vector.multi_reduction <add>, %181, %cst_64 [0, 2] : vector<2x16x16xf32> to vector<16xf32>
    %183 = vector.shape_cast %182 : vector<16xf32> to vector<1x16x1xf32>
    %cst_65 = arith.constant 3.200000e+01 : f32
    %184 = vector.broadcast %cst_65 : f32 to vector<1x16x1xf32>
    %185 = arith.divf %183, %184 : vector<1x16x1xf32>
    %186 = vector.broadcast %178 : vector<1x16x1xf32> to vector<2x16x16xf32>
    %187 = arith.subf %174, %186 : vector<2x16x16xf32>
    %cst_66 = arith.constant 9.99999974E-6 : f32
    %188 = vector.broadcast %cst_66 : f32 to vector<1x16x1xf32>
    %189 = arith.addf %185, %188 : vector<1x16x1xf32>
    %190 = math.rsqrt %189 : vector<1x16x1xf32>
    %191 = vector.broadcast %190 : vector<1x16x1xf32> to vector<2x16x16xf32>
    %192 = arith.mulf %187, %191 : vector<2x16x16xf32>
    %193 = vector.shape_cast %192 : vector<2x16x16xf32> to vector<32x16xf32>
    %cst_67 = arith.constant dense<0.000000e+00> : vector<32x16xf32>
    %194 = tpu.matmul %193, %9, %cst_67 {dimension_numbers = #tpu.dot_dimension_numbers<[1], [0], [0], [1], [0, 0, 1, 1], [], []>} : vector<32x16xf32>, vector<16x16xf32>, vector<32x16xf32> -> vector<32x16xf32>
    %195 = vector.broadcast %10 : vector<1x16xf32> to vector<32x16xf32>
    %196 = arith.addf %194, %195 : vector<32x16xf32>
    %197 = vector.shape_cast %196 : vector<32x16xf32> to vector<2x16x16xf32>
    %cst_68 = arith.constant 5.000000e-01 : f32
    %198 = vector.broadcast %cst_68 : f32 to vector<2x16x16xf32>
    %199 = arith.mulf %197, %198 : vector<2x16x16xf32>
    "tpu.trace_start"() <{level = 10 : i32, message = "bqd,bkd->bqk"}> : () -> ()
    %cst_69 = arith.constant dense<0.000000e+00> : vector<2x16x16xf32>
    %200 = tpu.matmul %199, %30, %cst_69 {dimension_numbers = #tpu.dot_dimension_numbers<[2], [2], [1], [1], [0, 0, 0, 1, 1, 1], [0], [0]>} : vector<2x16x16xf32>, vector<2x16x16xf32>, vector<2x16x16xf32> -> vector<2x16x16xf32>
    %cst_70 = arith.constant dense<0.000000e+00> : vector<2x16x16xf32>
    %201 = tpu.matmul %199, %35, %cst_70 {dimension_numbers = #tpu.dot_dimension_numbers<[2], [2], [1], [1], [0, 0, 0, 1, 1, 1], [0], [0]>} : vector<2x16x16xf32>, vector<2x16x16xf32>, vector<2x16x16xf32> -> vector<2x16x16xf32>
    %cst_71 = arith.constant dense<0.000000e+00> : vector<2x16x16xf32>
    %202 = tpu.matmul %199, %40, %cst_71 {dimension_numbers = #tpu.dot_dimension_numbers<[2], [2], [1], [1], [0, 0, 0, 1, 1, 1], [0], [0]>} : vector<2x16x16xf32>, vector<2x16x16xf32>, vector<2x16x16xf32> -> vector<2x16x16xf32>
    %cst_72 = arith.constant dense<0.000000e+00> : vector<2x16x16xf32>
    %203 = tpu.matmul %199, %45, %cst_72 {dimension_numbers = #tpu.dot_dimension_numbers<[2], [2], [1], [1], [0, 0, 0, 1, 1, 1], [0], [0]>} : vector<2x16x16xf32>, vector<2x16x16xf32>, vector<2x16x16xf32> -> vector<2x16x16xf32>
    "tpu.trace_stop"() : () -> ()
    %204 = vector.shape_cast %200 : vector<2x16x16xf32> to vector<1x2x16x16xf32>
    %205 = vector.shape_cast %201 : vector<2x16x16xf32> to vector<1x2x16x16xf32>
    %206 = vector.shape_cast %202 : vector<2x16x16xf32> to vector<1x2x16x16xf32>
    %207 = vector.shape_cast %203 : vector<2x16x16xf32> to vector<1x2x16x16xf32>
    %208 = tpu.concatenate %204, %205, %206, %207 in 0 : vector<1x2x16x16xf32>, vector<1x2x16x16xf32>, vector<1x2x16x16xf32>, vector<1x2x16x16xf32> -> vector<4x2x16x16xf32>
    %209 = arith.addf %208, %3 : vector<4x2x16x16xf32>
    %cst_73 = arith.constant dense<0xFF800000> : vector<4x2x16xf32>
    %210 = vector.multi_reduction <maximumf>, %209, %cst_73 [3] : vector<4x2x16x16xf32> to vector<4x2x16xf32>
    %211 = vector.shape_cast %210 : vector<4x2x16xf32> to vector<4x2x16x1xf32>
    %212 = vector.broadcast %211 : vector<4x2x16x1xf32> to vector<4x2x16x16xf32>
    %213 = arith.subf %209, %212 : vector<4x2x16x16xf32>
    %214 = math.exp %213 : vector<4x2x16x16xf32>
    %cst_74 = arith.constant dense<0.000000e+00> : vector<4x2x16xf32>
    %215 = vector.multi_reduction <add>, %214, %cst_74 [3] : vector<4x2x16x16xf32> to vector<4x2x16xf32>
    %216 = vector.shape_cast %215 : vector<4x2x16xf32> to vector<4x2x16x1xf32>
    %217 = tpu.reciprocal %216 {approx = true} : vector<4x2x16x1xf32> -> vector<4x2x16x1xf32>
    %218 = vector.broadcast %217 : vector<4x2x16x1xf32> to vector<4x2x16x16xf32>
    %219 = arith.mulf %214, %218 : vector<4x2x16x16xf32>
    %220 = vector.extract_strided_slice %219 {offsets = [0, 0, 0, 0], sizes = [1, 2, 16, 16], strides = [1, 1, 1, 1]} : vector<4x2x16x16xf32> to vector<1x2x16x16xf32>
    %221 = vector.shape_cast %220 : vector<1x2x16x16xf32> to vector<2x16x16xf32>
    "tpu.trace_start"() <{level = 10 : i32, message = "bqk,bkd->bqd"}> : () -> ()
    %cst_75 = arith.constant dense<0.000000e+00> : vector<2x16x16xf32>
    %222 = tpu.matmul %221, %50, %cst_75 {dimension_numbers = #tpu.dot_dimension_numbers<[2], [1], [1], [2], [0, 0, 0, 1, 1, 2], [0], [0]>} : vector<2x16x16xf32>, vector<2x16x16xf32>, vector<2x16x16xf32> -> vector<2x16x16xf32>
    "tpu.trace_stop"() : () -> ()
    %223 = vector.extract_strided_slice %219 {offsets = [1, 0, 0, 0], sizes = [1, 2, 16, 16], strides = [1, 1, 1, 1]} : vector<4x2x16x16xf32> to vector<1x2x16x16xf32>
    %224 = vector.shape_cast %223 : vector<1x2x16x16xf32> to vector<2x16x16xf32>
    "tpu.trace_start"() <{level = 10 : i32, message = "bqk,bkd->bqd"}> : () -> ()
    %cst_76 = arith.constant dense<0.000000e+00> : vector<2x16x16xf32>
    %225 = tpu.matmul %224, %55, %cst_76 {dimension_numbers = #tpu.dot_dimension_numbers<[2], [1], [1], [2], [0, 0, 0, 1, 1, 2], [0], [0]>} : vector<2x16x16xf32>, vector<2x16x16xf32>, vector<2x16x16xf32> -> vector<2x16x16xf32>
    "tpu.trace_stop"() : () -> ()
    %226 = arith.addf %222, %225 : vector<2x16x16xf32>
    %227 = vector.extract_strided_slice %219 {offsets = [2, 0, 0, 0], sizes = [1, 2, 16, 16], strides = [1, 1, 1, 1]} : vector<4x2x16x16xf32> to vector<1x2x16x16xf32>
    %228 = vector.shape_cast %227 : vector<1x2x16x16xf32> to vector<2x16x16xf32>
    "tpu.trace_start"() <{level = 10 : i32, message = "bqk,bkd->bqd"}> : () -> ()
    %cst_77 = arith.constant dense<0.000000e+00> : vector<2x16x16xf32>
    %229 = tpu.matmul %228, %60, %cst_77 {dimension_numbers = #tpu.dot_dimension_numbers<[2], [1], [1], [2], [0, 0, 0, 1, 1, 2], [0], [0]>} : vector<2x16x16xf32>, vector<2x16x16xf32>, vector<2x16x16xf32> -> vector<2x16x16xf32>
    "tpu.trace_stop"() : () -> ()
    %230 = arith.addf %226, %229 : vector<2x16x16xf32>
    %231 = vector.extract_strided_slice %219 {offsets = [3, 0, 0, 0], sizes = [1, 2, 16, 16], strides = [1, 1, 1, 1]} : vector<4x2x16x16xf32> to vector<1x2x16x16xf32>
    %232 = vector.shape_cast %231 : vector<1x2x16x16xf32> to vector<2x16x16xf32>
    "tpu.trace_start"() <{level = 10 : i32, message = "bqk,bkd->bqd"}> : () -> ()
    %cst_78 = arith.constant dense<0.000000e+00> : vector<2x16x16xf32>
    %233 = tpu.matmul %232, %65, %cst_78 {dimension_numbers = #tpu.dot_dimension_numbers<[2], [1], [1], [2], [0, 0, 0, 1, 1, 2], [0], [0]>} : vector<2x16x16xf32>, vector<2x16x16xf32>, vector<2x16x16xf32> -> vector<2x16x16xf32>
    "tpu.trace_stop"() : () -> ()
    %234 = arith.addf %230, %233 : vector<2x16x16xf32>
    %235 = vector.shape_cast %234 : vector<2x16x16xf32> to vector<32x16xf32>
    %cst_79 = arith.constant dense<0.000000e+00> : vector<32x16xf32>
    %236 = tpu.matmul %235, %13, %cst_79 {dimension_numbers = #tpu.dot_dimension_numbers<[1], [0], [0], [1], [0, 0, 1, 1], [], []>} : vector<32x16xf32>, vector<16x16xf32>, vector<32x16xf32> -> vector<32x16xf32>
    %237 = vector.broadcast %14 : vector<1x16xf32> to vector<32x16xf32>
    %238 = arith.addf %236, %237 : vector<32x16xf32>
    %239 = vector.shape_cast %238 : vector<32x16xf32> to vector<2x16x16xf32>
    %240 = arith.addf %174, %239 : vector<2x16x16xf32>
    %cst_80 = arith.constant dense<0.000000e+00> : vector<16xf32>
    %241 = vector.multi_reduction <add>, %240, %cst_80 [0, 2] : vector<2x16x16xf32> to vector<16xf32>
    %242 = vector.shape_cast %241 : vector<16xf32> to vector<1x16x1xf32>
    %cst_81 = arith.constant 3.200000e+01 : f32
    %243 = vector.broadcast %cst_81 : f32 to vector<1x16x1xf32>
    %244 = arith.divf %242, %243 : vector<1x16x1xf32>
    %245 = vector.broadcast %244 : vector<1x16x1xf32> to vector<2x16x16xf32>
    %246 = arith.subf %240, %245 : vector<2x16x16xf32>
    %247 = arith.mulf %246, %246 : vector<2x16x16xf32>
    %cst_82 = arith.constant dense<0.000000e+00> : vector<16xf32>
    %248 = vector.multi_reduction <add>, %247, %cst_82 [0, 2] : vector<2x16x16xf32> to vector<16xf32>
    %249 = vector.shape_cast %248 : vector<16xf32> to vector<1x16x1xf32>
    %cst_83 = arith.constant 3.200000e+01 : f32
    %250 = vector.broadcast %cst_83 : f32 to vector<1x16x1xf32>
    %251 = arith.divf %249, %250 : vector<1x16x1xf32>
    %252 = vector.broadcast %244 : vector<1x16x1xf32> to vector<2x16x16xf32>
    %253 = arith.subf %240, %252 : vector<2x16x16xf32>
    %cst_84 = arith.constant 9.99999974E-6 : f32
    %254 = vector.broadcast %cst_84 : f32 to vector<1x16x1xf32>
    %255 = arith.addf %251, %254 : vector<1x16x1xf32>
    %256 = math.rsqrt %255 : vector<1x16x1xf32>
    %257 = vector.broadcast %256 : vector<1x16x1xf32> to vector<2x16x16xf32>
    %258 = arith.mulf %253, %257 : vector<2x16x16xf32>
    %259 = vector.shape_cast %258 : vector<2x16x16xf32> to vector<32x16xf32>
    %cst_85 = arith.constant dense<0.000000e+00> : vector<32x32xf32>
    %260 = tpu.matmul %259, %15, %cst_85 {dimension_numbers = #tpu.dot_dimension_numbers<[1], [0], [0], [1], [0, 0, 1, 1], [], []>} : vector<32x16xf32>, vector<16x32xf32>, vector<32x32xf32> -> vector<32x32xf32>
    %261 = vector.broadcast %16 : vector<1x32xf32> to vector<32x32xf32>
    %262 = arith.addf %260, %261 : vector<32x32xf32>
    %cst_86 = arith.constant 0.000000e+00 : f32
    %263 = vector.broadcast %cst_86 : f32 to vector<32x32xf32>
    %264 = arith.maximumf %262, %263 : vector<32x32xf32>
    %cst_87 = arith.constant dense<0.000000e+00> : vector<32x16xf32>
    %265 = tpu.matmul %264, %17, %cst_87 {dimension_numbers = #tpu.dot_dimension_numbers<[1], [0], [0], [1], [0, 0, 1, 1], [], []>} : vector<32x32xf32>, vector<32x16xf32>, vector<32x16xf32> -> vector<32x16xf32>
    %266 = vector.broadcast %18 : vector<1x16xf32> to vector<32x16xf32>
    %267 = arith.addf %265, %266 : vector<32x16xf32>
    %268 = vector.shape_cast %267 : vector<32x16xf32> to vector<2x16x16xf32>
    %269 = arith.addf %240, %268 : vector<2x16x16xf32>
    %cst_88 = arith.constant dense<0.000000e+00> : vector<16xf32>
    %270 = vector.multi_reduction <add>, %269, %cst_88 [0, 2] : vector<2x16x16xf32> to vector<16xf32>
    %271 = vector.shape_cast %270 : vector<16xf32> to vector<1x16x1xf32>
    %cst_89 = arith.constant 3.200000e+01 : f32
    %272 = vector.broadcast %cst_89 : f32 to vector<1x16x1xf32>
    %273 = arith.divf %271, %272 : vector<1x16x1xf32>
    %274 = vector.broadcast %273 : vector<1x16x1xf32> to vector<2x16x16xf32>
    %275 = arith.subf %269, %274 : vector<2x16x16xf32>
    %276 = arith.mulf %275, %275 : vector<2x16x16xf32>
    %cst_90 = arith.constant dense<0.000000e+00> : vector<16xf32>
    %277 = vector.multi_reduction <add>, %276, %cst_90 [0, 2] : vector<2x16x16xf32> to vector<16xf32>
    %278 = vector.shape_cast %277 : vector<16xf32> to vector<1x16x1xf32>
    %cst_91 = arith.constant 3.200000e+01 : f32
    %279 = vector.broadcast %cst_91 : f32 to vector<1x16x1xf32>
    %280 = arith.divf %278, %279 : vector<1x16x1xf32>
    %281 = vector.broadcast %273 : vector<1x16x1xf32> to vector<2x16x16xf32>
    %282 = arith.subf %269, %281 : vector<2x16x16xf32>
    %cst_92 = arith.constant 9.99999974E-6 : f32
    %283 = vector.broadcast %cst_92 : f32 to vector<1x16x1xf32>
    %284 = arith.addf %280, %283 : vector<1x16x1xf32>
    %285 = math.rsqrt %284 : vector<1x16x1xf32>
    %286 = vector.broadcast %285 : vector<1x16x1xf32> to vector<2x16x16xf32>
    %287 = arith.mulf %282, %286 : vector<2x16x16xf32>
    %288 = vector.shape_cast %287 : vector<2x16x16xf32> to vector<32x16xf32>
    %cst_93 = arith.constant dense<0.000000e+00> : vector<32x48xf32>
    %289 = tpu.matmul %288, %5, %cst_93 {dimension_numbers = #tpu.dot_dimension_numbers<[1], [0], [0], [1], [0, 0, 1, 1], [], []>} : vector<32x16xf32>, vector<16x48xf32>, vector<32x48xf32> -> vector<32x48xf32>
    %290 = vector.broadcast %6 : vector<1x48xf32> to vector<32x48xf32>
    %291 = arith.addf %289, %290 : vector<32x48xf32>
    %292 = vector.shape_cast %291 : vector<32x48xf32> to vector<2x16x48xf32>
    %293 = vector.extract_strided_slice %292 {offsets = [0, 0, 0], sizes = [2, 16, 16], strides = [1, 1, 1]} : vector<2x16x48xf32> to vector<2x16x16xf32>
    %294 = vector.extract_strided_slice %292 {offsets = [0, 0, 16], sizes = [2, 16, 16], strides = [1, 1, 1]} : vector<2x16x48xf32> to vector<2x16x16xf32>
    %295 = vector.extract_strided_slice %292 {offsets = [0, 0, 32], sizes = [2, 16, 16], strides = [1, 1, 1]} : vector<2x16x48xf32> to vector<2x16x16xf32>
    %296 = vector.extract_strided_slice %4 {offsets = [0, 0, 0], sizes = [1, 1, 16], strides = [1, 1, 1]} : vector<4x1x16xf32> to vector<1x1x16xf32>
    %297 = vector.shape_cast %296 : vector<1x1x16xf32> to vector<1x16xf32>
    %298 = vector.shape_cast %297 : vector<1x16xf32> to vector<1x1x16xf32>
    %299 = vector.broadcast %298 : vector<1x1x16xf32> to vector<2x16x16xf32>
    %300 = arith.mulf %294, %299 : vector<2x16x16xf32>
    %301 = vector.extract_strided_slice %4 {offsets = [1, 0, 0], sizes = [1, 1, 16], strides = [1, 1, 1]} : vector<4x1x16xf32> to vector<1x1x16xf32>
    %302 = vector.shape_cast %301 : vector<1x1x16xf32> to vector<1x16xf32>
    %303 = vector.shape_cast %302 : vector<1x16xf32> to vector<1x1x16xf32>
    %304 = vector.broadcast %303 : vector<1x1x16xf32> to vector<2x16x16xf32>
    %305 = arith.mulf %294, %304 : vector<2x16x16xf32>
    %306 = vector.extract_strided_slice %4 {offsets = [2, 0, 0], sizes = [1, 1, 16], strides = [1, 1, 1]} : vector<4x1x16xf32> to vector<1x1x16xf32>
    %307 = vector.shape_cast %306 : vector<1x1x16xf32> to vector<1x16xf32>
    %308 = vector.shape_cast %307 : vector<1x16xf32> to vector<1x1x16xf32>
    %309 = vector.broadcast %308 : vector<1x1x16xf32> to vector<2x16x16xf32>
    %310 = arith.mulf %294, %309 : vector<2x16x16xf32>
    %311 = vector.extract_strided_slice %4 {offsets = [3, 0, 0], sizes = [1, 1, 16], strides = [1, 1, 1]} : vector<4x1x16xf32> to vector<1x1x16xf32>
    %312 = vector.shape_cast %311 : vector<1x1x16xf32> to vector<1x16xf32>
    %313 = vector.shape_cast %312 : vector<1x16xf32> to vector<1x1x16xf32>
    %314 = vector.broadcast %313 : vector<1x1x16xf32> to vector<2x16x16xf32>
    %315 = arith.mulf %294, %314 : vector<2x16x16xf32>
    %316 = vector.extract_strided_slice %4 {offsets = [0, 0, 0], sizes = [1, 1, 16], strides = [1, 1, 1]} : vector<4x1x16xf32> to vector<1x1x16xf32>
    %317 = vector.shape_cast %316 : vector<1x1x16xf32> to vector<1x16xf32>
    %318 = vector.shape_cast %317 : vector<1x16xf32> to vector<1x1x16xf32>
    %319 = vector.broadcast %318 : vector<1x1x16xf32> to vector<2x16x16xf32>
    %320 = arith.mulf %295, %319 : vector<2x16x16xf32>
    %321 = vector.extract_strided_slice %4 {offsets = [1, 0, 0], sizes = [1, 1, 16], strides = [1, 1, 1]} : vector<4x1x16xf32> to vector<1x1x16xf32>
    %322 = vector.shape_cast %321 : vector<1x1x16xf32> to vector<1x16xf32>
    %323 = vector.shape_cast %322 : vector<1x16xf32> to vector<1x1x16xf32>
    %324 = vector.broadcast %323 : vector<1x1x16xf32> to vector<2x16x16xf32>
    %325 = arith.mulf %295, %324 : vector<2x16x16xf32>
    %326 = vector.extract_strided_slice %4 {offsets = [2, 0, 0], sizes = [1, 1, 16], strides = [1, 1, 1]} : vector<4x1x16xf32> to vector<1x1x16xf32>
    %327 = vector.shape_cast %326 : vector<1x1x16xf32> to vector<1x16xf32>
    %328 = vector.shape_cast %327 : vector<1x16xf32> to vector<1x1x16xf32>
    %329 = vector.broadcast %328 : vector<1x1x16xf32> to vector<2x16x16xf32>
    %330 = arith.mulf %295, %329 : vector<2x16x16xf32>
    %331 = vector.extract_strided_slice %4 {offsets = [3, 0, 0], sizes = [1, 1, 16], strides = [1, 1, 1]} : vector<4x1x16xf32> to vector<1x1x16xf32>
    %332 = vector.shape_cast %331 : vector<1x1x16xf32> to vector<1x16xf32>
    %333 = vector.shape_cast %332 : vector<1x16xf32> to vector<1x1x16xf32>
    %334 = vector.broadcast %333 : vector<1x1x16xf32> to vector<2x16x16xf32>
    %335 = arith.mulf %295, %334 : vector<2x16x16xf32>
    %cst_94 = arith.constant 5.000000e-01 : f32
    %336 = vector.broadcast %cst_94 : f32 to vector<2x16x16xf32>
    %337 = arith.mulf %293, %336 : vector<2x16x16xf32>
    "tpu.trace_start"() <{level = 10 : i32, message = "bqd,bkd->bqk"}> : () -> ()
    %cst_95 = arith.constant dense<0.000000e+00> : vector<2x16x16xf32>
    %338 = tpu.matmul %337, %300, %cst_95 {dimension_numbers = #tpu.dot_dimension_numbers<[2], [2], [1], [1], [0, 0, 0, 1, 1, 1], [0], [0]>} : vector<2x16x16xf32>, vector<2x16x16xf32>, vector<2x16x16xf32> -> vector<2x16x16xf32>
    %cst_96 = arith.constant dense<0.000000e+00> : vector<2x16x16xf32>
    %339 = tpu.matmul %337, %305, %cst_96 {dimension_numbers = #tpu.dot_dimension_numbers<[2], [2], [1], [1], [0, 0, 0, 1, 1, 1], [0], [0]>} : vector<2x16x16xf32>, vector<2x16x16xf32>, vector<2x16x16xf32> -> vector<2x16x16xf32>
    %cst_97 = arith.constant dense<0.000000e+00> : vector<2x16x16xf32>
    %340 = tpu.matmul %337, %310, %cst_97 {dimension_numbers = #tpu.dot_dimension_numbers<[2], [2], [1], [1], [0, 0, 0, 1, 1, 1], [0], [0]>} : vector<2x16x16xf32>, vector<2x16x16xf32>, vector<2x16x16xf32> -> vector<2x16x16xf32>
    %cst_98 = arith.constant dense<0.000000e+00> : vector<2x16x16xf32>
    %341 = tpu.matmul %337, %315, %cst_98 {dimension_numbers = #tpu.dot_dimension_numbers<[2], [2], [1], [1], [0, 0, 0, 1, 1, 1], [0], [0]>} : vector<2x16x16xf32>, vector<2x16x16xf32>, vector<2x16x16xf32> -> vector<2x16x16xf32>
    "tpu.trace_stop"() : () -> ()
    %342 = vector.shape_cast %338 : vector<2x16x16xf32> to vector<1x2x16x16xf32>
    %343 = vector.shape_cast %339 : vector<2x16x16xf32> to vector<1x2x16x16xf32>
    %344 = vector.shape_cast %340 : vector<2x16x16xf32> to vector<1x2x16x16xf32>
    %345 = vector.shape_cast %341 : vector<2x16x16xf32> to vector<1x2x16x16xf32>
    %346 = tpu.concatenate %342, %343, %344, %345 in 0 : vector<1x2x16x16xf32>, vector<1x2x16x16xf32>, vector<1x2x16x16xf32>, vector<1x2x16x16xf32> -> vector<4x2x16x16xf32>
    %347 = arith.addf %346, %2 : vector<4x2x16x16xf32>
    %cst_99 = arith.constant dense<0xFF800000> : vector<4x2x16xf32>
    %348 = vector.multi_reduction <maximumf>, %347, %cst_99 [3] : vector<4x2x16x16xf32> to vector<4x2x16xf32>
    %349 = vector.shape_cast %348 : vector<4x2x16xf32> to vector<4x2x16x1xf32>
    %350 = vector.broadcast %349 : vector<4x2x16x1xf32> to vector<4x2x16x16xf32>
    %351 = arith.subf %347, %350 : vector<4x2x16x16xf32>
    %352 = math.exp %351 : vector<4x2x16x16xf32>
    %cst_100 = arith.constant dense<0.000000e+00> : vector<4x2x16xf32>
    %353 = vector.multi_reduction <add>, %352, %cst_100 [3] : vector<4x2x16x16xf32> to vector<4x2x16xf32>
    %354 = vector.shape_cast %353 : vector<4x2x16xf32> to vector<4x2x16x1xf32>
    %355 = tpu.reciprocal %354 {approx = true} : vector<4x2x16x1xf32> -> vector<4x2x16x1xf32>
    %356 = vector.broadcast %355 : vector<4x2x16x1xf32> to vector<4x2x16x16xf32>
    %357 = arith.mulf %352, %356 : vector<4x2x16x16xf32>
    %358 = vector.extract_strided_slice %357 {offsets = [0, 0, 0, 0], sizes = [1, 2, 16, 16], strides = [1, 1, 1, 1]} : vector<4x2x16x16xf32> to vector<1x2x16x16xf32>
    %359 = vector.shape_cast %358 : vector<1x2x16x16xf32> to vector<2x16x16xf32>
    "tpu.trace_start"() <{level = 10 : i32, message = "bqk,bkd->bqd"}> : () -> ()
    %cst_101 = arith.constant dense<0.000000e+00> : vector<2x16x16xf32>
    %360 = tpu.matmul %359, %320, %cst_101 {dimension_numbers = #tpu.dot_dimension_numbers<[2], [1], [1], [2], [0, 0, 0, 1, 1, 2], [0], [0]>} : vector<2x16x16xf32>, vector<2x16x16xf32>, vector<2x16x16xf32> -> vector<2x16x16xf32>
    "tpu.trace_stop"() : () -> ()
    %361 = vector.extract_strided_slice %357 {offsets = [1, 0, 0, 0], sizes = [1, 2, 16, 16], strides = [1, 1, 1, 1]} : vector<4x2x16x16xf32> to vector<1x2x16x16xf32>
    %362 = vector.shape_cast %361 : vector<1x2x16x16xf32> to vector<2x16x16xf32>
    "tpu.trace_start"() <{level = 10 : i32, message = "bqk,bkd->bqd"}> : () -> ()
    %cst_102 = arith.constant dense<0.000000e+00> : vector<2x16x16xf32>
    %363 = tpu.matmul %362, %325, %cst_102 {dimension_numbers = #tpu.dot_dimension_numbers<[2], [1], [1], [2], [0, 0, 0, 1, 1, 2], [0], [0]>} : vector<2x16x16xf32>, vector<2x16x16xf32>, vector<2x16x16xf32> -> vector<2x16x16xf32>
    "tpu.trace_stop"() : () -> ()
    %364 = arith.addf %360, %363 : vector<2x16x16xf32>
    %365 = vector.extract_strided_slice %357 {offsets = [2, 0, 0, 0], sizes = [1, 2, 16, 16], strides = [1, 1, 1, 1]} : vector<4x2x16x16xf32> to vector<1x2x16x16xf32>
    %366 = vector.shape_cast %365 : vector<1x2x16x16xf32> to vector<2x16x16xf32>
    "tpu.trace_start"() <{level = 10 : i32, message = "bqk,bkd->bqd"}> : () -> ()
    %cst_103 = arith.constant dense<0.000000e+00> : vector<2x16x16xf32>
    %367 = tpu.matmul %366, %330, %cst_103 {dimension_numbers = #tpu.dot_dimension_numbers<[2], [1], [1], [2], [0, 0, 0, 1, 1, 2], [0], [0]>} : vector<2x16x16xf32>, vector<2x16x16xf32>, vector<2x16x16xf32> -> vector<2x16x16xf32>
    "tpu.trace_stop"() : () -> ()
    %368 = arith.addf %364, %367 : vector<2x16x16xf32>
    %369 = vector.extract_strided_slice %357 {offsets = [3, 0, 0, 0], sizes = [1, 2, 16, 16], strides = [1, 1, 1, 1]} : vector<4x2x16x16xf32> to vector<1x2x16x16xf32>
    %370 = vector.shape_cast %369 : vector<1x2x16x16xf32> to vector<2x16x16xf32>
    "tpu.trace_start"() <{level = 10 : i32, message = "bqk,bkd->bqd"}> : () -> ()
    %cst_104 = arith.constant dense<0.000000e+00> : vector<2x16x16xf32>
    %371 = tpu.matmul %370, %335, %cst_104 {dimension_numbers = #tpu.dot_dimension_numbers<[2], [1], [1], [2], [0, 0, 0, 1, 1, 2], [0], [0]>} : vector<2x16x16xf32>, vector<2x16x16xf32>, vector<2x16x16xf32> -> vector<2x16x16xf32>
    "tpu.trace_stop"() : () -> ()
    %372 = arith.addf %368, %371 : vector<2x16x16xf32>
    %373 = vector.shape_cast %372 : vector<2x16x16xf32> to vector<32x16xf32>
    %cst_105 = arith.constant dense<0.000000e+00> : vector<32x16xf32>
    %374 = tpu.matmul %373, %7, %cst_105 {dimension_numbers = #tpu.dot_dimension_numbers<[1], [0], [0], [1], [0, 0, 1, 1], [], []>} : vector<32x16xf32>, vector<16x16xf32>, vector<32x16xf32> -> vector<32x16xf32>
    %375 = vector.broadcast %8 : vector<1x16xf32> to vector<32x16xf32>
    %376 = arith.addf %374, %375 : vector<32x16xf32>
    %377 = vector.shape_cast %376 : vector<32x16xf32> to vector<2x16x16xf32>
    %378 = arith.addf %269, %377 : vector<2x16x16xf32>
    %cst_106 = arith.constant dense<0.000000e+00> : vector<16xf32>
    %379 = vector.multi_reduction <add>, %378, %cst_106 [0, 2] : vector<2x16x16xf32> to vector<16xf32>
    %380 = vector.shape_cast %379 : vector<16xf32> to vector<1x16x1xf32>
    %cst_107 = arith.constant 3.200000e+01 : f32
    %381 = vector.broadcast %cst_107 : f32 to vector<1x16x1xf32>
    %382 = arith.divf %380, %381 : vector<1x16x1xf32>
    %383 = vector.broadcast %382 : vector<1x16x1xf32> to vector<2x16x16xf32>
    %384 = arith.subf %378, %383 : vector<2x16x16xf32>
    %385 = arith.mulf %384, %384 : vector<2x16x16xf32>
    %cst_108 = arith.constant dense<0.000000e+00> : vector<16xf32>
    %386 = vector.multi_reduction <add>, %385, %cst_108 [0, 2] : vector<2x16x16xf32> to vector<16xf32>
    %387 = vector.shape_cast %386 : vector<16xf32> to vector<1x16x1xf32>
    %cst_109 = arith.constant 3.200000e+01 : f32
    %388 = vector.broadcast %cst_109 : f32 to vector<1x16x1xf32>
    %389 = arith.divf %387, %388 : vector<1x16x1xf32>
    %390 = vector.broadcast %382 : vector<1x16x1xf32> to vector<2x16x16xf32>
    %391 = arith.subf %378, %390 : vector<2x16x16xf32>
    %cst_110 = arith.constant 9.99999974E-6 : f32
    %392 = vector.broadcast %cst_110 : f32 to vector<1x16x1xf32>
    %393 = arith.addf %389, %392 : vector<1x16x1xf32>
    %394 = math.rsqrt %393 : vector<1x16x1xf32>
    %395 = vector.broadcast %394 : vector<1x16x1xf32> to vector<2x16x16xf32>
    %396 = arith.mulf %391, %395 : vector<2x16x16xf32>
    %397 = vector.shape_cast %396 : vector<2x16x16xf32> to vector<32x16xf32>
    %cst_111 = arith.constant dense<0.000000e+00> : vector<32x16xf32>
    %398 = tpu.matmul %397, %9, %cst_111 {dimension_numbers = #tpu.dot_dimension_numbers<[1], [0], [0], [1], [0, 0, 1, 1], [], []>} : vector<32x16xf32>, vector<16x16xf32>, vector<32x16xf32> -> vector<32x16xf32>
    %399 = vector.broadcast %10 : vector<1x16xf32> to vector<32x16xf32>
    %400 = arith.addf %398, %399 : vector<32x16xf32>
    %401 = vector.shape_cast %400 : vector<32x16xf32> to vector<2x16x16xf32>
    %cst_112 = arith.constant 5.000000e-01 : f32
    %402 = vector.broadcast %cst_112 : f32 to vector<2x16x16xf32>
    %403 = arith.mulf %401, %402 : vector<2x16x16xf32>
    "tpu.trace_start"() <{level = 10 : i32, message = "bqd,bkd->bqk"}> : () -> ()
    %cst_113 = arith.constant dense<0.000000e+00> : vector<2x16x16xf32>
    %404 = tpu.matmul %403, %30, %cst_113 {dimension_numbers = #tpu.dot_dimension_numbers<[2], [2], [1], [1], [0, 0, 0, 1, 1, 1], [0], [0]>} : vector<2x16x16xf32>, vector<2x16x16xf32>, vector<2x16x16xf32> -> vector<2x16x16xf32>
    %cst_114 = arith.constant dense<0.000000e+00> : vector<2x16x16xf32>
    %405 = tpu.matmul %403, %35, %cst_114 {dimension_numbers = #tpu.dot_dimension_numbers<[2], [2], [1], [1], [0, 0, 0, 1, 1, 1], [0], [0]>} : vector<2x16x16xf32>, vector<2x16x16xf32>, vector<2x16x16xf32> -> vector<2x16x16xf32>
    %cst_115 = arith.constant dense<0.000000e+00> : vector<2x16x16xf32>
    %406 = tpu.matmul %403, %40, %cst_115 {dimension_numbers = #tpu.dot_dimension_numbers<[2], [2], [1], [1], [0, 0, 0, 1, 1, 1], [0], [0]>} : vector<2x16x16xf32>, vector<2x16x16xf32>, vector<2x16x16xf32> -> vector<2x16x16xf32>
    %cst_116 = arith.constant dense<0.000000e+00> : vector<2x16x16xf32>
    %407 = tpu.matmul %403, %45, %cst_116 {dimension_numbers = #tpu.dot_dimension_numbers<[2], [2], [1], [1], [0, 0, 0, 1, 1, 1], [0], [0]>} : vector<2x16x16xf32>, vector<2x16x16xf32>, vector<2x16x16xf32> -> vector<2x16x16xf32>
    "tpu.trace_stop"() : () -> ()
    %408 = vector.shape_cast %404 : vector<2x16x16xf32> to vector<1x2x16x16xf32>
    %409 = vector.shape_cast %405 : vector<2x16x16xf32> to vector<1x2x16x16xf32>
    %410 = vector.shape_cast %406 : vector<2x16x16xf32> to vector<1x2x16x16xf32>
    %411 = vector.shape_cast %407 : vector<2x16x16xf32> to vector<1x2x16x16xf32>
    %412 = tpu.concatenate %408, %409, %410, %411 in 0 : vector<1x2x16x16xf32>, vector<1x2x16x16xf32>, vector<1x2x16x16xf32>, vector<1x2x16x16xf32> -> vector<4x2x16x16xf32>
    %413 = arith.addf %412, %3 : vector<4x2x16x16xf32>
    %cst_117 = arith.constant dense<0xFF800000> : vector<4x2x16xf32>
    %414 = vector.multi_reduction <maximumf>, %413, %cst_117 [3] : vector<4x2x16x16xf32> to vector<4x2x16xf32>
    %415 = vector.shape_cast %414 : vector<4x2x16xf32> to vector<4x2x16x1xf32>
    %416 = vector.broadcast %415 : vector<4x2x16x1xf32> to vector<4x2x16x16xf32>
    %417 = arith.subf %413, %416 : vector<4x2x16x16xf32>
    %418 = math.exp %417 : vector<4x2x16x16xf32>
    %cst_118 = arith.constant dense<0.000000e+00> : vector<4x2x16xf32>
    %419 = vector.multi_reduction <add>, %418, %cst_118 [3] : vector<4x2x16x16xf32> to vector<4x2x16xf32>
    %420 = vector.shape_cast %419 : vector<4x2x16xf32> to vector<4x2x16x1xf32>
    %421 = tpu.reciprocal %420 {approx = true} : vector<4x2x16x1xf32> -> vector<4x2x16x1xf32>
    %422 = vector.broadcast %421 : vector<4x2x16x1xf32> to vector<4x2x16x16xf32>
    %423 = arith.mulf %418, %422 : vector<4x2x16x16xf32>
    %424 = vector.extract_strided_slice %423 {offsets = [0, 0, 0, 0], sizes = [1, 2, 16, 16], strides = [1, 1, 1, 1]} : vector<4x2x16x16xf32> to vector<1x2x16x16xf32>
    %425 = vector.shape_cast %424 : vector<1x2x16x16xf32> to vector<2x16x16xf32>
    "tpu.trace_start"() <{level = 10 : i32, message = "bqk,bkd->bqd"}> : () -> ()
    %cst_119 = arith.constant dense<0.000000e+00> : vector<2x16x16xf32>
    %426 = tpu.matmul %425, %50, %cst_119 {dimension_numbers = #tpu.dot_dimension_numbers<[2], [1], [1], [2], [0, 0, 0, 1, 1, 2], [0], [0]>} : vector<2x16x16xf32>, vector<2x16x16xf32>, vector<2x16x16xf32> -> vector<2x16x16xf32>
    "tpu.trace_stop"() : () -> ()
    %427 = vector.extract_strided_slice %423 {offsets = [1, 0, 0, 0], sizes = [1, 2, 16, 16], strides = [1, 1, 1, 1]} : vector<4x2x16x16xf32> to vector<1x2x16x16xf32>
    %428 = vector.shape_cast %427 : vector<1x2x16x16xf32> to vector<2x16x16xf32>
    "tpu.trace_start"() <{level = 10 : i32, message = "bqk,bkd->bqd"}> : () -> ()
    %cst_120 = arith.constant dense<0.000000e+00> : vector<2x16x16xf32>
    %429 = tpu.matmul %428, %55, %cst_120 {dimension_numbers = #tpu.dot_dimension_numbers<[2], [1], [1], [2], [0, 0, 0, 1, 1, 2], [0], [0]>} : vector<2x16x16xf32>, vector<2x16x16xf32>, vector<2x16x16xf32> -> vector<2x16x16xf32>
    "tpu.trace_stop"() : () -> ()
    %430 = arith.addf %426, %429 : vector<2x16x16xf32>
    %431 = vector.extract_strided_slice %423 {offsets = [2, 0, 0, 0], sizes = [1, 2, 16, 16], strides = [1, 1, 1, 1]} : vector<4x2x16x16xf32> to vector<1x2x16x16xf32>
    %432 = vector.shape_cast %431 : vector<1x2x16x16xf32> to vector<2x16x16xf32>
    "tpu.trace_start"() <{level = 10 : i32, message = "bqk,bkd->bqd"}> : () -> ()
    %cst_121 = arith.constant dense<0.000000e+00> : vector<2x16x16xf32>
    %433 = tpu.matmul %432, %60, %cst_121 {dimension_numbers = #tpu.dot_dimension_numbers<[2], [1], [1], [2], [0, 0, 0, 1, 1, 2], [0], [0]>} : vector<2x16x16xf32>, vector<2x16x16xf32>, vector<2x16x16xf32> -> vector<2x16x16xf32>
    "tpu.trace_stop"() : () -> ()
    %434 = arith.addf %430, %433 : vector<2x16x16xf32>
    %435 = vector.extract_strided_slice %423 {offsets = [3, 0, 0, 0], sizes = [1, 2, 16, 16], strides = [1, 1, 1, 1]} : vector<4x2x16x16xf32> to vector<1x2x16x16xf32>
    %436 = vector.shape_cast %435 : vector<1x2x16x16xf32> to vector<2x16x16xf32>
    "tpu.trace_start"() <{level = 10 : i32, message = "bqk,bkd->bqd"}> : () -> ()
    %cst_122 = arith.constant dense<0.000000e+00> : vector<2x16x16xf32>
    %437 = tpu.matmul %436, %65, %cst_122 {dimension_numbers = #tpu.dot_dimension_numbers<[2], [1], [1], [2], [0, 0, 0, 1, 1, 2], [0], [0]>} : vector<2x16x16xf32>, vector<2x16x16xf32>, vector<2x16x16xf32> -> vector<2x16x16xf32>
    "tpu.trace_stop"() : () -> ()
    %438 = arith.addf %434, %437 : vector<2x16x16xf32>
    %439 = vector.shape_cast %438 : vector<2x16x16xf32> to vector<32x16xf32>
    %cst_123 = arith.constant dense<0.000000e+00> : vector<32x16xf32>
    %440 = tpu.matmul %439, %13, %cst_123 {dimension_numbers = #tpu.dot_dimension_numbers<[1], [0], [0], [1], [0, 0, 1, 1], [], []>} : vector<32x16xf32>, vector<16x16xf32>, vector<32x16xf32> -> vector<32x16xf32>
    %441 = vector.broadcast %14 : vector<1x16xf32> to vector<32x16xf32>
    %442 = arith.addf %440, %441 : vector<32x16xf32>
    %443 = vector.shape_cast %442 : vector<32x16xf32> to vector<2x16x16xf32>
    %444 = arith.addf %378, %443 : vector<2x16x16xf32>
    %cst_124 = arith.constant dense<0.000000e+00> : vector<16xf32>
    %445 = vector.multi_reduction <add>, %444, %cst_124 [0, 2] : vector<2x16x16xf32> to vector<16xf32>
    %446 = vector.shape_cast %445 : vector<16xf32> to vector<1x16x1xf32>
    %cst_125 = arith.constant 3.200000e+01 : f32
    %447 = vector.broadcast %cst_125 : f32 to vector<1x16x1xf32>
    %448 = arith.divf %446, %447 : vector<1x16x1xf32>
    %449 = vector.broadcast %448 : vector<1x16x1xf32> to vector<2x16x16xf32>
    %450 = arith.subf %444, %449 : vector<2x16x16xf32>
    %451 = arith.mulf %450, %450 : vector<2x16x16xf32>
    %cst_126 = arith.constant dense<0.000000e+00> : vector<16xf32>
    %452 = vector.multi_reduction <add>, %451, %cst_126 [0, 2] : vector<2x16x16xf32> to vector<16xf32>
    %453 = vector.shape_cast %452 : vector<16xf32> to vector<1x16x1xf32>
    %cst_127 = arith.constant 3.200000e+01 : f32
    %454 = vector.broadcast %cst_127 : f32 to vector<1x16x1xf32>
    %455 = arith.divf %453, %454 : vector<1x16x1xf32>
    %456 = vector.broadcast %448 : vector<1x16x1xf32> to vector<2x16x16xf32>
    %457 = arith.subf %444, %456 : vector<2x16x16xf32>
    %cst_128 = arith.constant 9.99999974E-6 : f32
    %458 = vector.broadcast %cst_128 : f32 to vector<1x16x1xf32>
    %459 = arith.addf %455, %458 : vector<1x16x1xf32>
    %460 = math.rsqrt %459 : vector<1x16x1xf32>
    %461 = vector.broadcast %460 : vector<1x16x1xf32> to vector<2x16x16xf32>
    %462 = arith.mulf %457, %461 : vector<2x16x16xf32>
    %463 = vector.shape_cast %462 : vector<2x16x16xf32> to vector<32x16xf32>
    %cst_129 = arith.constant dense<0.000000e+00> : vector<32x32xf32>
    %464 = tpu.matmul %463, %15, %cst_129 {dimension_numbers = #tpu.dot_dimension_numbers<[1], [0], [0], [1], [0, 0, 1, 1], [], []>} : vector<32x16xf32>, vector<16x32xf32>, vector<32x32xf32> -> vector<32x32xf32>
    %465 = vector.broadcast %16 : vector<1x32xf32> to vector<32x32xf32>
    %466 = arith.addf %464, %465 : vector<32x32xf32>
    %cst_130 = arith.constant 0.000000e+00 : f32
    %467 = vector.broadcast %cst_130 : f32 to vector<32x32xf32>
    %468 = arith.maximumf %466, %467 : vector<32x32xf32>
    %cst_131 = arith.constant dense<0.000000e+00> : vector<32x16xf32>
    %469 = tpu.matmul %468, %17, %cst_131 {dimension_numbers = #tpu.dot_dimension_numbers<[1], [0], [0], [1], [0, 0, 1, 1], [], []>} : vector<32x32xf32>, vector<32x16xf32>, vector<32x16xf32> -> vector<32x16xf32>
    %470 = vector.broadcast %18 : vector<1x16xf32> to vector<32x16xf32>
    %471 = arith.addf %469, %470 : vector<32x16xf32>
    %472 = vector.shape_cast %471 : vector<32x16xf32> to vector<2x16x16xf32>
    %473 = arith.addf %444, %472 : vector<2x16x16xf32>
    %cst_132 = arith.constant dense<0.000000e+00> : vector<16xf32>
    %474 = vector.multi_reduction <add>, %473, %cst_132 [0, 2] : vector<2x16x16xf32> to vector<16xf32>
    %475 = vector.shape_cast %474 : vector<16xf32> to vector<1x16x1xf32>
    %cst_133 = arith.constant 3.200000e+01 : f32
    %476 = vector.broadcast %cst_133 : f32 to vector<1x16x1xf32>
    %477 = arith.divf %475, %476 : vector<1x16x1xf32>
    %478 = vector.broadcast %477 : vector<1x16x1xf32> to vector<2x16x16xf32>
    %479 = arith.subf %473, %478 : vector<2x16x16xf32>
    %480 = arith.mulf %479, %479 : vector<2x16x16xf32>
    %cst_134 = arith.constant dense<0.000000e+00> : vector<16xf32>
    %481 = vector.multi_reduction <add>, %480, %cst_134 [0, 2] : vector<2x16x16xf32> to vector<16xf32>
    %482 = vector.shape_cast %481 : vector<16xf32> to vector<1x16x1xf32>
    %cst_135 = arith.constant 3.200000e+01 : f32
    %483 = vector.broadcast %cst_135 : f32 to vector<1x16x1xf32>
    %484 = arith.divf %482, %483 : vector<1x16x1xf32>
    %485 = vector.broadcast %477 : vector<1x16x1xf32> to vector<2x16x16xf32>
    %486 = arith.subf %473, %485 : vector<2x16x16xf32>
    %cst_136 = arith.constant 9.99999974E-6 : f32
    %487 = vector.broadcast %cst_136 : f32 to vector<1x16x1xf32>
    %488 = arith.addf %484, %487 : vector<1x16x1xf32>
    %489 = math.rsqrt %488 : vector<1x16x1xf32>
    %490 = vector.broadcast %489 : vector<1x16x1xf32> to vector<2x16x16xf32>
    %491 = arith.mulf %486, %490 : vector<2x16x16xf32>
    %c0_137 = arith.constant 0 : index
    %c0_138 = arith.constant 0 : index
    %c0_139 = arith.constant 0 : index
    %492 = vector.load %arg20[%c0_137, %c0_138, %c0_139] : memref<2x16x16xf32, #tpu.memory_space<vmem>>, vector<2x16x16xf32>
    tpu.vector_store %arg20[%c0_137, %c0_138, %c0_139], %491 {strides = array<i32>} : memref<2x16x16xf32, #tpu.memory_space<vmem>>, vector<2x16x16xf32>,
    return
  }
  func.func @transform_0(%arg0: i32) -> (i32, i32, i32) {
    %c0_i32 = arith.constant 0 : i32
    %c0_i32_0 = arith.constant 0 : i32
    %c0_i32_1 = arith.constant 0 : i32
    %c0_i32_2 = arith.constant 0 : i32
    return %c0_i32, %c0_i32_0, %c0_i32_1 : i32, i32, i32
  }
  func.func @transform_1(%arg0: i32) -> (i32, i32, i32) {
    %c0_i32 = arith.constant 0 : i32
    %c0_i32_0 = arith.constant 0 : i32
    %c0_i32_1 = arith.constant 0 : i32
    %c0_i32_2 = arith.constant 0 : i32
    return %c0_i32, %c0_i32_0, %c0_i32_1 : i32, i32, i32
  }
  func.func @transform_2(%arg0: i32) -> (i32, i32, i32, i32) {
    %c0_i32 = arith.constant 0 : i32
    %c0_i32_0 = arith.constant 0 : i32
    %c0_i32_1 = arith.constant 0 : i32
    %c0_i32_2 = arith.constant 0 : i32
    %c0_i32_3 = arith.constant 0 : i32
    return %c0_i32, %c0_i32_0, %c0_i32_1, %c0_i32_2 : i32, i32, i32, i32
  }
  func.func @transform_3(%arg0: i32) -> (i32, i32, i32, i32) {
    %c0_i32 = arith.constant 0 : i32
    %c0_i32_0 = arith.constant 0 : i32
    %c0_i32_1 = arith.constant 0 : i32
    %c0_i32_2 = arith.constant 0 : i32
    %c0_i32_3 = arith.constant 0 : i32
    return %c0_i32, %c0_i32_0, %c0_i32_1, %c0_i32_2 : i32, i32, i32, i32
  }
  func.func @transform_4(%arg0: i32) -> (i32, i32, i32) {
    %c0_i32 = arith.constant 0 : i32
    %c0_i32_0 = arith.constant 0 : i32
    %c0_i32_1 = arith.constant 0 : i32
    %c0_i32_2 = arith.constant 0 : i32
    return %c0_i32, %c0_i32_0, %c0_i32_1 : i32, i32, i32
  }
  func.func @transform_5(%arg0: i32) -> (i32, i32) {
    %c0_i32 = arith.constant 0 : i32
    %c0_i32_0 = arith.constant 0 : i32
    %c0_i32_1 = arith.constant 0 : i32
    return %c0_i32, %c0_i32_0 : i32, i32
  }
  func.func @transform_6(%arg0: i32) -> (i32, i32) {
    %c0_i32 = arith.constant 0 : i32
    %c0_i32_0 = arith.constant 0 : i32
    %c0_i32_1 = arith.constant 0 : i32
    return %c0_i32, %c0_i32_0 : i32, i32
  }
  func.func @transform_7(%arg0: i32) -> (i32, i32) {
    %c0_i32 = arith.constant 0 : i32
    %c0_i32_0 = arith.constant 0 : i32
    %c0_i32_1 = arith.constant 0 : i32
    return %c0_i32, %c0_i32_0 : i32, i32
  }
  func.func @transform_8(%arg0: i32) -> (i32, i32) {
    %c0_i32 = arith.constant 0 : i32
    %c0_i32_0 = arith.constant 0 : i32
    %c0_i32_1 = arith.constant 0 : i32
    return %c0_i32, %c0_i32_0 : i32, i32
  }
  func.func @transform_9(%arg0: i32) -> (i32, i32) {
    %c0_i32 = arith.constant 0 : i32
    %c0_i32_0 = arith.constant 0 : i32
    %c0_i32_1 = arith.constant 0 : i32
    return %c0_i32, %c0_i32_0 : i32, i32
  }
  func.func @transform_10(%arg0: i32) -> (i32, i32) {
    %c0_i32 = arith.constant 0 : i32
    %c0_i32_0 = arith.constant 0 : i32
    %c0_i32_1 = arith.constant 0 : i32
    return %c0_i32, %c0_i32_0 : i32, i32
  }
  func.func @transform_11(%arg0: i32) -> (i32, i32) {
    %c0_i32 = arith.constant 0 : i32
    %c0_i32_0 = arith.constant 0 : i32
    %c0_i32_1 = arith.constant 0 : i32
    return %c0_i32, %c0_i32_0 : i32, i32
  }
  func.func @transform_12(%arg0: i32) -> (i32, i32) {
    %c0_i32 = arith.constant 0 : i32
    %c0_i32_0 = arith.constant 0 : i32
    %c0_i32_1 = arith.constant 0 : i32
    return %c0_i32, %c0_i32_0 : i32, i32
  }
  func.func @transform_13(%arg0: i32) -> (i32, i32) {
    %c0_i32 = arith.constant 0 : i32
    %c0_i32_0 = arith.constant 0 : i32
    %c0_i32_1 = arith.constant 0 : i32
    return %c0_i32, %c0_i32_0 : i32, i32
  }
  func.func @transform_14(%arg0: i32) -> (i32, i32) {
    %c0_i32 = arith.constant 0 : i32
    %c0_i32_0 = arith.constant 0 : i32
    %c0_i32_1 = arith.constant 0 : i32
    return %c0_i32, %c0_i32_0 : i32, i32
  }
  func.func @transform_15(%arg0: i32) -> (i32, i32) {
    %c0_i32 = arith.constant 0 : i32
    %c0_i32_0 = arith.constant 0 : i32
    %c0_i32_1 = arith.constant 0 : i32
    return %c0_i32, %c0_i32_0 : i32, i32
  }
  func.func @transform_16(%arg0: i32) -> (i32, i32) {
    %c0_i32 = arith.constant 0 : i32
    %c0_i32_0 = arith.constant 0 : i32
    %c0_i32_1 = arith.constant 0 : i32
    return %c0_i32, %c0_i32_0 : i32, i32
  }
  func.func @transform_17(%arg0: i32) -> (i32, i32) {
    %c0_i32 = arith.constant 0 : i32
    %c0_i32_0 = arith.constant 0 : i32
    %c0_i32_1 = arith.constant 0 : i32
    return %c0_i32, %c0_i32_0 : i32, i32
  }
  func.func @transform_18(%arg0: i32) -> (i32, i32) {
    %c0_i32 = arith.constant 0 : i32
    %c0_i32_0 = arith.constant 0 : i32
    %c0_i32_1 = arith.constant 0 : i32
    return %c0_i32, %c0_i32_0 : i32, i32
  }
  func.func @transform_19(%arg0: i32) -> (i32, i32, i32) {
    %c0_i32 = arith.constant 0 : i32
    %c0_i32_0 = arith.constant 0 : i32
    %c0_i32_1 = arith.constant 0 : i32
    %c0_i32_2 = arith.constant 0 : i32
    return %c0_i32, %c0_i32_0, %c0_i32_1 : i32, i32, i32
  }
}

</mosaic_0001>

<bundles_post_ra>
// kernel: tpu_custom_call.1
= control target key start
LH: loop header
LB: loop body
LE: loop exit
PB: predicated region body
PF: predicated region fallthrough
CT: control target
= control target key end

     0   :  { %s12058_s0 = inlined_call_operand.vmem [shape: f32[2,16,16], index: 0, kind: input, shape index: {}]   ;;  %s12059_s1 = inlined_call_operand.hbm [shape: f32[2,16,16], index: 1, kind: input, shape index: {}]   ;;  %s12060_s2 = inlined_call_operand.hbm [shape: f32[4,2,16,16], index: 2, kind: input, shape index: {}]   ;;  %s12061_s3 = inlined_call_operand.hbm [shape: f32[4,2,16,16], index: 3, kind: input, shape index: {}]   ;;  %s12062_s4 = inlined_call_operand.vmem [shape: f32[4,1,16], index: 4, kind: input, shape index: {}]   ;;  %s12063_s5 = inlined_call_operand.vmem [shape: f32[16,48], index: 5, kind: input, shape index: {}]   ;;  %s12064_s6 = inlined_call_operand.vmem [shape: f32[1,48], index: 6, kind: input, shape index: {}]   ;;  %s12065_s7 = inlined_call_operand.hbm [shape: f32[16,16], index: 7, kind: input, shape index: {}]   ;;  %s12066_s8 = inlined_call_operand.vmem [shape: f32[1,16], index: 8, kind: input, shape index: {}]   ;;  %s12067_s9 = inlined_call_operand.hbm [shape: f32[16,16], index: 9, kind: input, shape index: {}]   ;;  %s12068_s10 = inlined_call_operand.vmem [shape: f32[1,16], index: 10, kind: input, shape index: {}]   ;;  %s12069_s11 = inlined_call_operand.hbm [shape: f32[16,32], index: 11, kind: input, shape index: {}]   ;;  %s12070_s12 = inlined_call_operand.vmem [shape: f32[1,32], index: 12, kind: input, shape index: {}]   ;;  %s12071_s13 = inlined_call_operand.hbm [shape: f32[16,16], index: 13, kind: input, shape index: {}]   ;;  %s12072_s14 = inlined_call_operand.vmem [shape: f32[1,16], index: 14, kind: input, shape index: {}]   ;;  %s12073_s15 = inlined_call_operand.hbm [shape: f32[16,32], index: 15, kind: input, shape index: {}]   ;;  %s12074_s16 = inlined_call_operand.vmem [shape: f32[1,32], index: 16, kind: input, shape index: {}]   ;;  %s12075_s17 = inlined_call_operand.vmem [shape: f32[32,16], index: 17, kind: input, shape index: {}]   ;;  %s12076_s18 = inlined_call_operand.vmem [shape: f32[1,16], index: 18, kind: input, shape index: {}]   ;;  %s12077_s19 = inlined_call_operand.hbm [shape: f32[2,16,16], index: 19, kind: output, shape index: {}]  }
   0x1   :  { %12103 = sst [smem:[#allocation35_spill]] %s12058_s0 }
   0x2   :  { %12104 = sst [smem:[#allocation36_spill]] %s12059_s1 }
   0x3   :  { %12105 = sst [smem:[#allocation37_spill]] %s12060_s2 }
   0x4   :  { %12106 = sst [smem:[#allocation38_spill]] %s12061_s3 }
   0x5   :  { %24 = vsyncpa [#allocation3], 0 }
   0x6   :  { %25 = vsyncpa [#allocation6], 0 }
   0x7   :  { %26 = vsyncpa [#allocation9], 0 }
   0x8   :  { %27 = vsyncpa [#allocation12], 0 }
   0x9   :  { %28 = vsyncpa [#allocation15], 0 }
   0xa   :  { %29 = vsyncpa [#allocation4], 0  ;;  %s10013_s0 = smov [#allocation5]   ;;  %s10014_s20 = smov [#allocation8]  }
   0xb   :  { %s49_s30 = sshll.u32 %s10013_s0, 4  ;;  %s79_s21 = sshll.u32 %s10014_s20, 4  ;;  %s50_s30 = int_to_ptr.vmem [resolvable:$true] %s49_s30  ;;  %s80_s21 = int_to_ptr.vmem [resolvable:$true] %s79_s21 }
   0xc   :  { %s9829_s1 = scalar_lea.vmem %s50_s30, 2048  ;;  %p9834_p1 = scmp.lt.s32.totalorder %s50_s30, %s50_s30 }
   0xd   :  { %p9830_p0 = scmp.ne.s32.totalorder %s50_s30, %s9829_s1  ;;  %p9835_p2 = scmp.lt.s32.totalorder %s9829_s1, %s9829_s1 }
   0xf   :  { %p9836_p3 = por %p9835_p2, %p9834_p1 }
  0x11   :  { %p9837_p4 = pnand %p9836_p3, %p9830_p0 }
  0x13   :  { %9840 = shalt.err (!%p9837_p4)
}
  0x14   :  { %s10015_s22 = smov 128   ;;  %s10016_s2 = smov 8  }
  0x15   :  { %s12107_s25 = sld [smem:[#allocation37_spill]]  ;;  %s9849_s3 = scalar_lea.vmem %s80_s21, 256 }
  0x16   :  { %p9850_p5 = scmp.ne.s32.totalorder %s80_s21, %s9849_s3  ;;  %p9854_p6 = scmp.lt.s32.totalorder %s80_s21, %s80_s21 }
  0x17   :  { %p9855_p7 = scmp.lt.s32.totalorder %s9849_s3, %s9849_s3 }
  0x19   :  { %p9856_p8 = por %p9855_p7, %p9854_p6 }
  0x1b   :  { %55 = dma.hbm_to_vmem [thread:$0]  %s12107_s25, 2048, %s50_s30, [#allocation6], %s10015_s22, %s10015_s22, %s10016_s2  }
  0x1c   :  { %p9857_p9 = pnand %p9856_p8, %p9850_p5 }
  0x1e   :  { %9860 = shalt.err (!%p9857_p9)
}
  0x1f   :  { %85 = dma.hbm_to_vmem [thread:$0]  %s12065_s7, 256, %s80_s21, [#allocation9], %s10015_s22, %s10015_s22, %s10016_s2  }
  0x20   :  { %s10017_s28 = smov [#allocation11]   ;;  %s10018_s0 = smov [#allocation2]  }
  0x21   :  { %s107_s29 = sshll.u32 %s10017_s28, 4  ;;  %s37_s20 = sshll.u32 %s10018_s0, 4  ;;  %s108_s29 = int_to_ptr.vmem [resolvable:$true] %s107_s29  ;;  %s38_s20 = int_to_ptr.vmem [resolvable:$true] %s37_s20 }
  0x22   :  { %s9869_s30 = scalar_lea.vmem %s108_s29, 256  ;;  %p9874_p11 = scmp.lt.s32.totalorder %s108_s29, %s108_s29 }
  0x23   :  { %p9870_p10 = scmp.ne.s32.totalorder %s108_s29, %s9869_s30  ;;  %p9875_p12 = scmp.lt.s32.totalorder %s9869_s30, %s9869_s30 }
  0x25   :  { %p9876_p13 = por %p9875_p12, %p9874_p11 }
  0x27   :  { %p9877_p0 = pnand %p9876_p13, %p9870_p10 }
  0x29   :  { %9880 = shalt.err (!%p9877_p0)
}
  0x2a   :  { %113 = dma.hbm_to_vmem [thread:$0]  %s12069_s11, 256, %s108_s29, [#allocation12], %s10015_s22, %s10015_s22, %s10016_s2  }
  0x2b   :  { %s9889_s7 = scalar_lea.vmem %s38_s20, 512  ;;  %p9894_p2 = scmp.lt.s32.totalorder %s38_s20, %s38_s20 }
  0x2c   :  { %p9890_p1 = scmp.ne.s32.totalorder %s38_s20, %s9889_s7  ;;  %p9895_p3 = scmp.lt.s32.totalorder %s9889_s7, %s9889_s7 }
  0x2e   :  { %p9896_p4 = por %p9895_p3, %p9894_p2 }
  0x30   :  { %p9897_p5 = pnand %p9896_p4, %p9890_p1 }
  0x32   :  { %9900 = shalt.err (!%p9897_p5)
}
  0x33   :  { %s12108_s25 = sld [smem:[#allocation36_spill]]  ;;  %s10019_s3 = smov [#allocation7]  }
  0x34   :  { %s61_s26 = sshll.u32 %s10019_s3, 4  ;;  %s10020_s27 = smov [#allocation10]   ;;  %s62_s26 = int_to_ptr.vmem [resolvable:$true] %s61_s26 }
  0x35   :  { %s93_s28 = sshll.u32 %s10020_s27, 4  ;;  %s9909_s11 = scalar_lea.vmem %s62_s26, 2048  ;;  %s94_s28 = int_to_ptr.vmem [resolvable:$true] %s93_s28 }
  0x36   :  { %p9910_p6 = scmp.ne.s32.totalorder %s62_s26, %s9909_s11  ;;  %p9914_p7 = scmp.lt.s32.totalorder %s62_s26, %s62_s26 }
  0x37   :  { %p9915_p8 = scmp.lt.s32.totalorder %s9909_s11, %s9909_s11 }
  0x39   :  { %43 = dma.hbm_to_vmem [thread:$0]  %s12108_s25, 512, %s38_s20, [#allocation3], %s10015_s22, %s10015_s22, %s10016_s2  }
  0x3a   :  { %p9916_p9 = por %p9915_p8, %p9914_p7 }
  0x3c   :  { %p9917_p10 = pnand %p9916_p9, %p9910_p6 }
  0x3e   :  { %9920 = shalt.err (!%p9917_p10)
}
  0x3f   :  { %s12109_s30 = sld [smem:[#allocation38_spill]]  ;;  %s9929_s20 = scalar_lea.vmem %s94_s28, 256 }
  0x40   :  { %p9930_p11 = scmp.ne.s32.totalorder %s94_s28, %s9929_s20  ;;  %p9934_p12 = scmp.lt.s32.totalorder %s94_s28, %s94_s28 }
  0x41   :  { %p9935_p13 = scmp.lt.s32.totalorder %s9929_s20, %s9929_s20 }
  0x43   :  { %p9936_p0 = por %p9935_p13, %p9934_p12 }
  0x45   :  { %67 = dma.hbm_to_vmem [thread:$0]  %s12109_s30, 2048, %s62_s26, [#allocation6], %s10015_s22, %s10015_s22, %s10016_s2  }
  0x46   :  { %p9937_p1 = pnand %p9936_p0, %p9930_p11 }
  0x48   :  { %9940 = shalt.err (!%p9937_p1)
}
  0x49   :  { %99 = dma.hbm_to_vmem [thread:$0]  %s12067_s9, 256, %s94_s28, [#allocation9], %s10015_s22, %s10015_s22, %s10016_s2  }
  0x4a   :  { %s10021_s7 = smov [#allocation13]   ;;  %s10022_s24 = smov [#allocation14]  }
  0x4b   :  { %s121_s21 = sshll.u32 %s10021_s7, 4  ;;  %s135_s25 = sshll.u32 %s10022_s24, 4  ;;  %s122_s21 = int_to_ptr.vmem [resolvable:$true] %s121_s21  ;;  %s136_s25 = int_to_ptr.vmem [resolvable:$true] %s135_s25 }
  0x4c   :  { %s9949_s3 = scalar_lea.vmem %s122_s21, 256  ;;  %p9954_p3 = scmp.lt.s32.totalorder %s122_s21, %s122_s21 }
  0x4d   :  { %p9950_p2 = scmp.ne.s32.totalorder %s122_s21, %s9949_s3  ;;  %p9955_p4 = scmp.lt.s32.totalorder %s9949_s3, %s9949_s3 }
  0x4f   :  { %p9956_p5 = por %p9955_p4, %p9954_p3 }
  0x51   :  { %p9957_p6 = pnand %p9956_p5, %p9950_p2 }
  0x53   :  { %9960 = shalt.err (!%p9957_p6)
}
  0x54   :  { %127 = dma.hbm_to_vmem [thread:$0]  %s12071_s13, 256, %s122_s21, [#allocation12], %s10015_s22, %s10015_s22, %s10016_s2  }
  0x55   :  { %s9969_s9 = scalar_lea.vmem %s136_s25, 256  ;;  %p9974_p8 = scmp.lt.s32.totalorder %s136_s25, %s136_s25 }
  0x56   :  { %p9970_p7 = scmp.ne.s32.totalorder %s136_s25, %s9969_s9  ;;  %p9975_p9 = scmp.lt.s32.totalorder %s9969_s9, %s9969_s9 }
  0x58   :  { %p9976_p10 = por %p9975_p9, %p9974_p8 }
  0x5a   :  { %p9977_p11 = pnand %p9976_p10, %p9970_p7 }
  0x5c   :  { %9980 = shalt.err (!%p9977_p11)
}
  0x5d   :  { %141 = dma.hbm_to_vmem [thread:$0]  %s12073_s15, 256, %s136_s25, [#allocation15], %s10015_s22, %s10015_s22, %s10016_s2  }
  0x5e   :  { %10001 = dma.done.wait [#allocation3], 512  }
  0x5f   :  { %10002 = vsyncadd [#allocation3], 4294966784 }
  0x60   :  { %10003 = dma.done.wait [#allocation6], 4096  }
  0x61   :  { %10004 = vsyncadd [#allocation6], 4294963200 }
  0x62   :  { %10005 = dma.done.wait [#allocation9], 512  }
  0x63   :  { %10006 = vsyncadd [#allocation9], 4294966784 }
  0x64   :  { %10007 = dma.done.wait [#allocation12], 512  }
  0x65   :  { %10008 = vsyncadd [#allocation12], 4294966784 }
  0x66   :  { %10009 = dma.done.wait [#allocation15], 256  }
  0x67   :  { %10010 = vsyncadd [#allocation15], 4294967040  ;;  %vm245_vm0 = vcmask 130048   ;;  %s12110_s0 = sld [smem:[#allocation35_spill]]  ;;  %v226_v28 = vld [vmem:[#allocation11 + $0x8] sm:$0xff]  ;;  %v225_v29 = vld [vmem:[#allocation11] sm:$0xff] }
  0x68   :  { %v176_v30 = vld [vmem:[#allocation2] sm:$0xff]  ;;  %8875 = vmatprep.subr.mxu0 %v226_v28  ;;  %v217_v31 = vld [vmem:[%s12063_s5 + $0x8] sm:$0xff]  ;;  %v178_v33 = vld [vmem:[#allocation2 + $0x10] sm:$0xff]  ;;  %s10023_s9 = smov 16   ;;  %s10024_s21 = smov 112   ;;  %vm4293_vm1 = vcmask 261120  }
  0x69   :  { %8879 = vmatprep.mubr.msk.f32.mxu0 %vm245_vm0, %v176_v30  ;;  %8876 = vmatpush3.msra.mxu0 %v226_v28  ;;  %v177_v32 = vld [vmem:[#allocation2 + $0x8] sm:$0xff]  ;;  %v179_v34 = vld [vmem:[#allocation2 + $0x18] sm:$0xff]  ;;  %v216_v35 = vld [vmem:[%s12063_s5] sm:$0xff]  ;;  %s10025_s24 = smov 32   ;;  %s10026_s25 = smov 96  }
  0x6a   :  { %8885 = vmatprep.subr.mxu1 %v217_v31  ;;  %8877 = vmatprep.subr.mxu0 %v225_v29  ;;  %v10209_v36 = vld [vmem:[%s12062_s4 + $0x1] ss:$0 sm:$0xff]  ;;  %v10215_v37 = vld [vmem:[%s12062_s4] ss:$0 sm:$0xff]  ;;  %v10220_v38 = vld [vmem:[%s12062_s4 + $0x2] ss:$0 sm:$0xff] }
  0x6b   :  { %8886 = vmatpush3.msra.mxu1 %v217_v31  ;;  %8878 = vmatpush3.msra.mxu0 %v225_v29  ;;  %v10227_v39 = vld [vmem:[%s12062_s4 + $0x3] ss:$0 sm:$0xff]  ;;  %v10239_v53 = vld [vmem:[%s12070_s12] ss:$0 sm:$0xff] }
  0x6c   :  { %8880 = vmatmul.mubr.msk.f32.vlgmr.msra.gmra.mxu0 %vm245_vm0, %v177_v32  ;;  %8887 = vmatprep.subr.mxu1 %v216_v35  ;;  %v8291_v56 = vld [vmem:[%s12064_s6] ss:$0 sm:$0xff] }
  0x6d   :  { %v172_v0 = vld [vmem:[%s12110_s0] sm:$0xff]  ;;  %v174_v1 = vld [vmem:[%s12110_s0 + $0x10] sm:$0xff]  ;;  %v173_v2 = vld [vmem:[%s12110_s0 + $0x8] sm:$0xff]  ;;  %8882 = vmatprep.mubr.msk.f32.mxu0 %vm245_vm0, %v178_v33  ;;  %8888 = vmatpush3.msra.mxu1 %v216_v35 }
  0x6e   :  { %v411_v3 = vsel %vm245_vm0, %v172_v0, 0.0  ;;  %v412_v4 = vsel %vm245_vm0, %v174_v1, 0.0  ;;  %v175_v5 = vld [vmem:[%s12110_s0 + $0x18] sm:$0xff]  ;;  %v416_v6 = vsel %vm245_vm0, %v173_v2, 0.0 }
  0x6f   :  { %v413_v7 = vadd.f32 %v412_v4, %v411_v3  ;;  %v417_v8 = vsel %vm245_vm0, %v175_v5, 0.0 }
  0x70   :  { %v418_v9 = vadd.f32 %v417_v8, %v416_v6  ;;  %8883 = vmatmul.mubr.msk.f32.gmra.mxu0 %vm245_vm0, %v179_v34 }
  0x71   :  { %414 = vadd.xlane.f32.xlu0 %v413_v7 }
  0x75   :  { %419 = vadd.xlane.f32.xlu0 %v418_v9 }
  0x8b   :  { %383 = vrot.lane.b32.xlu0 %v10215_v37, %s10023_s9 }
  0xfa   :  { %v415_v10 = vpop.xlane.xlu0 %414 }
  0xfb   :  { %v422_v11 = vmul.f32 0.03125, %v415_v10 }
  0xfd   :  { %v424_v12 = vsub.f32 %v172_v0, %v422_v11  ;;  %v426_v13 = vsub.f32 %v174_v1, %v422_v11 }
  0xfe   :  { %v420_v14 = vpop.xlane.xlu0 %419 }
  0xff   :  { %v423_v15 = vmul.f32 0.03125, %v420_v14  ;;  %v428_v16 = vmul.f32 %v424_v12, %v424_v12  ;;  %v430_v17 = vmul.f32 %v426_v13, %v426_v13 }
 0x101   :  { %v425_v18 = vsub.f32 %v173_v2, %v423_v15  ;;  %v427_v19 = vsub.f32 %v175_v5, %v423_v15  ;;  %v432_v20 = vsel %vm245_vm0, %v428_v16, 0.0  ;;  %v433_v21 = vsel %vm245_vm0, %v430_v17, 0.0 }
 0x102   :  { %v434_v22 = vadd.f32 %v433_v21, %v432_v20  ;;  %v10247_v58 = vpop.permute.xlu0 %383 }
 0x103   :  { %v429_v23 = vmul.f32 %v425_v18, %v425_v18  ;;  %v431_v24 = vmul.f32 %v427_v19, %v427_v19 }
 0x104   :  { %435 = vadd.xlane.f32.xlu1 %v434_v22 }
 0x105   :  { %v437_v25 = vsel %vm245_vm0, %v429_v23, 0.0  ;;  %v438_v26 = vsel %vm245_vm0, %v431_v24, 0.0 }
 0x106   :  { %v439_v27 = vadd.f32 %v438_v26, %v437_v25 }
 0x108   :  { %440 = vadd.xlane.f32.xlu1 %v439_v27 }
 0x119   :  { %390 = vrot.lane.b32.xlu1 %v10209_v36, %s10023_s9 }
 0x11d   :  { %397 = vrot.lane.b32.xlu1 %v10220_v38, %s10023_s9 }
 0x121   :  { %404 = vrot.lane.b32.xlu1 %v10227_v39, %s10023_s9 }
 0x12c   :  { %v10234_v52 = vpop.f32.mrf.mxu0 }
 0x12e   :  { %v324_v54 = vpop.f32.mrf.mxu0 }
 0x12f   :  { %v10242_v55 = vadd.f32 %v10239_v53, %v324_v54 }
 0x18d   :  { %v436_v40 = vpop.xlane.xlu1 %435 }
 0x18e   :  { %v442_v41 = vmul.f32 0.03125, %v436_v40 }
 0x190   :  { %v444_v42 = vadd.f32 1e-05, %v442_v41 }
 0x191   :  { %v441_v43 = vpop.xlane.xlu1 %440 }
 0x192   :  { %9476 = vrsqrt.f32 %v444_v42  ;;  %v443_v44 = vmul.f32 0.03125, %v441_v43 }
 0x194   :  { %v445_v45 = vadd.f32 1e-05, %v443_v44 }
 0x195   :  { %v10276_v8 = vpop.permute.xlu1 %390 }
 0x196   :  { %9478 = vrsqrt.f32 %v445_v45 }
 0x19f   :  { %v9477_v46 = vpop.eup %9476 }
 0x1a0   :  { %v448_v47 = vmul.f32 %v9477_v46, %v424_v12  ;;  %v450_v50 = vmul.f32 %v9477_v46, %v426_v13  ;;  %v10292_v13 = vpop.permute.xlu1 %397 }
 0x1a2   :  { %8889 = vmatprep.mubr.msk.f32.mxu1 %vm245_vm0, %v448_v47 }
 0x1a3   :  { %v9479_v48 = vpop.eup %9478 }
 0x1a4   :  { %v449_v49 = vmul.f32 %v9479_v48, %v425_v18  ;;  %v451_v51 = vmul.f32 %v9479_v48, %v427_v19  ;;  %v10303_v17 = vpop.permute.xlu1 %404 }
 0x1a6   :  { %8890 = vmatmul.mubr.msk.f32.vlgmr.msra.gmra.mxu1 %vm245_vm0, %v449_v49 }
 0x1a7   :  { %8892 = vmatprep.mubr.msk.f32.mxu1 %vm245_vm0, %v450_v50 }
 0x1aa   :  { %8893 = vmatmul.mubr.msk.f32.gmra.mxu1 %vm245_vm0, %v451_v51 }
 0x266   :  { %v8891_v57 = vpop.f32.mrf.mxu1 }
 0x267   :  { %v10249_v59 = vadd.f32 %v8891_v57, %v8291_v56 }
 0x268   :  { %v536_v60 = vpop.f32.mrf.mxu1 }
 0x269   :  { %v10251_v61 = vadd.f32 %v8291_v56, %v536_v60  ;;  %v556_v62 = vmul.f32 %v10249_v59, %v10247_v58  ;;  %v560_v9 = vmul.f32 %v10249_v59, %v10276_v8  ;;  %v564_v14 = vmul.f32 %v10249_v59, %v10292_v13 }
 0x26a   :  { %v8894_v63 = vpop.f32.mrf.mxu1  ;;  %v568_v19 = vmul.f32 %v10249_v59, %v10303_v17  ;;  %v600_v27 = vmul.f32 0.5, %v10249_v59 }
 0x26b   :  { %v10255_v0 = vadd.f32 %v8894_v63, %v8291_v56  ;;  %607 = vrot.lane.b32.xlu0 %v556_v62, %s10024_s21  ;;  %v10259_v1 = vmul.f32 0.5, %v10251_v61  ;;  %v555_v2 = vmul.f32 %v10251_v61, %v10247_v58  ;;  %v559_v10 = vmul.f32 %v10251_v61, %v10276_v8 }
 0x26c   :  { %v546_v3 = vpop.f32.mrf.mxu1  ;;  %v563_v15 = vmul.f32 %v10251_v61, %v10292_v13  ;;  %v567_v20 = vmul.f32 %v10251_v61, %v10303_v17 }
 0x26d   :  { %v10263_v4 = vadd.f32 %v8291_v56, %v546_v3  ;;  %8899 = vmatprep.mubr.msk.f32.mxu0 %vm245_vm0, %v10259_v1  ;;  %605 = vrot.lane.b32.xlu1 %v555_v2, %s10024_s21  ;;  %v558_v5 = vmul.f32 %v10255_v0, %v10247_v58  ;;  %v562_v11 = vmul.f32 %v10255_v0, %v10276_v8  ;;  %v602_v30 = vmul.f32 0.5, %v10255_v0 }
 0x26e   :  { %v566_v16 = vmul.f32 %v10255_v0, %v10292_v13  ;;  %v570_v21 = vmul.f32 %v10255_v0, %v10303_v17 }
 0x26f   :  { %698 = vrot.lane.b32.xlu0 %v558_v5, %s10024_s21  ;;  %v10272_v6 = vmul.f32 0.5, %v10263_v4  ;;  %v557_v7 = vmul.f32 %v10263_v4, %v10247_v58  ;;  %v561_v12 = vmul.f32 %v10263_v4, %v10276_v8  ;;  %v565_v18 = vmul.f32 %v10263_v4, %v10292_v13 }
 0x270   :  { %v569_v22 = vmul.f32 %v10263_v4, %v10303_v17 }
 0x271   :  { %8906 = vmatprep.mubr.msk.f32.mxu1 %vm245_vm0, %v10272_v6  ;;  %696 = vrot.lane.b32.xlu1 %v557_v7, %s10024_s21 }
 0x273   :  { %789 = vrot.lane.b32.xlu0 %v560_v9, %s10024_s21  ;;  %v181_v9 = vld [vmem:[#allocation5 + $0x8] sm:$0xff] }
 0x275   :  { %787 = vrot.lane.b32.xlu1 %v559_v10, %s10024_s21 }
 0x277   :  { %874 = vrot.lane.b32.xlu0 %v562_v11, %s10024_s21  ;;  %v180_v11 = vld [vmem:[#allocation5] sm:$0xff] }
 0x279   :  { %872 = vrot.lane.b32.xlu1 %v561_v12, %s10024_s21 }
 0x27b   :  { %959 = vrot.lane.b32.xlu0 %v564_v14, %s10024_s21 }
 0x27d   :  { %957 = vrot.lane.b32.xlu1 %v563_v15, %s10024_s21 }
 0x27f   :  { %1044 = vrot.lane.b32.xlu0 %v566_v16, %s10024_s21 }
 0x281   :  { %1042 = vrot.lane.b32.xlu1 %v565_v18, %s10024_s21  ;;  %v183_v18 = vld [vmem:[#allocation5 + $0x18] sm:$0xff] }
 0x283   :  { %1129 = vrot.lane.b32.xlu0 %v568_v19, %s10024_s21 }
 0x285   :  { %1127 = vrot.lane.b32.xlu1 %v567_v20, %s10024_s21  ;;  %v185_v20 = vld [vmem:[#allocation5 + $0x28] sm:$0xff] }
 0x287   :  { %1214 = vrot.lane.b32.xlu0 %v570_v21, %s10024_s21 }
 0x289   :  { %1212 = vrot.lane.b32.xlu1 %v569_v22, %s10024_s21 }
 0x28b   :  { %578 = vrot.lane.b32.xlu0 %v10209_v36, %s10025_s24 }
 0x28d   :  { %571 = vrot.lane.b32.xlu1 %v10215_v37, %s10025_s24 }
 0x291   :  { %585 = vrot.lane.b32.xlu1 %v10220_v38, %s10025_s24 }
 0x295   :  { %592 = vrot.lane.b32.xlu1 %v10227_v39, %s10025_s24 }
 0x2dd   :  { %v608_v23 = vpop.permute.xlu0 %607 }
 0x2de   :  { %8895 = vmatprep.subr.msk.mxu0 %vm245_vm0, %v608_v23 }
 0x2df   :  { %8896 = vmatpush3.xpose.msk.msra.mxu0 %vm245_vm0, %v608_v23  ;;  %v606_v24 = vpop.permute.xlu1 %605  ;;  %v182_v23 = vld [vmem:[#allocation5 + $0x10] sm:$0xff] }
 0x2e0   :  { %8897 = vmatprep.subr.msk.mxu0 %vm245_vm0, %v606_v24 }
 0x2e1   :  { %v699_v25 = vpop.permute.xlu0 %698 }
 0x2e2   :  { %8902 = vmatprep.subr.msk.mxu1 %vm245_vm0, %v699_v25 }
 0x2e3   :  { %8898 = vmatpush3.xpose.msk.msra.mxu0 %vm245_vm0, %v606_v24  ;;  %8903 = vmatpush3.xpose.msk.msra.mxu1 %vm245_vm0, %v699_v25  ;;  %v697_v26 = vpop.permute.xlu1 %696 }
 0x2e4   :  { %8904 = vmatprep.subr.msk.mxu1 %vm245_vm0, %v697_v26 }
 0x2e5   :  { %v790_v28 = vpop.permute.xlu0 %789 }
 0x2e6   :  { %8900 = vmatmul.mubr.msk.f32.vlgmr.msra.gmra.mxu0 %vm245_vm0, %v600_v27  ;;  %8909 = vmatprep.subr.msk.mxu0 %vm245_vm0, %v790_v28 }
 0x2e7   :  { %8905 = vmatpush3.xpose.msk.msra.mxu1 %vm245_vm0, %v697_v26  ;;  %8910 = vmatpush3.xpose.msk.msra.mxu0 %vm245_vm0, %v790_v28  ;;  %v788_v29 = vpop.permute.xlu1 %787 }
 0x2e8   :  { %8913 = vmatprep.mubr.msk.f32.mxu0 %vm245_vm0, %v10259_v1  ;;  %8911 = vmatprep.subr.msk.mxu0 %vm245_vm0, %v788_v29 }
 0x2e9   :  { %v875_v31 = vpop.permute.xlu0 %874 }
 0x2ea   :  { %8907 = vmatmul.mubr.msk.f32.vlgmr.msra.gmra.mxu1 %vm245_vm0, %v602_v30  ;;  %8916 = vmatprep.subr.msk.mxu1 %vm245_vm0, %v875_v31 }
 0x2eb   :  { %8912 = vmatpush3.xpose.msk.msra.mxu0 %vm245_vm0, %v788_v29  ;;  %8917 = vmatpush3.xpose.msk.msra.mxu1 %vm245_vm0, %v875_v31  ;;  %v873_v32 = vpop.permute.xlu1 %872  ;;  %v184_v31 = vld [vmem:[#allocation5 + $0x20] sm:$0xff] }
 0x2ec   :  { %8920 = vmatprep.mubr.msk.f32.mxu1 %vm245_vm0, %v10272_v6  ;;  %8918 = vmatprep.subr.msk.mxu1 %vm245_vm0, %v873_v32 }
 0x2ed   :  { %v960_v33 = vpop.permute.xlu0 %959 }
 0x2ee   :  { %8914 = vmatmul.mubr.msk.f32.vlgmr.msra.gmra.mxu0 %vm245_vm0, %v600_v27  ;;  %8923 = vmatprep.subr.msk.mxu0 %vm245_vm0, %v960_v33 }
 0x2ef   :  { %8919 = vmatpush3.xpose.msk.msra.mxu1 %vm245_vm0, %v873_v32  ;;  %8924 = vmatpush3.xpose.msk.msra.mxu0 %vm245_vm0, %v960_v33  ;;  %v958_v34 = vpop.permute.xlu1 %957 }
 0x2f0   :  { %8927 = vmatprep.mubr.msk.f32.mxu0 %vm245_vm0, %v10259_v1  ;;  %8925 = vmatprep.subr.msk.mxu0 %vm245_vm0, %v958_v34 }
 0x2f1   :  { %v1045_v35 = vpop.permute.xlu0 %1044 }
 0x2f2   :  { %8921 = vmatmul.mubr.msk.f32.vlgmr.msra.gmra.mxu1 %vm245_vm0, %v602_v30  ;;  %8930 = vmatprep.subr.msk.mxu1 %vm245_vm0, %v1045_v35 }
 0x2f3   :  { %8926 = vmatpush3.xpose.msk.msra.mxu0 %vm245_vm0, %v958_v34  ;;  %8931 = vmatpush3.xpose.msk.msra.mxu1 %vm245_vm0, %v1045_v35  ;;  %v1043_v36 = vpop.permute.xlu1 %1042  ;;  %v189_v35 = vld [vmem:[#allocation5 + $0x48] sm:$0xff] }
 0x2f4   :  { %8934 = vmatprep.mubr.msk.f32.mxu1 %vm245_vm0, %v10272_v6  ;;  %8932 = vmatprep.subr.msk.mxu1 %vm245_vm0, %v1043_v36 }
 0x2f5   :  { %v1130_v37 = vpop.permute.xlu0 %1129 }
 0x2f6   :  { %8928 = vmatmul.mubr.msk.f32.vlgmr.msra.gmra.mxu0 %vm245_vm0, %v600_v27  ;;  %8937 = vmatprep.subr.msk.mxu0 %vm245_vm0, %v1130_v37 }
 0x2f7   :  { %8933 = vmatpush3.xpose.msk.msra.mxu1 %vm245_vm0, %v1043_v36  ;;  %8938 = vmatpush3.xpose.msk.msra.mxu0 %vm245_vm0, %v1130_v37  ;;  %v1128_v38 = vpop.permute.xlu1 %1127 }
 0x2f8   :  { %8941 = vmatprep.mubr.msk.f32.mxu0 %vm245_vm0, %v10259_v1  ;;  %8939 = vmatprep.subr.msk.mxu0 %vm245_vm0, %v1128_v38 }
 0x2f9   :  { %v1215_v39 = vpop.permute.xlu0 %1214 }
 0x2fa   :  { %8935 = vmatmul.mubr.msk.f32.vlgmr.msra.gmra.mxu1 %vm245_vm0, %v602_v30  ;;  %8944 = vmatprep.subr.msk.mxu1 %vm245_vm0, %v1215_v39 }
 0x2fb   :  { %8940 = vmatpush3.xpose.msk.msra.mxu0 %vm245_vm0, %v1128_v38  ;;  %8945 = vmatpush3.xpose.msk.msra.mxu1 %vm245_vm0, %v1215_v39  ;;  %v1213_v40 = vpop.permute.xlu1 %1212  ;;  %v186_v39 = vld [vmem:[#allocation5 + $0x30] sm:$0xff] }
 0x2fc   :  { %8948 = vmatprep.mubr.msk.f32.mxu1 %vm245_vm0, %v10272_v6  ;;  %8946 = vmatprep.subr.msk.mxu1 %vm245_vm0, %v1213_v40  ;;  %v10426_v6 = vpop.f32.mrf.mxu0 }
 0x2fd   :  { %v10376_v41 = vpop.permute.xlu0 %578 }
 0x2fe   :  { %8942 = vmatmul.mubr.msk.f32.vlgmr.msra.gmra.mxu0 %vm245_vm0, %v600_v27  ;;  %v582_v42 = vmul.f32 %v10376_v41, %v10249_v59  ;;  %v581_v43 = vmul.f32 %v10376_v41, %v10251_v61  ;;  %v584_v45 = vmul.f32 %v10376_v41, %v10255_v0  ;;  %v583_v51 = vmul.f32 %v10376_v41, %v10263_v4  ;;  %v10428_v7 = vpop.f32.mrf.mxu0  ;;  %v187_v27 = vld [vmem:[#allocation5 + $0x38] sm:$0xff] }
 0x2ff   :  { %8947 = vmatpush3.xpose.msk.msra.mxu1 %vm245_vm0, %v1213_v40  ;;  %v10384_v44 = vpop.permute.xlu1 %571 }
 0x300   :  { %1491 = vrot.lane.b32.xlu0 %v582_v42, %s10026_s25  ;;  %1489 = vrot.lane.b32.xlu1 %v581_v43, %s10026_s25  ;;  %v577_v46 = vmul.f32 %v10384_v44, %v10255_v0  ;;  %v575_v48 = vmul.f32 %v10384_v44, %v10249_v59  ;;  %v574_v50 = vmul.f32 %v10384_v44, %v10251_v61  ;;  %v188_v43 = vld [vmem:[#allocation5 + $0x40] sm:$0xff] }
 0x301   :  { %v576_v54 = vmul.f32 %v10384_v44, %v10263_v4 }
 0x302   :  { %8949 = vmatmul.mubr.msk.f32.vlgmr.msra.gmra.mxu1 %vm245_vm0, %v602_v30 }
 0x303   :  { %v10393_v47 = vpop.permute.xlu1 %585 }
 0x304   :  { %1580 = vrot.lane.b32.xlu1 %v584_v45, %s10026_s25  ;;  %1758 = vrot.lane.b32.xlu0 %v577_v46, %s10026_s25  ;;  %v591_v49 = vmul.f32 %v10393_v47, %v10255_v0  ;;  %v589_v56 = vmul.f32 %v10393_v47, %v10249_v59  ;;  %v588_v57 = vmul.f32 %v10393_v47, %v10251_v61 }
 0x307   :  { %v10418_v60 = vpop.permute.xlu1 %592 }
 0x308   :  { %1669 = vrot.lane.b32.xlu1 %v575_v48, %s10026_s25  ;;  %1936 = vrot.lane.b32.xlu0 %v591_v49, %s10026_s25 }
 0x30c   :  { %1667 = vrot.lane.b32.xlu1 %v574_v50, %s10026_s25  ;;  %1578 = vrot.lane.b32.xlu0 %v583_v51, %s10026_s25 }
 0x310   :  { %1756 = vrot.lane.b32.xlu0 %v576_v54, %s10026_s25  ;;  %1847 = vrot.lane.b32.xlu1 %v589_v56, %s10026_s25  ;;  %v191_v54 = vld [vmem:[#allocation5 + $0x58] sm:$0xff] }
 0x314   :  { %1845 = vrot.lane.b32.xlu1 %v588_v57, %s10026_s25  ;;  %v193_v57 = vld [vmem:[#allocation5 + $0x68] sm:$0xff] }
 0x372   :  { %v1492_v62 = vpop.permute.xlu0 %1491  ;;  %v1490_v63 = vpop.permute.xlu1 %1489 }
 0x373   :  { %8951 = vmatprep.subr.mxu1 %v1492_v62 }
 0x374   :  { %8952 = vmatpush3.msra.mxu1 %v1492_v62 }
 0x375   :  { %8953 = vmatprep.subr.mxu1 %v1490_v63 }
 0x376   :  { %8954 = vmatpush3.msra.mxu1 %v1490_v63  ;;  %v10420_v1 = vpop.permute.xlu1 %1580 }
 0x377   :  { %8958 = vmatprep.subr.mxu1 %v10420_v1 }
 0x37a   :  { %v1670_v2 = vpop.permute.xlu1 %1669 }
 0x37b   :  { %8965 = vmatprep.subr.mxu0 %v1670_v2 }
 0x37c   :  { %8966 = vmatpush3.msra.mxu0 %v1670_v2 }
 0x37e   :  { %v1668_v3 = vpop.permute.xlu1 %1667 }
 0x37f   :  { %8967 = vmatprep.subr.mxu0 %v1668_v3 }
 0x380   :  { %8968 = vmatpush3.msra.mxu0 %v1668_v3  ;;  %v190_v3 = vld [vmem:[#allocation5 + $0x50] sm:$0xff] }
 0x382   :  { %v10423_v5 = vpop.permute.xlu1 %1847 }
 0x383   :  { %8979 = vmatprep.subr.mxu0 %v10423_v5 }
 0x3a6   :  { %v8901_v10 = vpop.f32.mrf.mxu0 }
 0x3a7   :  { %v10430_v12 = vadd.f32 %v8901_v10, %v181_v9 }
 0x3a8   :  { %v685_v14 = vpop.f32.mrf.mxu0 }
 0x3a9   :  { %v10432_v15 = vadd.f32 %v685_v14, %v180_v11  ;;  %v1314_v16 = vsel %vm245_vm0, %v10430_v12, -inf  ;;  %v192_v11 = vld [vmem:[#allocation5 + $0x60] sm:$0xff] }
 0x3aa   :  { %v8908_v19 = vpop.f32.mrf.mxu1  ;;  %1315 = vmax.xlane.f32.xlu0 %v1314_v16 }
 0x3ab   :  { %v10436_v21 = vadd.f32 %v8908_v19, %v183_v18  ;;  %v1311_v22 = vsel %vm245_vm0, %v10432_v15, -inf }
 0x3ac   :  { %v776_v24 = vpop.f32.mrf.mxu1 }
 0x3ad   :  { %v10442_v28 = vadd.f32 %v776_v24, %v182_v23  ;;  %v1320_v29 = vsel %vm245_vm0, %v10436_v21, -inf  ;;  %v195_v23 = vld [vmem:[#allocation5 + $0x78] sm:$0xff] }
 0x3ae   :  { %v8915_v25 = vpop.f32.mrf.mxu0  ;;  %1312 = vmax.xlane.f32.xlu0 %v1311_v22 }
 0x3af   :  { %v10440_v26 = vadd.f32 %v8915_v25, %v185_v20  ;;  %v1317_v37 = vsel %vm245_vm0, %v10442_v28, -inf  ;;  %v194_v25 = vld [vmem:[#allocation5 + $0x70] sm:$0xff] }
 0x3b0   :  { %v861_v32 = vpop.f32.mrf.mxu0 }
 0x3b1   :  { %v1326_v30 = vsel %vm245_vm0, %v10440_v26, -inf  ;;  %v10450_v36 = vadd.f32 %v861_v32, %v184_v31 }
 0x3b2   :  { %v8922_v33 = vpop.f32.mrf.mxu1  ;;  %1321 = vmax.xlane.f32.xlu0 %v1320_v29  ;;  %1327 = vmax.xlane.f32.xlu1 %v1326_v30 }
 0x3b3   :  { %v10448_v34 = vadd.f32 %v8922_v33, %v187_v27  ;;  %v1323_v50 = vsel %vm245_vm0, %v10450_v36, -inf }
 0x3b4   :  { %v946_v40 = vpop.f32.mrf.mxu1 }
 0x3b5   :  { %v1332_v38 = vsel %vm245_vm0, %v10448_v34, -inf  ;;  %v10458_v48 = vadd.f32 %v946_v40, %v186_v39  ;;  %v590_v39 = vmul.f32 %v10393_v47, %v10263_v4  ;;  %v10503_v40 = vpop.permute.xlu0 %1758 }
 0x3b6   :  { %v8929_v42 = vpop.f32.mrf.mxu0  ;;  %1318 = vmax.xlane.f32.xlu0 %v1317_v37  ;;  %1333 = vmax.xlane.f32.xlu1 %v1332_v38  ;;  %v596_v37 = vmul.f32 %v10418_v60, %v10249_v59  ;;  %v595_v38 = vmul.f32 %v10418_v60, %v10251_v61  ;;  %v10512_v61 = vpop.permute.xlu1 %1845 }
 0x3b7   :  { %v10456_v45 = vadd.f32 %v8929_v42, %v189_v35  ;;  %v1329_v63 = vsel %vm245_vm0, %v10458_v48, -inf }
 0x3b8   :  { %v1031_v46 = vpop.f32.mrf.mxu0 }
 0x3b9   :  { %v10460_v49 = vadd.f32 %v1031_v46, %v188_v43  ;;  %v1338_v51 = vsel %vm245_vm0, %v10456_v45, -inf  ;;  %v10505_v42 = vpop.permute.xlu0 %1936 }
 0x3ba   :  { %v8936_v56 = vpop.f32.mrf.mxu1  ;;  %1324 = vmax.xlane.f32.xlu0 %v1323_v50  ;;  %1339 = vmax.xlane.f32.xlu1 %v1338_v51 }
 0x3bb   :  { %v10466_v62 = vadd.f32 %v8936_v56, %v191_v54  ;;  %v1335_v2 = vsel %vm245_vm0, %v10460_v49, -inf }
 0x3bc   :  { %v1116_v9 = vpop.f32.mrf.mxu1 }
 0x3bd   :  { %v10474_v18 = vadd.f32 %v1116_v9, %v190_v3  ;;  %v1344_v20 = vsel %vm245_vm0, %v10466_v62, -inf  ;;  %v10507_v43 = vpop.permute.xlu0 %1578 }
 0x3be   :  { %v8943_v10 = vpop.f32.mrf.mxu0  ;;  %1330 = vmax.xlane.f32.xlu0 %v1329_v63  ;;  %1336 = vmax.xlane.f32.xlu1 %v1335_v2 }
 0x3bf   :  { %v10472_v14 = vadd.f32 %v8943_v10, %v193_v57  ;;  %v1341_v31 = vsel %vm245_vm0, %v10474_v18, -inf }
 0x3c0   :  { %v1201_v16 = vpop.f32.mrf.mxu0 }
 0x3c1   :  { %v10476_v19 = vadd.f32 %v1201_v16, %v192_v11  ;;  %v1350_v22 = vsel %vm245_vm0, %v10472_v14, -inf  ;;  %v10509_v46 = vpop.permute.xlu0 %1756 }
 0x3c2   :  { %v8950_v24 = vpop.f32.mrf.mxu1  ;;  %1345 = vmax.xlane.f32.xlu0 %v1344_v20  ;;  %1351 = vmax.xlane.f32.xlu1 %v1350_v22 }
 0x3c3   :  { %v10482_v29 = vadd.f32 %v8950_v24, %v195_v23  ;;  %v1347_v32 = vsel %vm245_vm0, %v10476_v19, -inf }
 0x3c4   :  { %v1286_v27 = vpop.f32.mrf.mxu1 }
 0x3c5   :  { %v10484_v30 = vadd.f32 %v1286_v27, %v194_v25  ;;  %v1356_v35 = vsel %vm245_vm0, %v10482_v29, -inf }
 0x3c6   :  { %1342 = vmax.xlane.f32.xlu0 %v1341_v31  ;;  %1348 = vmax.xlane.f32.xlu1 %v1347_v32 }
 0x3c7   :  { %v1353_v33 = vsel %vm245_vm0, %v10484_v30, -inf }
 0x3ca   :  { %1354 = vmax.xlane.f32.xlu0 %v1353_v33  ;;  %1357 = vmax.xlane.f32.xlu1 %v1356_v35 }
 0x3db   :  { %2029 = vrot.lane.b32.xlu1 %v596_v37, %s10026_s25 }
 0x3df   :  { %2027 = vrot.lane.b32.xlu1 %v595_v38, %s10026_s25 }
 0x3e0   :  { %1934 = vrot.lane.b32.xlu0 %v590_v39, %s10026_s25 }
 0x433   :  { %v1316_v59 = vpop.xlane.xlu0 %1315 }
 0x434   :  { %v1360_v50 = vsub.f32 %v10430_v12, %v1316_v59 }
 0x436   :  { %v1377_v51 = vmul.f32 1.442695, %v1360_v50 }
 0x437   :  { %v1313_v54 = vpop.xlane.xlu0 %1312 }
 0x438   :  { %9480 = vpow2.f32 %v1377_v51  ;;  %v1359_v56 = vsub.f32 %v10432_v15, %v1313_v54 }
 0x43a   :  { %v1375_v57 = vmul.f32 1.442695, %v1359_v56 }
 0x43b   :  { %v1322_v63 = vpop.xlane.xlu0 %1321  ;;  %v1328_v2 = vpop.xlane.xlu1 %1327 }
 0x43c   :  { %9482 = vpow2.f32 %v1375_v57  ;;  %v1362_v3 = vsub.f32 %v10436_v21, %v1322_v63  ;;  %v1364_v9 = vsub.f32 %v10440_v26, %v1328_v2 }
 0x43e   :  { %v1381_v10 = vmul.f32 1.442695, %v1362_v3  ;;  %v1385_v11 = vmul.f32 1.442695, %v1364_v9 }
 0x43f   :  { %v1319_v16 = vpop.xlane.xlu0 %1318  ;;  %v1334_v20 = vpop.xlane.xlu1 %1333 }
 0x440   :  { %9484 = vpow2.f32 %v1381_v10  ;;  %v1361_v12 = vsub.f32 %v10442_v28, %v1319_v16  ;;  %v1366_v22 = vsub.f32 %v10448_v34, %v1334_v20 }
 0x441   :  { %9486 = vpow2.f32 %v1385_v11 }
 0x442   :  { %v1379_v23 = vmul.f32 1.442695, %v1361_v12  ;;  %v1389_v15 = vmul.f32 1.442695, %v1366_v22 }
 0x443   :  { %v1325_v24 = vpop.xlane.xlu0 %1324  ;;  %v1340_v25 = vpop.xlane.xlu1 %1339 }
 0x444   :  { %9488 = vpow2.f32 %v1379_v23  ;;  %v1363_v27 = vsub.f32 %v10450_v36, %v1325_v24  ;;  %v1368_v21 = vsub.f32 %v10456_v45, %v1340_v25 }
 0x445   :  { %v10521_v26 = vpop.eup %9480  ;;  %9490 = vpow2.f32 %v1389_v15 }
 0x446   :  { %v1383_v31 = vmul.f32 1.442695, %v1363_v27  ;;  %v1393_v32 = vmul.f32 1.442695, %v1368_v21  ;;  %v1410_v28 = vsel %vm245_vm0, %v10521_v26, 0.0 }
 0x447   :  { %v1331_v33 = vpop.xlane.xlu0 %1330  ;;  %1411 = vadd.xlane.f32.xlu0 %v1410_v28  ;;  %v1337_v34 = vpop.xlane.xlu1 %1336 }
 0x448   :  { %9492 = vpow2.f32 %v1383_v31  ;;  %v1365_v35 = vsub.f32 %v10458_v48, %v1331_v33  ;;  %v1367_v37 = vsub.f32 %v10460_v49, %v1337_v34 }
 0x449   :  { %v10527_v38 = vpop.eup %9482  ;;  %9494 = vpow2.f32 %v1393_v32 }
 0x44a   :  { %v1387_v36 = vmul.f32 1.442695, %v1365_v35  ;;  %v1391_v45 = vmul.f32 1.442695, %v1367_v37  ;;  %v1407_v39 = vsel %vm245_vm0, %v10527_v38, 0.0 }
 0x44b   :  { %v1346_v59 = vpop.xlane.xlu0 %1345  ;;  %1408 = vadd.xlane.f32.xlu0 %v1407_v39  ;;  %v1352_v50 = vpop.xlane.xlu1 %1351 }
 0x44c   :  { %9496 = vpow2.f32 %v1387_v36  ;;  %v1370_v51 = vsub.f32 %v10466_v62, %v1346_v59  ;;  %v1372_v54 = vsub.f32 %v10472_v14, %v1352_v50 }
 0x44d   :  { %v10533_v56 = vpop.eup %9484  ;;  %9498 = vpow2.f32 %v1391_v45 }
 0x44e   :  { %v10535_v48 = vpop.eup %9486  ;;  %v1397_v49 = vmul.f32 1.442695, %v1370_v51  ;;  %v1401_v57 = vmul.f32 1.442695, %v1372_v54  ;;  %v1416_v63 = vsel %vm245_vm0, %v10533_v56, 0.0 }
 0x44f   :  { %v1343_v2 = vpop.xlane.xlu0 %1342  ;;  %1417 = vadd.xlane.f32.xlu0 %v1416_v63  ;;  %v1422_v3 = vsel %vm245_vm0, %v10535_v48, 0.0  ;;  %v1349_v9 = vpop.xlane.xlu1 %1348  ;;  %v597_v63 = vmul.f32 %v10418_v60, %v10263_v4 }
 0x450   :  { %9500 = vpow2.f32 %v1397_v49  ;;  %v1369_v62 = vsub.f32 %v10474_v18, %v1343_v2  ;;  %1423 = vadd.xlane.f32.xlu1 %v1422_v3  ;;  %v1371_v14 = vsub.f32 %v10476_v19, %v1349_v9  ;;  %v598_v2 = vmul.f32 %v10418_v60, %v10255_v0 }
 0x451   :  { %v10543_v10 = vpop.eup %9488  ;;  %9502 = vpow2.f32 %v1401_v57 }
 0x452   :  { %v10545_v11 = vpop.eup %9490  ;;  %v1395_v16 = vmul.f32 1.442695, %v1369_v62  ;;  %v1399_v20 = vmul.f32 1.442695, %v1371_v14  ;;  %v1413_v12 = vsel %vm245_vm0, %v10543_v10, 0.0 }
 0x453   :  { %v1355_v22 = vpop.xlane.xlu0 %1354  ;;  %1414 = vadd.xlane.f32.xlu0 %v1413_v12  ;;  %v1428_v23 = vsel %vm245_vm0, %v10545_v11, 0.0  ;;  %v1358_v15 = vpop.xlane.xlu1 %1357 }
 0x454   :  { %9504 = vpow2.f32 %v1395_v16  ;;  %v1373_v18 = vsub.f32 %v10484_v30, %v1355_v22  ;;  %1429 = vadd.xlane.f32.xlu1 %v1428_v23  ;;  %v1374_v19 = vsub.f32 %v10482_v29, %v1358_v15 }
 0x455   :  { %v10553_v24 = vpop.eup %9492  ;;  %9506 = vpow2.f32 %v1399_v20 }
 0x456   :  { %v10555_v25 = vpop.eup %9494  ;;  %v1403_v27 = vmul.f32 1.442695, %v1373_v18  ;;  %v1405_v21 = vmul.f32 1.442695, %v1374_v19  ;;  %v1419_v31 = vsel %vm245_vm0, %v10553_v24, 0.0 }
 0x457   :  { %1420 = vadd.xlane.f32.xlu0 %v1419_v31  ;;  %v1434_v32 = vsel %vm245_vm0, %v10555_v25, 0.0  ;;  %v10599_v3 = vpop.permute.xlu0 %1934  ;;  %v10601_v9 = vpop.permute.xlu1 %2029 }
 0x458   :  { %9508 = vpow2.f32 %v1403_v27  ;;  %1435 = vadd.xlane.f32.xlu1 %v1434_v32 }
 0x459   :  { %v10561_v30 = vpop.eup %9496  ;;  %9510 = vpow2.f32 %v1405_v21 }
 0x45a   :  { %v10563_v29 = vpop.eup %9498  ;;  %v1425_v28 = vsel %vm245_vm0, %v10561_v30, 0.0 }
 0x45b   :  { %1426 = vadd.xlane.f32.xlu0 %v1425_v28  ;;  %v1431_v33 = vsel %vm245_vm0, %v10563_v29, 0.0  ;;  %v10603_v16 = vpop.permute.xlu1 %2027 }
 0x45c   :  { %1432 = vadd.xlane.f32.xlu1 %v1431_v33 }
 0x45d   :  { %v10569_v34 = vpop.eup %9500 }
 0x45e   :  { %v10571_v35 = vpop.eup %9502  ;;  %v1440_v37 = vsel %vm245_vm0, %v10569_v34, 0.0 }
 0x45f   :  { %1441 = vadd.xlane.f32.xlu0 %v1440_v37  ;;  %v1446_v36 = vsel %vm245_vm0, %v10571_v35, 0.0 }
 0x460   :  { %1447 = vadd.xlane.f32.xlu1 %v1446_v36 }
 0x461   :  { %v10577_v45 = vpop.eup %9504 }
 0x462   :  { %v10579_v39 = vpop.eup %9506  ;;  %v1437_v59 = vsel %vm245_vm0, %v10577_v45, 0.0 }
 0x463   :  { %1438 = vadd.xlane.f32.xlu0 %v1437_v59  ;;  %v1443_v50 = vsel %vm245_vm0, %v10579_v39, 0.0 }
 0x464   :  { %1444 = vadd.xlane.f32.xlu1 %v1443_v50 }
 0x465   :  { %v10585_v51 = vpop.eup %9508 }
 0x466   :  { %v10587_v54 = vpop.eup %9510  ;;  %v1449_v49 = vsel %vm245_vm0, %v10585_v51, 0.0 }
 0x467   :  { %1450 = vadd.xlane.f32.xlu0 %v1449_v49  ;;  %v1452_v57 = vsel %vm245_vm0, %v10587_v54, 0.0 }
 0x468   :  { %1453 = vadd.xlane.f32.xlu1 %v1452_v57 }
 0x479   :  { %2116 = vrot.lane.b32.xlu1 %v597_v63, %s10026_s25 }
 0x47d   :  { %2118 = vrot.lane.b32.xlu0 %v598_v2, %s10026_s25 }
 0x4d0   :  { %v1412_v62 = vpop.xlane.xlu0 %1411 }
 0x4d1   :  { %9512 = vrcp.f32 %v1412_v62 }
 0x4d4   :  { %v1409_v14 = vpop.xlane.xlu0 %1408 }
 0x4d5   :  { %9514 = vrcp.f32 %v1409_v14 }
 0x4d8   :  { %v1418_v20 = vpop.xlane.xlu0 %1417 }
 0x4d9   :  { %v1424_v12 = vpop.xlane.xlu1 %1423 }
 0x4da   :  { %9516 = vrcp.f32 %v1424_v12 }
 0x4dc   :  { %v1415_v4 = vpop.xlane.xlu0 %1414 }
 0x4dd   :  { %v1430_v22 = vpop.xlane.xlu1 %1429 }
 0x4de   :  { %v9513_v15 = vpop.eup %9512 }
 0x4df   :  { %v1472_v21 = vmul.f32 %v9513_v15, %v10521_v26 }
 0x4e0   :  { %v1421_v23 = vpop.xlane.xlu0 %1420 }
 0x4e1   :  { %9518 = vrcp.f32 %v1421_v23  ;;  %v1436_v0 = vpop.xlane.xlu1 %1435 }
 0x4e2   :  { %v9515_v18 = vpop.eup %9514  ;;  %9520 = vrcp.f32 %v1430_v22 }
 0x4e3   :  { %v1471_v19 = vmul.f32 %v9515_v18, %v10527_v38  ;;  %9522 = vrcp.f32 %v1436_v0 }
 0x4e4   :  { %v1427_v27 = vpop.xlane.xlu0 %1426 }
 0x4e5   :  { %9524 = vrcp.f32 %v1427_v27  ;;  %v1433_v31 = vpop.xlane.xlu1 %1432  ;;  %8969 = vmatprep.mubr.msk.f32.mxu0 %vm245_vm0, %v1471_v19 }
 0x4e6   :  { %9526 = vrcp.f32 %v1433_v31  ;;  %8970 = vmatmul.mubr.msk.f32.vlgmr.msra.gmra.mxu0 %vm245_vm0, %v1472_v21 }
 0x4e7   :  { %9528 = vrcp.f32 %v1415_v4  ;;  %8980 = vmatpush3.msra.mxu0 %v10423_v5  ;;  %v9517_v28 = vpop.eup %9516 }
 0x4e8   :  { %8981 = vmatprep.subr.mxu0 %v10512_v61  ;;  %v1442_v32 = vpop.xlane.xlu0 %1441  ;;  %9530 = vrcp.f32 %v1418_v20  ;;  %v1476_v50 = vmul.f32 %v9517_v28, %v10535_v48 }
 0x4e9   :  { %8982 = vmatpush3.msra.mxu0 %v10512_v61  ;;  %v1448_v38 = vpop.xlane.xlu1 %1447  ;;  %9532 = vrcp.f32 %v1442_v32 }
 0x4ea   :  { %8993 = vmatprep.subr.mxu0 %v10601_v9  ;;  %9534 = vrcp.f32 %v1448_v38 }
 0x4ec   :  { %v1439_v26 = vpop.xlane.xlu0 %1438 }
 0x4ed   :  { %9536 = vrcp.f32 %v1439_v26  ;;  %v1445_v33 = vpop.xlane.xlu1 %1444 }
 0x4ee   :  { %v9519_v37 = vpop.eup %9518  ;;  %9538 = vrcp.f32 %v1445_v33 }
 0x4ef   :  { %v1475_v36 = vmul.f32 %v9519_v37, %v10553_v24  ;;  %v9521_v5 = vpop.eup %9520 }
 0x4f0   :  { %v1451_v59 = vpop.xlane.xlu0 %1450  ;;  %v9523_v49 = vpop.eup %9522  ;;  %v1478_v48 = vmul.f32 %v9521_v5, %v10545_v11  ;;  %v220_v11 = vld [vmem:[#allocation8 + $0x8] sm:$0xff] }
 0x4f1   :  { %9540 = vrcp.f32 %v1451_v59  ;;  %v1454_v61 = vpop.xlane.xlu1 %1453  ;;  %8955 = vmatprep.mubr.msk.f32.mxu1 %vm245_vm0, %v1475_v36  ;;  %v1480_v14 = vmul.f32 %v9523_v49, %v10555_v25 }
 0x4f2   :  { %v9525_v57 = vpop.eup %9524  ;;  %9542 = vrcp.f32 %v1454_v61  ;;  %8956 = vmatmul.mubr.msk.f32.vlgmr.msra.gmra.mxu1 %vm245_vm0, %v1476_v50 }
 0x4f3   :  { %v9527_v63 = vpop.eup %9526  ;;  %8959 = vmatpush3.msra.mxu1 %v10420_v1  ;;  %v1477_v2 = vmul.f32 %v9525_v57, %v10561_v30 }
 0x4f4   :  { %v9529_v62 = vpop.eup %9528  ;;  %8960 = vmatprep.subr.mxu1 %v10507_v43  ;;  %v1479_v24 = vmul.f32 %v9527_v63, %v10563_v29 }
 0x4f5   :  { %8961 = vmatpush3.msra.mxu1 %v10507_v43  ;;  %8962 = vmatprep.mubr.msk.f32.mxu1 %vm245_vm0, %v1477_v2  ;;  %v9531_v1 = vpop.eup %9530  ;;  %v1473_v30 = vmul.f32 %v9529_v62, %v10543_v10  ;;  %v2117_v4 = vpop.permute.xlu1 %2116 }
 0x4f6   :  { %8972 = vmatprep.subr.mxu1 %v10503_v40  ;;  %8983 = vmatprep.mubr.msk.f32.mxu0 %vm245_vm0, %v1479_v24  ;;  %v9533_v29 = vpop.eup %9532  ;;  %v1474_v20 = vmul.f32 %v9531_v1, %v10533_v56 }
 0x4f7   :  { %8963 = vmatmul.mubr.msk.f32.vlgmr.msra.gmra.mxu1 %vm245_vm0, %v1478_v48  ;;  %8984 = vmatmul.mubr.msk.f32.vlgmr.msra.gmra.mxu0 %vm245_vm0, %v1480_v14  ;;  %v9535_v43 = vpop.eup %9534  ;;  %v1482_v56 = vmul.f32 %v9533_v29, %v10569_v34  ;;  %v223_v34 = vld [vmem:[#allocation10 + $0x8] sm:$0xff] }
 0x4f8   :  { %8973 = vmatpush3.msra.mxu1 %v10503_v40  ;;  %8994 = vmatpush3.msra.mxu0 %v10601_v9 }
 0x4f9   :  { %8974 = vmatprep.subr.mxu1 %v10509_v46  ;;  %8976 = vmatprep.mubr.msk.f32.mxu1 %vm245_vm0, %v1473_v30  ;;  %v10693_v30 = vld [vmem:[%s12062_s4 + $0x1] ss:$0 sm:$0xff] }
 0x4fa   :  { %v9537_v25 = vpop.eup %9536  ;;  %8995 = vmatprep.subr.mxu0 %v10603_v16  ;;  %8975 = vmatpush3.msra.mxu1 %v10509_v46  ;;  %v1484_v46 = vmul.f32 %v9535_v43, %v10571_v35  ;;  %v10654_v35 = vadd.f32 %v10234_v52, %v10239_v53  ;;  %v222_v52 = vld [vmem:[#allocation10] sm:$0xff] }
 0x4fb   :  { %v9539_v12 = vpop.eup %9538  ;;  %8996 = vmatpush3.msra.mxu0 %v10603_v16  ;;  %8986 = vmatprep.subr.mxu1 %v10505_v42  ;;  %v1481_v40 = vmul.f32 %v9537_v25, %v10577_v45  ;;  %v2119_v45 = vpop.permute.xlu0 %2118 }
 0x4fc   :  { %8977 = vmatmul.mubr.msk.f32.vlgmr.msra.gmra.mxu1 %vm245_vm0, %v1474_v20  ;;  %v1483_v10 = vmul.f32 %v9539_v12, %v10579_v39  ;;  %9007 = vmatprep.subr.mxu0 %v220_v11  ;;  %v219_v39 = vld [vmem:[#allocation8] sm:$0xff]  ;;  %v10697_v29 = vmul.f32 %v10693_v30, %v10654_v35 }
 0x4fd   :  { %8987 = vmatpush3.msra.mxu1 %v10505_v42  ;;  %8990 = vmatprep.mubr.msk.f32.mxu1 %vm245_vm0, %v1481_v40 }
 0x4fe   :  { %v9541_v9 = vpop.eup %9540  ;;  %8988 = vmatprep.subr.mxu1 %v10599_v3  ;;  %8997 = vmatprep.mubr.msk.f32.mxu0 %vm245_vm0, %v1483_v10  ;;  %v9762_v10 = vld [vmem:[%s12110_s0 + $0x8] sm:$0xff] }
 0x4ff   :  { %v9543_v16 = vpop.eup %9542  ;;  %8989 = vmatpush3.msra.mxu1 %v10599_v3  ;;  %8998 = vmatmul.mubr.msk.f32.vlgmr.msra.gmra.mxu0 %vm245_vm0, %v1484_v46  ;;  %v1485_v42 = vmul.f32 %v9541_v9, %v10585_v51  ;;  %v10660_v3 = vld [vmem:[%s12062_s4] ss:$0 sm:$0xff] }
 0x500   :  { %9000 = vmatprep.subr.mxu1 %v2119_v45  ;;  %8991 = vmatmul.mubr.msk.f32.vlgmr.msra.gmra.mxu1 %vm245_vm0, %v1482_v56  ;;  %v1486_v22 = vmul.f32 %v9543_v16, %v10587_v54  ;;  %v10664_v51 = vmul.f32 %v10660_v3, %v10654_v35  ;;  %v10669_v54 = vadd.f32 %v10426_v6, %v10239_v53  ;;  %v9763_v16 = vld [vmem:[%s12110_s0] sm:$0xff] }
 0x501   :  { %9001 = vmatpush3.msra.mxu1 %v2119_v45  ;;  %9008 = vmatpush3.msra.mxu0 %v220_v11  ;;  %v10684_v2 = vmul.f32 %v10660_v3, %v10242_v55  ;;  %v8344_v11 = vld [vmem:[%s12066_s8] ss:$0 sm:$0xff] }
 0x502   :  { %9002 = vmatprep.subr.mxu1 %v2117_v4  ;;  %9009 = vmatprep.subr.mxu0 %v219_v39  ;;  %v10676_v23 = vmul.f32 %v10660_v3, %v10669_v54 }
 0x503   :  { %9003 = vmatpush3.msra.mxu1 %v2117_v4  ;;  %9010 = vmatpush3.msra.mxu0 %v219_v39  ;;  %v9764_v39 = vld [vmem:[%s12110_s0 + $0x18] sm:$0xff] }
 0x504   :  { %9004 = vmatprep.mubr.msk.f32.mxu1 %vm245_vm0, %v1485_v42  ;;  %9017 = vmatprep.subr.mxu1 %v223_v34 }
 0x505   :  { %9027 = vmatprep.subr.msk.mxu0 %vm245_vm0, %v10664_v51  ;;  %9005 = vmatmul.mubr.msk.f32.vlgmr.msra.gmra.mxu1 %vm245_vm0, %v1486_v22 }
 0x506   :  { %9018 = vmatpush3.msra.mxu1 %v223_v34  ;;  %v9765_v34 = vld [vmem:[%s12110_s0 + $0x10] sm:$0xff] }
 0x507   :  { %9019 = vmatprep.subr.mxu1 %v222_v52 }
 0x508   :  { %9020 = vmatpush3.msra.mxu1 %v222_v52 }
 0x509   :  { %9034 = vmatprep.subr.msk.mxu1 %vm245_vm0, %v10676_v23 }
 0x5a6   :  { %v8971_v0 = vpop.f32.mrf.mxu0 }
 0x5a8   :  { %v1745_v53 = vpop.f32.mrf.mxu0 }
 0x5b2   :  { %v8957_v15 = vpop.f32.mrf.mxu1 }
 0x5b3   :  { %v1751_v26 = vadd.f32 %v8971_v0, %v8957_v15 }
 0x5b4   :  { %v1567_v18 = vpop.f32.mrf.mxu1 }
 0x5b5   :  { %v1746_v32 = vadd.f32 %v1745_v53, %v1567_v18 }
 0x5b7   :  { %v8964_v6 = vpop.f32.mrf.mxu1  ;;  %v8985_v19 = vpop.f32.mrf.mxu0 }
 0x5b8   :  { %v2022_v36 = vadd.f32 %v8985_v19, %v1751_v26  ;;  %v393_v19 = vmul.f32 %v10276_v8, %v10242_v55 }
 0x5b9   :  { %v1656_v27 = vpop.f32.mrf.mxu1  ;;  %v1923_v31 = vpop.f32.mrf.mxu0 }
 0x5ba   :  { %v2021_v33 = vadd.f32 %v1923_v31, %v1746_v32  ;;  %v386_v31 = vmul.f32 %v10247_v58, %v10242_v55  ;;  %v401_v32 = vmul.f32 %v10292_v13, %v10654_v35 }
 0x5bc   :  { %v8978_v21 = vpop.f32.mrf.mxu1 }
 0x5bd   :  { %v1840_v57 = vadd.f32 %v8978_v21, %v8964_v6  ;;  %v387_v21 = vmul.f32 %v10247_v58, %v10654_v35 }
 0x5be   :  { %v1834_v38 = vpop.f32.mrf.mxu1 }
 0x5bf   :  { %v8999_v28 = vpop.f32.mrf.mxu0  ;;  %v1835_v61 = vadd.f32 %v1834_v38, %v1656_v27  ;;  %v396_v27 = vmul.f32 %v10276_v8, %v10669_v54 }
 0x5c0   :  { %v8992_v37 = vpop.f32.mrf.mxu1  ;;  %v2204_v49 = vadd.f32 %v8999_v28, %v2022_v36 }
 0x5c1   :  { %v2105_v5 = vpop.f32.mrf.mxu0  ;;  %v2024_v24 = vadd.f32 %v8992_v37, %v1840_v57 }
 0x5c2   :  { %v2012_v59 = vpop.f32.mrf.mxu1  ;;  %v2203_v50 = vadd.f32 %v2105_v5, %v2021_v33 }
 0x5c3   :  { %v2023_v62 = vadd.f32 %v2012_v59, %v1835_v61 }
 0x5c4   :  { %9011 = vmatprep.mubr.msk.f32.mxu0 %vm245_vm0, %v2203_v50 }
 0x5c5   :  { %v9006_v63 = vpop.f32.mrf.mxu1  ;;  %9012 = vmatmul.mubr.msk.f32.vlgmr.msra.gmra.mxu0 %vm245_vm0, %v2204_v49 }
 0x5c6   :  { %9028 = vmatpush3.xpose.msk.msra.mxu0 %vm245_vm0, %v10664_v51  ;;  %v2206_v1 = vadd.f32 %v9006_v63, %v2024_v24 }
 0x5c7   :  { %v2194_v48 = vpop.f32.mrf.mxu1  ;;  %9029 = vmatprep.subr.msk.mxu0 %vm245_vm0, %v10684_v2 }
 0x5c8   :  { %v2205_v14 = vadd.f32 %v2194_v48, %v2023_v62 }
 0x5ca   :  { %9014 = vmatprep.mubr.msk.f32.mxu0 %vm245_vm0, %v2205_v14  ;;  %9030 = vmatpush3.xpose.msk.msra.mxu0 %vm245_vm0, %v10684_v2 }
 0x5cb   :  { %9015 = vmatmul.mubr.msk.f32.gmra.mxu0 %vm245_vm0, %v2206_v1  ;;  %9041 = vmatprep.subr.msk.mxu0 %vm245_vm0, %v10697_v29 }
 0x685   :  { %v9013_v43 = vpop.f32.mrf.mxu0 }
 0x686   :  { %v2297_v20 = vadd.f32 %v9013_v43, %v8344_v11  ;;  %v394_v43 = vmul.f32 %v10276_v8, %v10654_v35 }
 0x687   :  { %v2291_v25 = vpop.f32.mrf.mxu0 }
 0x688   :  { %v2292_v12 = vadd.f32 %v8344_v11, %v2291_v25  ;;  %v10711_v46 = vadd.f32 %v9762_v10, %v2297_v20 }
 0x68a   :  { %v10716_v45 = vadd.f32 %v9763_v16, %v2292_v12  ;;  %v2319_v52 = vsel %vm245_vm0, %v10711_v46, 0.0  ;;  %v389_v12 = vmul.f32 %v10247_v58, %v10669_v54 }
 0x68b   :  { %v9016_v40 = vpop.f32.mrf.mxu0 }
 0x68c   :  { %v2307_v9 = vadd.f32 %v9016_v40, %v8344_v11  ;;  %v2314_v18 = vsel %vm245_vm0, %v10716_v45, 0.0 }
 0x68d   :  { %v2301_v56 = vpop.f32.mrf.mxu0 }
 0x68e   :  { %v10721_v42 = vadd.f32 %v9764_v39, %v2307_v9  ;;  %v2302_v4 = vadd.f32 %v8344_v11, %v2301_v56  ;;  %v9766_v11 = vld [vmem:[%s12070_s12] ss:$0 sm:$0xff] }
 0x68f   :  { %v10765_v25 = vadd.f32 %v9766_v11, %v10428_v7 }
 0x690   :  { %v10726_v22 = vadd.f32 %v9765_v34, %v2302_v4  ;;  %v2320_v15 = vsel %vm245_vm0, %v10721_v42, 0.0 }
 0x691   :  { %v2321_v0 = vadd.f32 %v2320_v15, %v2319_v52  ;;  %v395_v20 = vmul.f32 %v10276_v8, %v10765_v25 }
 0x692   :  { %v2315_v53 = vsel %vm245_vm0, %v10726_v22, 0.0 }
 0x693   :  { %2322 = vadd.xlane.f32.xlu1 %v2321_v0  ;;  %v2316_v6 = vadd.f32 %v2315_v53, %v2314_v18  ;;  %v10778_v0 = vmul.f32 %v10660_v3, %v10765_v25  ;;  %v10788_v53 = vmul.f32 %v10693_v30, %v10669_v54  ;;  %v8349_v3 = vld [vmem:[%s12068_s10] ss:$0 sm:$0xff] }
 0x695   :  { %2317 = vadd.xlane.f32.xlu0 %v2316_v6 }
 0x6a4   :  { %3315 = vrot.lane.b32.xlu1 %v393_v19, %s10024_s21 }
 0x6a8   :  { %3406 = vrot.lane.b32.xlu1 %v396_v27, %s10024_s21 }
 0x6ac   :  { %3495 = vrot.lane.b32.xlu1 %v387_v21, %s10024_s21 }
 0x6b0   :  { %3493 = vrot.lane.b32.xlu1 %v386_v31, %s10024_s21 }
 0x6b4   :  { %3673 = vrot.lane.b32.xlu1 %v401_v32, %s10024_s21 }
 0x71c   :  { %v2323_v38 = vpop.xlane.xlu1 %2322 }
 0x71d   :  { %v2325_v26 = vmul.f32 0.03125, %v2323_v38 }
 0x71e   :  { %v2318_v28 = vpop.xlane.xlu0 %2317 }
 0x71f   :  { %v2327_v33 = vsub.f32 %v10711_v46, %v2325_v26  ;;  %v2329_v37 = vsub.f32 %v10721_v42, %v2325_v26  ;;  %v2324_v36 = vmul.f32 0.03125, %v2318_v28 }
 0x721   :  { %v2326_v5 = vsub.f32 %v10716_v45, %v2324_v36  ;;  %v2328_v59 = vsub.f32 %v10726_v22, %v2324_v36  ;;  %v2331_v61 = vmul.f32 %v2327_v33, %v2327_v33  ;;  %v2333_v57 = vmul.f32 %v2329_v37, %v2329_v37 }
 0x723   :  { %v2330_v50 = vmul.f32 %v2326_v5, %v2326_v5  ;;  %v2332_v49 = vmul.f32 %v2328_v59, %v2328_v59  ;;  %v2339_v48 = vsel %vm245_vm0, %v2331_v61, 0.0  ;;  %v2340_v14 = vsel %vm245_vm0, %v2333_v57, 0.0 }
 0x724   :  { %v2341_v1 = vadd.f32 %v2340_v14, %v2339_v48 }
 0x725   :  { %v2334_v63 = vsel %vm245_vm0, %v2330_v50, 0.0  ;;  %v2335_v62 = vsel %vm245_vm0, %v2332_v49, 0.0  ;;  %v9767_v50 = vld [vmem:[%s12062_s4 + $0x2] ss:$0 sm:$0xff] }
 0x726   :  { %v2336_v24 = vadd.f32 %v2335_v62, %v2334_v63  ;;  %v10822_v49 = vmul.f32 %v9767_v50, %v10654_v35  ;;  %v10838_v61 = vmul.f32 %v9767_v50, %v10669_v54  ;;  %v10847_v57 = vmul.f32 %v9767_v50, %v10765_v25  ;;  %v9768_v63 = vld [vmem:[%s12062_s4 + $0x3] ss:$0 sm:$0xff] }
 0x727   :  { %v10857_v62 = vmul.f32 %v9768_v63, %v10654_v35  ;;  %v10868_v48 = vmul.f32 %v9768_v63, %v10242_v55  ;;  %v10875_v14 = vmul.f32 %v9768_v63, %v10669_v54 }
 0x728   :  { %2337 = vadd.xlane.f32.xlu0 %v2336_v24  ;;  %v10862_v24 = vpop.permute.xlu1 %3315 }
 0x729   :  { %12111 = vst [vmem:[#allocation23_spill] sm:$0xff] %v10862_v24  ;;  %12112 = vst [vmem:[#allocation24_spill] sm:$0xff] %v10868_v48 }
 0x72a   :  { %12113 = vst [vmem:[#allocation25_spill] sm:$0xff] %v10875_v14 }
 0x72c   :  { %2342 = vadd.xlane.f32.xlu0 %v2341_v1  ;;  %v10888_v11 = vpop.permute.xlu1 %3406 }
 0x72d   :  { %12116 = vst [vmem:[#allocation28_spill] sm:$0xff] %v10888_v11 }
 0x742   :  { %3317 = vrot.lane.b32.xlu0 %v394_v43, %s10024_s21  ;;  %v10886_v43 = vmul.f32 %v9768_v63, %v10765_v25  ;;  %v388_v63 = vmul.f32 %v10247_v58, %v10765_v25 }
 0x744   :  { %12115 = vst [vmem:[#allocation27_spill] sm:$0xff] %v10886_v43 }
 0x746   :  { %3404 = vrot.lane.b32.xlu0 %v395_v20, %s10024_s21 }
 0x74a   :  { %3584 = vrot.lane.b32.xlu0 %v389_v12, %s10024_s21  ;;  %v10906_v12 = vpop.permute.xlu1 %3495 }
 0x7b1   :  { %v2338_v40 = vpop.xlane.xlu0 %2337 }
 0x7b2   :  { %v2344_v10 = vmul.f32 0.03125, %v2338_v40 }
 0x7b4   :  { %v2346_v9 = vadd.f32 1e-05, %v2344_v10  ;;  %v197_v10 = vld [vmem:[#allocation7 + $0x8] sm:$0xff] }
 0x7b5   :  { %v2343_v56 = vpop.xlane.xlu0 %2342 }
 0x7b6   :  { %9544 = vrsqrt.f32 %v2346_v9  ;;  %v2345_v16 = vmul.f32 0.03125, %v2343_v56  ;;  %v196_v56 = vld [vmem:[#allocation7] sm:$0xff] }
 0x7b8   :  { %v2347_v7 = vadd.f32 1e-05, %v2345_v16 }
 0x7b9   :  { %v10880_v1 = vpop.permute.xlu0 %3317 }
 0x7ba   :  { %9546 = vrsqrt.f32 %v2347_v7  ;;  %12114 = vst [vmem:[#allocation26_spill] sm:$0xff] %v10880_v1 }
 0x7bd   :  { %v10899_v20 = vpop.permute.xlu0 %3404 }
 0x7be   :  { %12117 = vst [vmem:[#allocation29_spill] sm:$0xff] %v10899_v20 }
 0x7c1   :  { %v10913_v40 = vpop.permute.xlu0 %3584 }
 0x7c3   :  { %v9545_v39 = vpop.eup %9544 }
 0x7c4   :  { %v2350_v4 = vmul.f32 %v9545_v39, %v2326_v5  ;;  %v2352_v15 = vmul.f32 %v9545_v39, %v2328_v59  ;;  %v10812_v59 = vmul.f32 %v10693_v30, %v10765_v25 }
 0x7c6   :  { %9021 = vmatprep.mubr.msk.f32.mxu1 %vm245_vm0, %v2350_v4 }
 0x7c7   :  { %v9547_v34 = vpop.eup %9546 }
 0x7c8   :  { %v2351_v52 = vmul.f32 %v9547_v34, %v2327_v33  ;;  %v2353_v18 = vmul.f32 %v9547_v34, %v2329_v37  ;;  %v10801_v37 = vmul.f32 %v10693_v30, %v10242_v55  ;;  %v10831_v30 = vmul.f32 %v9767_v50, %v10242_v55  ;;  %v199_v34 = vld [vmem:[#allocation7 + $0x18] sm:$0xff] }
 0x7c9   :  { %v400_v50 = vmul.f32 %v10292_v13, %v10242_v55 }
 0x7ca   :  { %9022 = vmatmul.mubr.msk.f32.vlgmr.msra.gmra.mxu1 %vm245_vm0, %v2351_v52 }
 0x7cb   :  { %9035 = vmatpush3.xpose.msk.msra.mxu1 %vm245_vm0, %v10676_v23  ;;  %9024 = vmatprep.mubr.msk.f32.mxu1 %vm245_vm0, %v2352_v15  ;;  %v201_v15 = vld [vmem:[#allocation7 + $0x28] sm:$0xff] }
 0x7cc   :  { %9036 = vmatprep.subr.msk.mxu1 %vm245_vm0, %v10778_v0 }
 0x7ce   :  { %9025 = vmatmul.mubr.msk.f32.gmra.mxu1 %vm245_vm0, %v2353_v18 }
 0x7cf   :  { %9037 = vmatpush3.xpose.msk.msra.mxu1 %vm245_vm0, %v10778_v0 }
 0x7d0   :  { %9048 = vmatprep.subr.msk.mxu1 %vm245_vm0, %v10788_v53 }
 0x88a   :  { %v9023_v6 = vpop.f32.mrf.mxu1 }
 0x88b   :  { %v2444_v19 = vadd.f32 %v9023_v6, %v8349_v3  ;;  %v198_v6 = vld [vmem:[#allocation7 + $0x10] sm:$0xff] }
 0x88c   :  { %v2438_v27 = vpop.f32.mrf.mxu1 }
 0x88d   :  { %v2439_v21 = vadd.f32 %v8349_v3, %v2438_v27  ;;  %v2458_v38 = vmul.f32 0.5, %v2444_v19 }
 0x88e   :  { %v9026_v31 = vpop.f32.mrf.mxu1 }
 0x88f   :  { %v2457_v32 = vmul.f32 0.5, %v2439_v21  ;;  %v2454_v26 = vadd.f32 %v9026_v31, %v8349_v3 }
 0x890   :  { %v2448_v28 = vpop.f32.mrf.mxu1 }
 0x891   :  { %v2449_v33 = vadd.f32 %v8349_v3, %v2448_v28  ;;  %9031 = vmatprep.mubr.msk.f32.mxu0 %vm245_vm0, %v2457_v32  ;;  %v2460_v5 = vmul.f32 0.5, %v2454_v26  ;;  %v200_v26 = vld [vmem:[#allocation7 + $0x20] sm:$0xff] }
 0x892   :  { %9032 = vmatmul.mubr.msk.f32.vlgmr.msra.gmra.mxu0 %vm245_vm0, %v2458_v38 }
 0x893   :  { %v2459_v36 = vmul.f32 0.5, %v2449_v33  ;;  %9042 = vmatpush3.xpose.msk.msra.mxu0 %vm245_vm0, %v10697_v29  ;;  %9045 = vmatprep.mubr.msk.f32.mxu0 %vm245_vm0, %v2457_v32 }
 0x894   :  { %9043 = vmatprep.subr.msk.mxu0 %vm245_vm0, %v10801_v37 }
 0x895   :  { %9038 = vmatprep.mubr.msk.f32.mxu1 %vm245_vm0, %v2459_v36 }
 0x896   :  { %9039 = vmatmul.mubr.msk.f32.vlgmr.msra.gmra.mxu1 %vm245_vm0, %v2460_v5 }
 0x897   :  { %9044 = vmatpush3.xpose.msk.msra.mxu0 %vm245_vm0, %v10801_v37  ;;  %9049 = vmatpush3.xpose.msk.msra.mxu1 %vm245_vm0, %v10788_v53 }
 0x898   :  { %9050 = vmatprep.subr.msk.mxu1 %vm245_vm0, %v10812_v59  ;;  %9052 = vmatprep.mubr.msk.f32.mxu1 %vm245_vm0, %v2459_v36 }
 0x899   :  { %9055 = vmatprep.subr.msk.mxu0 %vm245_vm0, %v10822_v49 }
 0x89a   :  { %9046 = vmatmul.mubr.msk.f32.vlgmr.msra.gmra.mxu0 %vm245_vm0, %v2458_v38 }
 0x89b   :  { %9051 = vmatpush3.xpose.msk.msra.mxu1 %vm245_vm0, %v10812_v59  ;;  %9056 = vmatpush3.xpose.msk.msra.mxu0 %vm245_vm0, %v10822_v49 }
 0x89c   :  { %9059 = vmatprep.mubr.msk.f32.mxu0 %vm245_vm0, %v2457_v32  ;;  %9057 = vmatprep.subr.msk.mxu0 %vm245_vm0, %v10831_v30 }
 0x89d   :  { %9062 = vmatprep.subr.msk.mxu1 %vm245_vm0, %v10838_v61 }
 0x89e   :  { %9053 = vmatmul.mubr.msk.f32.vlgmr.msra.gmra.mxu1 %vm245_vm0, %v2460_v5 }
 0x89f   :  { %9058 = vmatpush3.xpose.msk.msra.mxu0 %vm245_vm0, %v10831_v30  ;;  %9063 = vmatpush3.xpose.msk.msra.mxu1 %vm245_vm0, %v10838_v61 }
 0x8a0   :  { %9066 = vmatprep.mubr.msk.f32.mxu1 %vm245_vm0, %v2459_v36  ;;  %9064 = vmatprep.subr.msk.mxu1 %vm245_vm0, %v10847_v57 }
 0x8a1   :  { %9069 = vmatprep.subr.msk.mxu0 %vm245_vm0, %v10857_v62 }
 0x8a2   :  { %9060 = vmatmul.mubr.msk.f32.vlgmr.msra.gmra.mxu0 %vm245_vm0, %v2458_v38 }
 0x8a3   :  { %9065 = vmatpush3.xpose.msk.msra.mxu1 %vm245_vm0, %v10847_v57  ;;  %9070 = vmatpush3.xpose.msk.msra.mxu0 %vm245_vm0, %v10857_v62 }
 0x8a4   :  { %9073 = vmatprep.mubr.msk.f32.mxu0 %vm245_vm0, %v2457_v32  ;;  %9071 = vmatprep.subr.msk.mxu0 %vm245_vm0, %v10868_v48 }
 0x8a5   :  { %9076 = vmatprep.subr.msk.mxu1 %vm245_vm0, %v10875_v14 }
 0x8a6   :  { %9067 = vmatmul.mubr.msk.f32.vlgmr.msra.gmra.mxu1 %vm245_vm0, %v2460_v5 }
 0x8a7   :  { %9072 = vmatpush3.xpose.msk.msra.mxu0 %vm245_vm0, %v10868_v48  ;;  %9077 = vmatpush3.xpose.msk.msra.mxu1 %vm245_vm0, %v10875_v14 }
 0x8a8   :  { %9080 = vmatprep.mubr.msk.f32.mxu1 %vm245_vm0, %v2459_v36  ;;  %9078 = vmatprep.subr.msk.mxu1 %vm245_vm0, %v10886_v43 }
 0x8a9   :  { %9083 = vmatprep.subr.mxu0 %v10880_v1 }
 0x8aa   :  { %9074 = vmatmul.mubr.msk.f32.vlgmr.msra.gmra.mxu0 %vm245_vm0, %v2458_v38 }
 0x8ab   :  { %9079 = vmatpush3.xpose.msk.msra.mxu1 %vm245_vm0, %v10886_v43  ;;  %9084 = vmatpush3.msra.mxu0 %v10880_v1 }
 0x8ac   :  { %9085 = vmatprep.subr.mxu0 %v10862_v24  ;;  %9090 = vmatprep.subr.mxu1 %v10888_v11 }
 0x8ad   :  { %9086 = vmatpush3.msra.mxu0 %v10862_v24 }
 0x8ae   :  { %9081 = vmatmul.mubr.msk.f32.vlgmr.msra.gmra.mxu1 %vm245_vm0, %v2460_v5  ;;  %9097 = vmatprep.subr.mxu0 %v10906_v12 }
 0x8af   :  { %9091 = vmatpush3.msra.mxu1 %v10888_v11 }
 0x8b0   :  { %9092 = vmatprep.subr.mxu1 %v10899_v20 }
 0x8b1   :  { %9093 = vmatpush3.msra.mxu1 %v10899_v20 }
 0x8b2   :  { %9104 = vmatprep.subr.mxu1 %v10913_v40 }
 0x952   :  { %v9033_v9 = vpop.f32.mrf.mxu0 }
 0x953   :  { %v10917_v16 = vadd.f32 %v9033_v9, %v197_v10  ;;  %v203_v10 = vld [vmem:[#allocation7 + $0x38] sm:$0xff] }
 0x954   :  { %v2539_v7 = vpop.f32.mrf.mxu0 }
 0x955   :  { %v10919_v39 = vadd.f32 %v2539_v7, %v196_v56  ;;  %v3140_v4 = vsel %vm245_vm0, %v10917_v16, -inf  ;;  %v202_v7 = vld [vmem:[#allocation7 + $0x30] sm:$0xff] }
 0x956   :  { %v9040_v52 = vpop.f32.mrf.mxu1  ;;  %3141 = vmax.xlane.f32.xlu0 %v3140_v4 }
 0x957   :  { %v10923_v18 = vadd.f32 %v9040_v52, %v199_v34  ;;  %v3137_v3 = vsel %vm245_vm0, %v10919_v39, -inf }
 0x958   :  { %v2626_v19 = vpop.f32.mrf.mxu1 }
 0x959   :  { %v10929_v31 = vadd.f32 %v2626_v19, %v198_v6  ;;  %v3146_v38 = vsel %vm245_vm0, %v10923_v18, -inf  ;;  %v207_v19 = vld [vmem:[#allocation7 + $0x58] sm:$0xff] }
 0x95a   :  { %v9047_v27 = vpop.f32.mrf.mxu0  ;;  %3138 = vmax.xlane.f32.xlu0 %v3137_v3  ;;  %v205_v3 = vld [vmem:[#allocation7 + $0x48] sm:$0xff] }
 0x95b   :  { %v10927_v21 = vadd.f32 %v9047_v27, %v201_v15  ;;  %v3143_v36 = vsel %vm245_vm0, %v10929_v31, -inf }
 0x95c   :  { %v2707_v28 = vpop.f32.mrf.mxu0 }
 0x95d   :  { %v3152_v32 = vsel %vm245_vm0, %v10927_v21, -inf  ;;  %v10935_v33 = vadd.f32 %v2707_v28, %v200_v26  ;;  %v204_v28 = vld [vmem:[#allocation7 + $0x40] sm:$0xff] }
 0x95e   :  { %3153 = vmax.xlane.f32.xlu1 %v3152_v32  ;;  %3147 = vmax.xlane.f32.xlu0 %v3146_v38  ;;  %v9054_v9 = vpop.f32.mrf.mxu1 }
 0x95f   :  { %v3149_v5 = vsel %vm245_vm0, %v10935_v33, -inf  ;;  %v10947_v56 = vadd.f32 %v9054_v9, %v203_v10 }
 0x960   :  { %v2788_v4 = vpop.f32.mrf.mxu1 }
 0x961   :  { %v10949_v52 = vadd.f32 %v2788_v4, %v202_v7  ;;  %v3158_v15 = vsel %vm245_vm0, %v10947_v56, -inf  ;;  %v209_v4 = vld [vmem:[#allocation7 + $0x68] sm:$0xff] }
 0x962   :  { %3144 = vmax.xlane.f32.xlu0 %v3143_v36  ;;  %v9061_v6 = vpop.f32.mrf.mxu0 }
 0x963   :  { %v10953_v32 = vadd.f32 %v9061_v6, %v205_v3  ;;  %v3155_v26 = vsel %vm245_vm0, %v10949_v52, -inf }
 0x964   :  { %v2869_v36 = vpop.f32.mrf.mxu0 }
 0x965   :  { %v3164_v9 = vsel %vm245_vm0, %v10953_v32, -inf }
 0x966   :  { %3150 = vmax.xlane.f32.xlu0 %v3149_v5  ;;  %v9068_v34 = vpop.f32.mrf.mxu1  ;;  %v206_v5 = vld [vmem:[#allocation7 + $0x50] sm:$0xff] }
 0x967   :  { %v10955_v38 = vadd.f32 %v9068_v34, %v207_v19 }
 0x968   :  { %v2950_v27 = vpop.f32.mrf.mxu1 }
 0x969   :  { %v10961_v10 = vadd.f32 %v2950_v27, %v206_v5  ;;  %v3170_v7 = vsel %vm245_vm0, %v10955_v38, -inf }
 0x96a   :  { %v9075_v34 = vpop.f32.mrf.mxu0 }
 0x96b   :  { %v10967_v6 = vadd.f32 %v9075_v34, %v209_v4  ;;  %v211_v4 = vld [vmem:[#allocation7 + $0x78] sm:$0xff] }
 0x96f   :  { %3671 = vrot.lane.b32.xlu1 %v400_v50, %s10024_s21  ;;  %v9082_v50 = vpop.f32.mrf.mxu1 }
 0x970   :  { %v10981_v34 = vadd.f32 %v9082_v50, %v211_v4  ;;  %v402_v50 = vmul.f32 %v10292_v13, %v10765_v25 }
 0x971   :  { %v3112_v3 = vpop.f32.mrf.mxu1 }
 0x97c   :  { %3582 = vrot.lane.b32.xlu0 %v388_v63, %s10024_s21  ;;  %v10959_v63 = vadd.f32 %v2869_v36, %v204_v28  ;;  %v208_v28 = vld [vmem:[#allocation7 + $0x60] sm:$0xff]  ;;  %v3031_v36 = vpop.f32.mrf.mxu0 }
 0x97d   :  { %v10975_v5 = vadd.f32 %v3031_v36, %v208_v28  ;;  %v407_v28 = vmul.f32 %v10303_v17, %v10242_v55  ;;  %v10999_v36 = vpop.permute.xlu1 %3493 }
 0x97e   :  { %v3161_v27 = vsel %vm245_vm0, %v10959_v63, -inf }
 0x993   :  { %3159 = vmax.xlane.f32.xlu1 %v3158_v15  ;;  %v210_v15 = vld [vmem:[#allocation7 + $0x70] sm:$0xff] }
 0x994   :  { %v10969_v19 = vadd.f32 %v3112_v3, %v210_v15  ;;  %v3173_v15 = vsel %vm245_vm0, %v10975_v5, -inf  ;;  %v3182_v3 = vsel %vm245_vm0, %v10981_v34, -inf }
 0x997   :  { %3156 = vmax.xlane.f32.xlu1 %v3155_v26  ;;  %v3167_v26 = vsel %vm245_vm0, %v10961_v10, -inf }
 0x99b   :  { %3165 = vmax.xlane.f32.xlu1 %v3164_v9  ;;  %3171 = vmax.xlane.f32.xlu0 %v3170_v7  ;;  %v3176_v9 = vsel %vm245_vm0, %v10967_v6, -inf  ;;  %v3179_v7 = vsel %vm245_vm0, %v10969_v19, -inf }
 0x99f   :  { %3162 = vmax.xlane.f32.xlu1 %v3161_v27  ;;  %3168 = vmax.xlane.f32.xlu0 %v3167_v26  ;;  %v403_v27 = vmul.f32 %v10292_v13, %v10669_v54  ;;  %v408_v26 = vmul.f32 %v10303_v17, %v10654_v35 }
 0x9a3   :  { %3177 = vmax.xlane.f32.xlu1 %v3176_v9  ;;  %3180 = vmax.xlane.f32.xlu0 %v3179_v7 }
 0x9a7   :  { %3174 = vmax.xlane.f32.xlu1 %v3173_v15  ;;  %v11002_v15 = vpop.permute.xlu1 %3673 }
 0x9ab   :  { %3183 = vmax.xlane.f32.xlu1 %v3182_v3 }
 0x9b9   :  { %3762 = vrot.lane.b32.xlu0 %v403_v27, %s10024_s21 }
 0x9bc   :  { %3855 = vrot.lane.b32.xlu1 %v408_v26, %s10024_s21 }
 0x9bd   :  { %3760 = vrot.lane.b32.xlu0 %v402_v50, %s10024_s21 }
 0x9c0   :  { %3853 = vrot.lane.b32.xlu1 %v407_v28, %s10024_s21 }
 0x9df   :  { %v3142_v9 = vpop.xlane.xlu0 %3141 }
 0x9e0   :  { %v3186_v7 = vsub.f32 %v10917_v16, %v3142_v9 }
 0x9e2   :  { %v3203_v4 = vmul.f32 1.442695, %v3186_v7 }
 0x9e3   :  { %v3139_v35 = vpop.xlane.xlu0 %3138 }
 0x9e4   :  { %9548 = vpow2.f32 %v3203_v4  ;;  %v3185_v3 = vsub.f32 %v10919_v39, %v3139_v35 }
 0x9e6   :  { %v3201_v27 = vmul.f32 1.442695, %v3185_v3 }
 0x9e7   :  { %v3154_v26 = vpop.xlane.xlu1 %3153  ;;  %v3148_v50 = vpop.xlane.xlu0 %3147 }
 0x9e8   :  { %9550 = vpow2.f32 %v3201_v27  ;;  %v3190_v55 = vsub.f32 %v10927_v21, %v3154_v26  ;;  %v3188_v28 = vsub.f32 %v10923_v18, %v3148_v50 }
 0x9ea   :  { %v3211_v20 = vmul.f32 1.442695, %v3190_v55  ;;  %v3207_v11 = vmul.f32 1.442695, %v3188_v28 }
 0x9eb   :  { %v3145_v24 = vpop.xlane.xlu0 %3144  ;;  %v11033_v55 = vpop.permute.xlu1 %3671 }
 0x9ec   :  { %9552 = vpow2.f32 %v3211_v20  ;;  %v3187_v16 = vsub.f32 %v10929_v31, %v3145_v24 }
 0x9ed   :  { %9554 = vpow2.f32 %v3207_v11 }
 0x9ee   :  { %v3205_v9 = vmul.f32 1.442695, %v3187_v16 }
 0x9ef   :  { %v3151_v7 = vpop.xlane.xlu0 %3150 }
 0x9f0   :  { %9556 = vpow2.f32 %v3205_v9  ;;  %v3189_v39 = vsub.f32 %v10935_v33, %v3151_v7 }
 0x9f1   :  { %v11009_v4 = vpop.eup %9548 }
 0x9f2   :  { %v3209_v35 = vmul.f32 1.442695, %v3189_v39  ;;  %v3236_v21 = vsel %vm245_vm0, %v11009_v4, 0.0 }
 0x9f3   :  { %3237 = vadd.xlane.f32.xlu0 %v3236_v21  ;;  %v11036_v7 = vpop.permute.xlu0 %3582 }
 0x9f4   :  { %9558 = vpow2.f32 %v3209_v35 }
 0x9f5   :  { %v11013_v18 = vpop.eup %9550 }
 0x9f6   :  { %v3233_v20 = vsel %vm245_vm0, %v11013_v18, 0.0 }
 0x9f7   :  { %3234 = vadd.xlane.f32.xlu0 %v3233_v20 }
 0x9f9   :  { %v11017_v24 = vpop.eup %9552 }
 0x9fa   :  { %v11019_v11 = vpop.eup %9554  ;;  %v3248_v31 = vsel %vm245_vm0, %v11017_v24, 0.0 }
 0x9fb   :  { %3249 = vadd.xlane.f32.xlu1 %v3248_v31  ;;  %v3242_v33 = vsel %vm245_vm0, %v11019_v11, 0.0 }
 0x9fc   :  { %3243 = vadd.xlane.f32.xlu0 %v3242_v33 }
 0x9fd   :  { %v11025_v3 = vpop.eup %9556 }
 0x9fe   :  { %v3239_v27 = vsel %vm245_vm0, %v11025_v3, 0.0 }
 0xa00   :  { %3240 = vadd.xlane.f32.xlu0 %v3239_v27 }
 0xa01   :  { %v11029_v26 = vpop.eup %9558 }
 0xa02   :  { %v3245_v50 = vsel %vm245_vm0, %v11029_v26, 0.0 }
 0xa04   :  { %3246 = vadd.xlane.f32.xlu0 %v3245_v50 }
 0xa1c   :  { %v3160_v28 = vpop.xlane.xlu1 %3159 }
 0xa1d   :  { %v3192_v16 = vsub.f32 %v10947_v56, %v3160_v28 }
 0xa1f   :  { %v3215_v9 = vmul.f32 1.442695, %v3192_v16 }
 0xa20   :  { %v3157_v39 = vpop.xlane.xlu1 %3156 }
 0xa21   :  { %9560 = vpow2.f32 %v3215_v9  ;;  %v3191_v35 = vsub.f32 %v10949_v52, %v3157_v39 }
 0xa23   :  { %v3213_v21 = vmul.f32 1.442695, %v3191_v35 }
 0xa24   :  { %v3166_v20 = vpop.xlane.xlu1 %3165  ;;  %v3172_v31 = vpop.xlane.xlu0 %3171 }
 0xa25   :  { %9562 = vpow2.f32 %v3213_v21  ;;  %v3194_v33 = vsub.f32 %v10953_v32, %v3166_v20  ;;  %v3196_v27 = vsub.f32 %v10955_v38, %v3172_v31 }
 0xa27   :  { %v3219_v50 = vmul.f32 1.442695, %v3194_v33  ;;  %v3223_v1 = vmul.f32 1.442695, %v3196_v27 }
 0xa28   :  { %v3163_v43 = vpop.xlane.xlu1 %3162  ;;  %v3169_v14 = vpop.xlane.xlu0 %3168 }
 0xa29   :  { %9564 = vpow2.f32 %v3219_v50  ;;  %v3193_v56 = vsub.f32 %v10959_v63, %v3163_v43  ;;  %v3195_v28 = vsub.f32 %v10961_v10, %v3169_v14 }
 0xa2a   :  { %9566 = vpow2.f32 %v3223_v1 }
 0xa2b   :  { %v3217_v16 = vmul.f32 1.442695, %v3193_v56  ;;  %v3221_v52 = vmul.f32 1.442695, %v3195_v28 }
 0xa2c   :  { %v3178_v9 = vpop.xlane.xlu1 %3177  ;;  %v3181_v39 = vpop.xlane.xlu0 %3180 }
 0xa2d   :  { %9568 = vpow2.f32 %v3217_v16  ;;  %v3198_v35 = vsub.f32 %v10967_v6, %v3178_v9  ;;  %v3199_v32 = vsub.f32 %v10969_v19, %v3181_v39 }
 0xa2e   :  { %v11045_v38 = vpop.eup %9560  ;;  %9570 = vpow2.f32 %v3221_v52 }
 0xa2f   :  { %v3227_v21 = vmul.f32 1.442695, %v3198_v35  ;;  %v3229_v20 = vmul.f32 1.442695, %v3199_v32  ;;  %v3254_v43 = vsel %vm245_vm0, %v11045_v38, 0.0 }
 0xa30   :  { %3255 = vadd.xlane.f32.xlu1 %v3254_v43  ;;  %v3175_v14 = vpop.xlane.xlu1 %3174 }
 0xa31   :  { %9572 = vpow2.f32 %v3227_v21  ;;  %v3197_v1 = vsub.f32 %v10975_v5, %v3175_v14 }
 0xa32   :  { %v11050_v63 = vpop.eup %9562  ;;  %9574 = vpow2.f32 %v3229_v20 }
 0xa33   :  { %v3225_v10 = vmul.f32 1.442695, %v3197_v1  ;;  %v3251_v6 = vsel %vm245_vm0, %v11050_v63, 0.0  ;;  %v410_v1 = vmul.f32 %v10303_v17, %v10669_v54 }
 0xa34   :  { %3252 = vadd.xlane.f32.xlu1 %v3251_v6  ;;  %v3184_v19 = vpop.xlane.xlu1 %3183  ;;  %v11093_v6 = vpop.permute.xlu0 %3762 }
 0xa35   :  { %9576 = vpow2.f32 %v3225_v10  ;;  %v3200_v31 = vsub.f32 %v10981_v34, %v3184_v19  ;;  %v409_v10 = vmul.f32 %v10303_v17, %v10765_v25 }
 0xa36   :  { %v11055_v33 = vpop.eup %9564 }
 0xa37   :  { %v11057_v27 = vpop.eup %9566  ;;  %v3231_v50 = vmul.f32 1.442695, %v3200_v31  ;;  %v3260_v5 = vsel %vm245_vm0, %v11055_v33, 0.0 }
 0xa38   :  { %3261 = vadd.xlane.f32.xlu1 %v3260_v5  ;;  %v3266_v56 = vsel %vm245_vm0, %v11057_v27, 0.0  ;;  %v11095_v19 = vpop.permute.xlu0 %3760 }
 0xa39   :  { %9578 = vpow2.f32 %v3231_v50  ;;  %3267 = vadd.xlane.f32.xlu0 %v3266_v56  ;;  %12118 = vst [vmem:[#allocation30_spill] sm:$0xff] %v11095_v19  ;;  %v11097_v50 = vpop.permute.xlu1 %3855 }
 0xa3a   :  { %v11063_v28 = vpop.eup %9568  ;;  %12119 = vst [vmem:[#allocation31_spill] sm:$0xff] %v11097_v50 }
 0xa3b   :  { %v11065_v16 = vpop.eup %9570  ;;  %v3257_v34 = vsel %vm245_vm0, %v11063_v28, 0.0 }
 0xa3c   :  { %3258 = vadd.xlane.f32.xlu1 %v3257_v34  ;;  %v3263_v52 = vsel %vm245_vm0, %v11065_v16, 0.0 }
 0xa3d   :  { %3264 = vadd.xlane.f32.xlu0 %v3263_v52  ;;  %v11099_v34 = vpop.permute.xlu1 %3853 }
 0xa3e   :  { %v11071_v9 = vpop.eup %9572  ;;  %12120 = vst [vmem:[#allocation32_spill] sm:$0xff] %v11099_v34 }
 0xa3f   :  { %v11073_v39 = vpop.eup %9574  ;;  %v3272_v35 = vsel %vm245_vm0, %v11071_v9, 0.0 }
 0xa40   :  { %3273 = vadd.xlane.f32.xlu1 %v3272_v35  ;;  %v3275_v32 = vsel %vm245_vm0, %v11073_v39, 0.0 }
 0xa41   :  { %3276 = vadd.xlane.f32.xlu0 %v3275_v32 }
 0xa42   :  { %v11079_v21 = vpop.eup %9576 }
 0xa43   :  { %v3269_v20 = vsel %vm245_vm0, %v11079_v21, 0.0 }
 0xa44   :  { %3270 = vadd.xlane.f32.xlu1 %v3269_v20 }
 0xa46   :  { %v11083_v43 = vpop.eup %9578 }
 0xa47   :  { %v3278_v14 = vsel %vm245_vm0, %v11083_v43, 0.0 }
 0xa48   :  { %3279 = vadd.xlane.f32.xlu1 %v3278_v14 }
 0xa57   :  { %3944 = vrot.lane.b32.xlu0 %v410_v1, %s10024_s21 }
 0xa59   :  { %3942 = vrot.lane.b32.xlu1 %v409_v10, %s10024_s21 }
 0xa7c   :  { %v3238_v31 = vpop.xlane.xlu0 %3237 }
 0xa80   :  { %v3235_v5 = vpop.xlane.xlu0 %3234 }
 0xa81   :  { %9580 = vrcp.f32 %v3235_v5 }
 0xa84   :  { %v3250_v54 = vpop.xlane.xlu1 %3249 }
 0xa85   :  { %v3244_v56 = vpop.xlane.xlu0 %3243  ;;  %9582 = vrcp.f32 %v3250_v54 }
 0xa89   :  { %v3241_v52 = vpop.xlane.xlu0 %3240 }
 0xa8d   :  { %v3247_v35 = vpop.xlane.xlu0 %3246 }
 0xa8e   :  { %9584 = vrcp.f32 %v3247_v35  ;;  %v9581_v25 = vpop.eup %9580 }
 0xa8f   :  { %9586 = vrcp.f32 %v3238_v31  ;;  %v3297_v48 = vmul.f32 %v9581_v25, %v11013_v18 }
 0xa90   :  { %9588 = vrcp.f32 %v3241_v52 }
 0xa92   :  { %v9583_v32 = vpop.eup %9582 }
 0xa93   :  { %v3302_v1 = vmul.f32 %v9583_v32, %v11017_v24 }
 0xa9b   :  { %v9585_v20 = vpop.eup %9584 }
 0xa9c   :  { %v3301_v14 = vmul.f32 %v9585_v20, %v11029_v26  ;;  %v9587_v10 = vpop.eup %9586 }
 0xa9d   :  { %v3298_v31 = vmul.f32 %v9587_v10, %v11009_v4  ;;  %v9589_v54 = vpop.eup %9588 }
 0xa9e   :  { %9087 = vmatprep.mubr.msk.f32.mxu0 %vm245_vm0, %v3301_v14  ;;  %v3299_v10 = vmul.f32 %v9589_v54, %v11025_v3 }
 0xa9f   :  { %9088 = vmatmul.mubr.msk.f32.vlgmr.msra.gmra.mxu0 %vm245_vm0, %v3302_v1 }
 0xaa0   :  { %9098 = vmatpush3.msra.mxu0 %v10906_v12  ;;  %9101 = vmatprep.mubr.msk.f32.mxu0 %vm245_vm0, %v3297_v48 }
 0xaa1   :  { %9099 = vmatprep.subr.mxu0 %v10999_v36 }
 0xaa2   :  { %9100 = vmatpush3.msra.mxu0 %v10999_v36 }
 0xaa3   :  { %9111 = vmatprep.subr.mxu0 %v11002_v15  ;;  %9102 = vmatmul.mubr.msk.f32.vlgmr.msra.gmra.mxu0 %vm245_vm0, %v3298_v31 }
 0xaa4   :  { %9112 = vmatpush3.msra.mxu0 %v11002_v15 }
 0xaa5   :  { %9113 = vmatprep.subr.mxu0 %v11033_v55 }
 0xaa6   :  { %9114 = vmatpush3.msra.mxu0 %v11033_v55 }
 0xaa7   :  { %9125 = vmatprep.subr.mxu0 %v11097_v50 }
 0xab9   :  { %v3256_v18 = vpop.xlane.xlu1 %3255 }
 0xaba   :  { %9590 = vrcp.f32 %v3256_v18 }
 0xabd   :  { %v3253_v48 = vpop.xlane.xlu1 %3252 }
 0xabe   :  { %9592 = vrcp.f32 %v3253_v48 }
 0xabf   :  { %9594 = vrcp.f32 %v3244_v56 }
 0xac1   :  { %v3262_v4 = vpop.xlane.xlu1 %3261 }
 0xac2   :  { %v3268_v24 = vpop.xlane.xlu0 %3267  ;;  %9596 = vrcp.f32 %v3262_v4 }
 0xac3   :  { %9598 = vrcp.f32 %v3268_v24 }
 0xac5   :  { %v3259_v26 = vpop.xlane.xlu1 %3258 }
 0xac6   :  { %9600 = vrcp.f32 %v3259_v26  ;;  %v3265_v5 = vpop.xlane.xlu0 %3264 }
 0xac7   :  { %9602 = vrcp.f32 %v3265_v5  ;;  %v9591_v25 = vpop.eup %9590 }
 0xac8   :  { %v3304_v56 = vmul.f32 %v9591_v25, %v11045_v38 }
 0xac9   :  { %v3274_v35 = vpop.xlane.xlu1 %3273 }
 0xaca   :  { %v3277_v32 = vpop.xlane.xlu0 %3276 }
 0xacb   :  { %v9593_v20 = vpop.eup %9592  ;;  %9604 = vrcp.f32 %v3277_v32 }
 0xacc   :  { %v3303_v52 = vmul.f32 %v9593_v20, %v11050_v63  ;;  %9606 = vrcp.f32 %v3274_v35  ;;  %v9595_v1 = vpop.eup %9594  ;;  %v229_v20 = vld [vmem:[#allocation13 + $0x8] sm:$0xff] }
 0xacd   :  { %v3271_v14 = vpop.xlane.xlu1 %3270  ;;  %v3300_v18 = vmul.f32 %v9595_v1, %v11019_v11 }
 0xace   :  { %9608 = vrcp.f32 %v3271_v14  ;;  %9094 = vmatprep.mubr.msk.f32.mxu1 %vm245_vm0, %v3303_v52  ;;  %v11134_v26 = vpop.permute.xlu0 %3944  ;;  %v228_v52 = vld [vmem:[#allocation13] sm:$0xff] }
 0xacf   :  { %9095 = vmatmul.mubr.msk.f32.vlgmr.msra.gmra.mxu1 %vm245_vm0, %v3304_v56  ;;  %v9597_v31 = vpop.eup %9596  ;;  %12121 = vst [vmem:[#allocation33_spill] sm:$0xff] %v11134_v26 }
 0xad0   :  { %9105 = vmatpush3.msra.mxu1 %v10913_v40  ;;  %9108 = vmatprep.mubr.msk.f32.mxu1 %vm245_vm0, %v3299_v10  ;;  %v9599_v48 = vpop.eup %9598  ;;  %v3306_v24 = vmul.f32 %v9597_v31, %v11055_v33 }
 0xad1   :  { %9106 = vmatprep.subr.mxu1 %v11036_v7  ;;  %v3280_v63 = vpop.xlane.xlu1 %3279  ;;  %v3308_v5 = vmul.f32 %v9599_v48, %v11057_v27 }
 0xad2   :  { %9610 = vrcp.f32 %v3280_v63  ;;  %9107 = vmatpush3.msra.mxu1 %v11036_v7 }
 0xad3   :  { %v9601_v38 = vpop.eup %9600  ;;  %9118 = vmatprep.subr.mxu1 %v11093_v6  ;;  %9109 = vmatmul.mubr.msk.f32.vlgmr.msra.gmra.mxu1 %vm245_vm0, %v3300_v18 }
 0xad4   :  { %v9603_v3 = vpop.eup %9602  ;;  %9119 = vmatpush3.msra.mxu1 %v11093_v6  ;;  %v3305_v4 = vmul.f32 %v9601_v38, %v11063_v28 }
 0xad5   :  { %9120 = vmatprep.subr.mxu1 %v11095_v19  ;;  %v3307_v11 = vmul.f32 %v9603_v3, %v11065_v16  ;;  %v11146_v16 = vpop.permute.xlu1 %3942 }
 0xad6   :  { %9121 = vmatpush3.msra.mxu1 %v11095_v19  ;;  %9115 = vmatprep.mubr.msk.f32.mxu0 %vm245_vm0, %v3305_v4  ;;  %12122 = vst [vmem:[#allocation34_spill] sm:$0xff] %v11146_v16 }
 0xad7   :  { %9132 = vmatprep.subr.mxu1 %v11134_v26  ;;  %9116 = vmatmul.mubr.msk.f32.vlgmr.msra.gmra.mxu0 %vm245_vm0, %v3306_v24 }
 0xad8   :  { %v9605_v54 = vpop.eup %9604  ;;  %9122 = vmatprep.mubr.msk.f32.mxu1 %vm245_vm0, %v3307_v11  ;;  %9126 = vmatpush3.msra.mxu0 %v11097_v50 }
 0xad9   :  { %9123 = vmatmul.mubr.msk.f32.vlgmr.msra.gmra.mxu1 %vm245_vm0, %v3308_v5  ;;  %9127 = vmatprep.subr.mxu0 %v11099_v34  ;;  %v3311_v33 = vmul.f32 %v9605_v54, %v11073_v39  ;;  %v9607_v28 = vpop.eup %9606 }
 0xada   :  { %9133 = vmatpush3.msra.mxu1 %v11134_v26  ;;  %9128 = vmatpush3.msra.mxu0 %v11099_v34  ;;  %v3310_v25 = vmul.f32 %v9607_v28, %v11071_v9 }
 0xadb   :  { %v9609_v35 = vpop.eup %9608  ;;  %9134 = vmatprep.subr.mxu1 %v11146_v16  ;;  %9136 = vmatprep.mubr.msk.f32.mxu1 %vm245_vm0, %v3311_v33 }
 0xadc   :  { %9135 = vmatpush3.msra.mxu1 %v11146_v16  ;;  %v3309_v27 = vmul.f32 %v9609_v35, %v11079_v21  ;;  %9139 = vmatprep.subr.mxu0 %v229_v20 }
 0xade   :  { %9129 = vmatprep.mubr.msk.f32.mxu0 %vm245_vm0, %v3309_v27 }
 0xadf   :  { %v9611_v39 = vpop.eup %9610  ;;  %9130 = vmatmul.mubr.msk.f32.vlgmr.msra.gmra.mxu0 %vm245_vm0, %v3310_v25 }
 0xae0   :  { %v3312_v32 = vmul.f32 %v9611_v39, %v11083_v43  ;;  %9140 = vmatpush3.msra.mxu0 %v229_v20 }
 0xae1   :  { %9141 = vmatprep.subr.mxu0 %v228_v52 }
 0xae2   :  { %9137 = vmatmul.mubr.msk.f32.vlgmr.msra.gmra.mxu1 %vm245_vm0, %v3312_v32  ;;  %9142 = vmatpush3.msra.mxu0 %v228_v52 }
 0xb5f   :  { %v9089_v14 = vpop.f32.mrf.mxu0 }
 0xb61   :  { %v3393_v56 = vpop.f32.mrf.mxu0 }
 0xb63   :  { %v9103_v9 = vpop.f32.mrf.mxu0 }
 0xb64   :  { %v3577_v3 = vadd.f32 %v9103_v9, %v9089_v14  ;;  %v8402_v14 = vld [vmem:[%s12072_s14] ss:$0 sm:$0xff] }
 0xb65   :  { %v3571_v31 = vpop.f32.mrf.mxu0 }
 0xb66   :  { %v3572_v43 = vadd.f32 %v3571_v31, %v3393_v56 }
 0xb8f   :  { %v9096_v21 = vpop.f32.mrf.mxu1 }
 0xb91   :  { %v3482_v1 = vpop.f32.mrf.mxu1 }
 0xb93   :  { %v9110_v10 = vpop.f32.mrf.mxu1 }
 0xb94   :  { %v3666_v27 = vadd.f32 %v9110_v10, %v9096_v21 }
 0xb95   :  { %v3660_v63 = vpop.f32.mrf.mxu1 }
 0xb96   :  { %v3661_v5 = vadd.f32 %v3660_v63, %v3482_v1 }
 0xb97   :  { %v9117_v18 = vpop.f32.mrf.mxu0 }
 0xb98   :  { %v3848_v54 = vadd.f32 %v9117_v18, %v3577_v3 }
 0xb99   :  { %v9124_v48 = vpop.f32.mrf.mxu1  ;;  %v3749_v38 = vpop.f32.mrf.mxu0 }
 0xb9a   :  { %v3847_v24 = vadd.f32 %v3749_v38, %v3572_v43  ;;  %v3850_v20 = vadd.f32 %v9124_v48, %v3666_v27 }
 0xb9b   :  { %v3838_v11 = vpop.f32.mrf.mxu1 }
 0xb9c   :  { %v3849_v25 = vadd.f32 %v3838_v11, %v3661_v5 }
 0xb9f   :  { %v9131_v4 = vpop.f32.mrf.mxu0 }
 0xba0   :  { %v4030_v39 = vadd.f32 %v9131_v4, %v3848_v54 }
 0xba1   :  { %v3931_v33 = vpop.f32.mrf.mxu0 }
 0xba2   :  { %v4029_v28 = vadd.f32 %v3931_v33, %v3847_v24  ;;  %v9138_v35 = vpop.f32.mrf.mxu1 }
 0xba3   :  { %v4032_v56 = vadd.f32 %v9138_v35, %v3850_v20 }
 0xba4   :  { %v4020_v32 = vpop.f32.mrf.mxu1  ;;  %9143 = vmatprep.mubr.msk.f32.mxu0 %vm245_vm0, %v4029_v28 }
 0xba5   :  { %v4031_v52 = vadd.f32 %v4020_v32, %v3849_v25  ;;  %9144 = vmatmul.mubr.msk.f32.vlgmr.msra.gmra.mxu0 %vm245_vm0, %v4030_v39 }
 0xba7   :  { %9146 = vmatprep.mubr.msk.f32.mxu0 %vm245_vm0, %v4031_v52 }
 0xba9   :  { %9147 = vmatmul.mubr.msk.f32.gmra.mxu0 %vm245_vm0, %v4032_v56 }
 0xc65   :  { %v9145_v1 = vpop.f32.mrf.mxu0 }
 0xc66   :  { %v4123_v21 = vadd.f32 %v9145_v1, %v8402_v14 }
 0xc67   :  { %v4117_v9 = vpop.f32.mrf.mxu0 }
 0xc68   :  { %v4118_v10 = vadd.f32 %v8402_v14, %v4117_v9  ;;  %v11167_v63 = vadd.f32 %v4123_v21, %v10711_v46 }
 0xc69   :  { %v9148_v31 = vpop.f32.mrf.mxu0 }
 0xc6a   :  { %v4133_v18 = vadd.f32 %v9148_v31, %v8402_v14  ;;  %v11170_v38 = vadd.f32 %v4118_v10, %v10716_v45  ;;  %v4145_v24 = vsel %vm245_vm0, %v11167_v63, 0.0 }
 0xc6b   :  { %v4127_v48 = vpop.f32.mrf.mxu0 }
 0xc6c   :  { %v11173_v43 = vadd.f32 %v4133_v18, %v10721_v42  ;;  %v4128_v3 = vadd.f32 %v8402_v14, %v4127_v48  ;;  %v4140_v5 = vsel %vm245_vm0, %v11170_v38, 0.0  ;;  %v232_v18 = vld [vmem:[#allocation14 + $0x8] sm:$0xff]  ;;  %v231_v48 = vld [vmem:[#allocation14] sm:$0xff] }
 0xc6d   :  { %9149 = vmatprep.subr.mxu1 %v232_v18 }
 0xc6e   :  { %v11176_v4 = vadd.f32 %v4128_v3, %v10726_v22  ;;  %v4146_v11 = vsel %vm245_vm0, %v11173_v43, 0.0  ;;  %9150 = vmatpush3.msra.mxu1 %v232_v18  ;;  %v9769_v3 = vld [vmem:[%s12063_s5 + $0x8] sm:$0xff] }
 0xc6f   :  { %v4147_v46 = vadd.f32 %v4146_v11, %v4145_v24  ;;  %9151 = vmatprep.subr.mxu1 %v231_v48 }
 0xc70   :  { %v4141_v45 = vsel %vm245_vm0, %v11176_v4, 0.0  ;;  %9152 = vmatpush3.msra.mxu1 %v231_v48 }
 0xc71   :  { %4148 = vadd.xlane.f32.xlu1 %v4147_v46  ;;  %v4142_v42 = vadd.f32 %v4141_v45, %v4140_v5  ;;  %9173 = vmatprep.subr.mxu1 %v9769_v3 }
 0xc73   :  { %4143 = vadd.xlane.f32.xlu0 %v4142_v42 }
 0xcfa   :  { %v4149_v54 = vpop.xlane.xlu1 %4148 }
 0xcfb   :  { %v4151_v33 = vmul.f32 0.03125, %v4149_v54 }
 0xcfc   :  { %v4144_v22 = vpop.xlane.xlu0 %4143 }
 0xcfd   :  { %v4153_v28 = vsub.f32 %v11167_v63, %v4151_v33  ;;  %v4155_v35 = vsub.f32 %v11173_v43, %v4151_v33  ;;  %v4150_v27 = vmul.f32 0.03125, %v4144_v22 }
 0xcff   :  { %v4152_v25 = vsub.f32 %v11170_v38, %v4150_v27  ;;  %v4154_v39 = vsub.f32 %v11176_v4, %v4150_v27  ;;  %v4157_v32 = vmul.f32 %v4153_v28, %v4153_v28  ;;  %v4159_v20 = vmul.f32 %v4155_v35, %v4155_v35 }
 0xd01   :  { %v4156_v52 = vmul.f32 %v4152_v25, %v4152_v25  ;;  %v4158_v56 = vmul.f32 %v4154_v39, %v4154_v39  ;;  %v4165_v9 = vsel %vm245_vm0, %v4157_v32, 0.0  ;;  %v4166_v10 = vsel %vm245_vm0, %v4159_v20, 0.0 }
 0xd02   :  { %v4167_v31 = vadd.f32 %v4166_v10, %v4165_v9 }
 0xd03   :  { %v4160_v14 = vsel %vm245_vm0, %v4156_v52, 0.0  ;;  %v4161_v1 = vsel %vm245_vm0, %v4158_v56, 0.0  ;;  %v9770_v52 = vld [vmem:[%s12063_s5] sm:$0xff] }
 0xd04   :  { %v4162_v21 = vadd.f32 %v4161_v1, %v4160_v14  ;;  %v8407_v56 = vld [vmem:[%s12074_s16] ss:$0 sm:$0xff] }
 0xd06   :  { %4163 = vadd.xlane.f32.xlu0 %v4162_v21 }
 0xd0a   :  { %4168 = vadd.xlane.f32.xlu0 %v4167_v31 }
 0xd8f   :  { %v4164_v24 = vpop.xlane.xlu0 %4163 }
 0xd90   :  { %v4170_v11 = vmul.f32 0.03125, %v4164_v24 }
 0xd92   :  { %v4172_v46 = vadd.f32 1e-05, %v4170_v11 }
 0xd93   :  { %v4169_v5 = vpop.xlane.xlu0 %4168 }
 0xd94   :  { %9612 = vrsqrt.f32 %v4172_v46  ;;  %v4171_v45 = vmul.f32 0.03125, %v4169_v5  ;;  %v8412_v5 = vld [vmem:[%s12076_s18] ss:$0 sm:$0xff] }
 0xd96   :  { %v4173_v42 = vadd.f32 1e-05, %v4171_v45 }
 0xd98   :  { %9614 = vrsqrt.f32 %v4173_v42 }
 0xda1   :  { %v9613_v54 = vpop.eup %9612 }
 0xda2   :  { %v4176_v33 = vmul.f32 %v9613_v54, %v4152_v25  ;;  %v4178_v32 = vmul.f32 %v9613_v54, %v4154_v39  ;;  %v237_v25 = vld [vmem:[%s12075_s17 + $0x18] sm:$0xff]  ;;  %v234_v39 = vld [vmem:[%s12075_s17] sm:$0xff] }
 0xda3   :  { %9159 = vmatprep.subr.mxu0 %v237_v25 }
 0xda4   :  { %9153 = vmatprep.mubr.msk.f32.mxu1 %vm245_vm0, %v4176_v33  ;;  %9160 = vmatpush3.msra.mxu0 %v237_v25 }
 0xda5   :  { %v9615_v22 = vpop.eup %9614 }
 0xda6   :  { %v4177_v27 = vmul.f32 %v9615_v22, %v4153_v28  ;;  %v4179_v20 = vmul.f32 %v9615_v22, %v4155_v35  ;;  %v236_v28 = vld [vmem:[%s12075_s17 + $0x10] sm:$0xff]  ;;  %v235_v35 = vld [vmem:[%s12075_s17 + $0x8] sm:$0xff] }
 0xda7   :  { %9161 = vmatprep.subr.mxu0 %v236_v28 }
 0xda8   :  { %9154 = vmatmul.mubr.msk.f32.vlgmr.msra.gmra.mxu1 %vm245_vm0, %v4177_v27  ;;  %9162 = vmatpush3.msra.mxu0 %v236_v28 }
 0xda9   :  { %9156 = vmatprep.mubr.msk.f32.mxu1 %vm245_vm0, %v4178_v32  ;;  %9174 = vmatpush3.msra.mxu1 %v9769_v3 }
 0xdaa   :  { %9175 = vmatprep.subr.mxu1 %v9770_v52  ;;  %9163 = vmatprep.subr.mxu0 %v235_v35 }
 0xdab   :  { %9176 = vmatpush3.msra.mxu1 %v9770_v52  ;;  %9164 = vmatpush3.msra.mxu0 %v235_v35 }
 0xdac   :  { %9157 = vmatmul.mubr.msk.f32.gmra.mxu1 %vm245_vm0, %v4179_v20  ;;  %9165 = vmatprep.subr.mxu0 %v234_v39 }
 0xdad   :  { %9166 = vmatpush3.msra.mxu0 %v234_v39 }
 0xe68   :  { %v9155_v14 = vpop.f32.mrf.mxu1 }
 0xe69   :  { %v4270_v1 = vadd.f32 %v9155_v14, %v8407_v56 }
 0xe6a   :  { %v4264_v21 = vpop.f32.mrf.mxu1 }
 0xe6b   :  { %v4265_v9 = vadd.f32 %v8407_v56, %v4264_v21  ;;  %v4284_v18 = vmax.f32 %v4270_v1, 0.0 }
 0xe6c   :  { %v9158_v10 = vpop.f32.mrf.mxu1 }
 0xe6d   :  { %v4283_v31 = vmax.f32 %v4265_v9, 0.0  ;;  %v4280_v48 = vadd.f32 %v9158_v10, %v8407_v56 }
 0xe6e   :  { %v4274_v3 = vpop.f32.mrf.mxu1 }
 0xe6f   :  { %v4275_v24 = vadd.f32 %v8407_v56, %v4274_v3  ;;  %9167 = vmatprep.mubr.msk.f32.mxu0 %vm4293_vm1, %v4283_v31  ;;  %v4286_v46 = vmax.f32 %v4280_v48, 0.0 }
 0xe70   :  { %9168 = vmatmul.mubr.msk.f32.vlgmr.msra.gmra.mxu0 %vm4293_vm1, %v4284_v18 }
 0xe71   :  { %v4285_v11 = vmax.f32 %v4275_v24, 0.0 }
 0xe73   :  { %9170 = vmatprep.mubr.msk.f32.mxu0 %vm4293_vm1, %v4285_v11 }
 0xe74   :  { %9171 = vmatmul.mubr.msk.f32.gmra.mxu0 %vm4293_vm1, %v4286_v46 }
 0xf30   :  { %v9169_v45 = vpop.f32.mrf.mxu0 }
 0xf31   :  { %v4378_v42 = vadd.f32 %v9169_v45, %v8412_v5 }
 0xf32   :  { %v4372_v54 = vpop.f32.mrf.mxu0 }
 0xf33   :  { %v4373_v33 = vadd.f32 %v8412_v5, %v4372_v54  ;;  %v11227_v27 = vadd.f32 %v4378_v42, %v11167_v63 }
 0xf34   :  { %v9172_v22 = vpop.f32.mrf.mxu0 }
 0xf35   :  { %v4388_v32 = vadd.f32 %v9172_v22, %v8412_v5  ;;  %v11230_v52 = vadd.f32 %v4373_v33, %v11170_v38  ;;  %v4400_v39 = vsel %vm245_vm0, %v11227_v27, 0.0 }
 0xf36   :  { %v4382_v20 = vpop.f32.mrf.mxu0 }
 0xf37   :  { %v11233_v25 = vadd.f32 %v4388_v32, %v11173_v43  ;;  %v4383_v28 = vadd.f32 %v8412_v5, %v4382_v20  ;;  %v4395_v14 = vsel %vm245_vm0, %v11230_v52, 0.0 }
 0xf39   :  { %v11236_v35 = vadd.f32 %v4383_v28, %v11176_v4  ;;  %v4401_v56 = vsel %vm245_vm0, %v11233_v25, 0.0 }
 0xf3a   :  { %v4402_v63 = vadd.f32 %v4401_v56, %v4400_v39 }
 0xf3b   :  { %v4396_v38 = vsel %vm245_vm0, %v11236_v35, 0.0 }
 0xf3c   :  { %4403 = vadd.xlane.f32.xlu1 %v4402_v63  ;;  %v4397_v43 = vadd.f32 %v4396_v38, %v4395_v14 }
 0xf3e   :  { %4398 = vadd.xlane.f32.xlu0 %v4397_v43 }
 0xfc5   :  { %v4404_v1 = vpop.xlane.xlu1 %4403 }
 0xfc6   :  { %v4406_v21 = vmul.f32 0.03125, %v4404_v1 }
 0xfc7   :  { %v4399_v4 = vpop.xlane.xlu0 %4398 }
 0xfc8   :  { %v4408_v9 = vsub.f32 %v11227_v27, %v4406_v21  ;;  %v4410_v10 = vsub.f32 %v11233_v25, %v4406_v21  ;;  %v4405_v31 = vmul.f32 0.03125, %v4399_v4 }
 0xfca   :  { %v4412_v18 = vmul.f32 %v4408_v9, %v4408_v9  ;;  %v4414_v48 = vmul.f32 %v4410_v10, %v4410_v10  ;;  %v4407_v3 = vsub.f32 %v11230_v52, %v4405_v31  ;;  %v4409_v24 = vsub.f32 %v11236_v35, %v4405_v31 }
 0xfcc   :  { %v4411_v11 = vmul.f32 %v4407_v3, %v4407_v3  ;;  %v4413_v46 = vmul.f32 %v4409_v24, %v4409_v24  ;;  %v4420_v5 = vsel %vm245_vm0, %v4412_v18, 0.0  ;;  %v4421_v45 = vsel %vm245_vm0, %v4414_v48, 0.0  ;;  %v9771_v18 = vld [vmem:[%s12064_s6] ss:$0 sm:$0xff] }
 0xfcd   :  { %v4422_v42 = vadd.f32 %v4421_v45, %v4420_v5 }
 0xfce   :  { %v4415_v54 = vsel %vm245_vm0, %v4411_v11, 0.0  ;;  %v4416_v33 = vsel %vm245_vm0, %v4413_v46, 0.0 }
 0xfcf   :  { %4423 = vadd.xlane.f32.xlu1 %v4422_v42  ;;  %v4417_v22 = vadd.f32 %v4416_v33, %v4415_v54 }
 0xfd1   :  { %4418 = vadd.xlane.f32.xlu0 %v4417_v22 }
0x1058   :  { %v4424_v32 = vpop.xlane.xlu1 %4423 }
0x1059   :  { %v4426_v20 = vmul.f32 0.03125, %v4424_v32 }
0x105a   :  { %v4419_v28 = vpop.xlane.xlu0 %4418 }
0x105b   :  { %v4428_v39 = vadd.f32 1e-05, %v4426_v20  ;;  %v4425_v56 = vmul.f32 0.03125, %v4419_v28 }
0x105d   :  { %v4427_v63 = vadd.f32 1e-05, %v4425_v56  ;;  %9616 = vrsqrt.f32 %v4428_v39 }
0x105f   :  { %9618 = vrsqrt.f32 %v4427_v63 }
0x106a   :  { %v9617_v14 = vpop.eup %9616 }
0x106b   :  { %v4432_v1 = vmul.f32 %v9617_v14, %v4408_v9  ;;  %v4434_v4 = vmul.f32 %v9617_v14, %v4410_v10 }
0x106c   :  { %v9619_v38 = vpop.eup %9618 }
0x106d   :  { %v4431_v43 = vmul.f32 %v9619_v38, %v4407_v3  ;;  %v4433_v21 = vmul.f32 %v9619_v38, %v4409_v24 }
0x106f   :  { %9177 = vmatprep.mubr.msk.f32.mxu1 %vm245_vm0, %v4431_v43 }
0x1070   :  { %9178 = vmatmul.mubr.msk.f32.vlgmr.msra.gmra.mxu1 %vm245_vm0, %v4432_v1 }
0x1071   :  { %9180 = vmatprep.mubr.msk.f32.mxu1 %vm245_vm0, %v4433_v21 }
0x1074   :  { %9181 = vmatmul.mubr.msk.f32.gmra.mxu1 %vm245_vm0, %v4434_v4 }
0x1130   :  { %v9179_v31 = vpop.f32.mrf.mxu1 }
0x1131   :  { %v11261_v48 = vadd.f32 %v9771_v18, %v9179_v31 }
0x1132   :  { %v4513_v11 = vpop.f32.mrf.mxu1 }
0x1133   :  { %v11263_v3 = vadd.f32 %v9771_v18, %v4513_v11  ;;  %v4533_v9 = vmul.f32 %v11261_v48, %v10247_v58  ;;  %v4537_v54 = vmul.f32 %v11261_v48, %v10276_v8  ;;  %v4541_v28 = vmul.f32 %v11261_v48, %v10292_v13 }
0x1134   :  { %v9182_v24 = vpop.f32.mrf.mxu1  ;;  %v4545_v63 = vmul.f32 %v11261_v48, %v10303_v17  ;;  %v4553_v43 = vmul.f32 %v11261_v48, %v10376_v41  ;;  %v4549_v11 = vmul.f32 %v11261_v48, %v10384_v44 }
0x1135   :  { %v11267_v46 = vadd.f32 %v9771_v18, %v9182_v24  ;;  %4572 = vrot.lane.b32.xlu0 %v4533_v9, %s10024_s21  ;;  %v11271_v10 = vmul.f32 0.5, %v11263_v3  ;;  %v4532_v5 = vmul.f32 %v11263_v3, %v10247_v58  ;;  %v4536_v39 = vmul.f32 %v11263_v3, %v10276_v8 }
0x1136   :  { %v4523_v45 = vpop.f32.mrf.mxu1  ;;  %v4540_v14 = vmul.f32 %v11263_v3, %v10292_v13  ;;  %v4544_v1 = vmul.f32 %v11263_v3, %v10303_v17  ;;  %v4552_v31 = vmul.f32 %v11263_v3, %v10376_v41  ;;  %v4548_v9 = vmul.f32 %v11263_v3, %v10384_v44 }
0x1137   :  { %v11275_v42 = vadd.f32 %v9771_v18, %v4523_v45  ;;  %9187 = vmatprep.mubr.msk.f32.mxu0 %vm245_vm0, %v11271_v10  ;;  %4570 = vrot.lane.b32.xlu1 %v4532_v5, %s10024_s21  ;;  %v4535_v22 = vmul.f32 %v11267_v46, %v10247_v58  ;;  %v4539_v32 = vmul.f32 %v11267_v46, %v10276_v8 }
0x1138   :  { %v4543_v56 = vmul.f32 %v11267_v46, %v10292_v13  ;;  %v4547_v38 = vmul.f32 %v11267_v46, %v10303_v17  ;;  %v4551_v21 = vmul.f32 %v11267_v46, %v10384_v44  ;;  %v4557_v24 = vmul.f32 %v11261_v48, %v10393_v47 }
0x1139   :  { %4754 = vrot.lane.b32.xlu0 %v4537_v54, %s10024_s21  ;;  %v11284_v33 = vmul.f32 0.5, %v11275_v42  ;;  %v4534_v20 = vmul.f32 %v11275_v42, %v10247_v58  ;;  %v4538_v58 = vmul.f32 %v11275_v42, %v10276_v8  ;;  %v4542_v8 = vmul.f32 %v11275_v42, %v10292_v13 }
0x113a   :  { %v4546_v13 = vmul.f32 %v11275_v42, %v10303_v17  ;;  %v4554_v4 = vmul.f32 %v11275_v42, %v10376_v41  ;;  %v4550_v18 = vmul.f32 %v11275_v42, %v10384_v44  ;;  %v4555_v17 = vmul.f32 %v11267_v46, %v10376_v41 }
0x113b   :  { %9194 = vmatprep.mubr.msk.f32.mxu1 %vm245_vm0, %v11284_v33  ;;  %4663 = vrot.lane.b32.xlu1 %v4535_v22, %s10024_s21  ;;  %v4556_v41 = vmul.f32 %v11263_v3, %v10393_v47  ;;  %v4565_v22 = vmul.f32 0.5, %v11261_v48 }
0x113d   :  { %4839 = vrot.lane.b32.xlu0 %v4539_v32, %s10024_s21 }
0x113f   :  { %4661 = vrot.lane.b32.xlu1 %v4534_v20, %s10024_s21 }
0x1141   :  { %4924 = vrot.lane.b32.xlu0 %v4541_v28, %s10024_s21 }
0x1143   :  { %4752 = vrot.lane.b32.xlu1 %v4536_v39, %s10024_s21  ;;  %v4567_v39 = vmul.f32 0.5, %v11267_v46 }
0x1145   :  { %5009 = vrot.lane.b32.xlu0 %v4543_v56, %s10024_s21 }
0x1147   :  { %4837 = vrot.lane.b32.xlu1 %v4538_v58, %s10024_s21 }
0x1149   :  { %5094 = vrot.lane.b32.xlu0 %v4545_v63, %s10024_s21 }
0x114b   :  { %4922 = vrot.lane.b32.xlu1 %v4540_v14, %s10024_s21 }
0x114d   :  { %5179 = vrot.lane.b32.xlu0 %v4547_v38, %s10024_s21 }
0x114f   :  { %5007 = vrot.lane.b32.xlu1 %v4542_v8, %s10024_s21 }
0x1151   :  { %5456 = vrot.lane.b32.xlu0 %v4553_v43, %s10026_s25 }
0x1153   :  { %5092 = vrot.lane.b32.xlu1 %v4544_v1, %s10024_s21 }
0x1155   :  { %5723 = vrot.lane.b32.xlu0 %v4551_v21, %s10026_s25 }
0x1157   :  { %5177 = vrot.lane.b32.xlu1 %v4546_v13, %s10024_s21 }
0x1159   :  { %5543 = vrot.lane.b32.xlu0 %v4554_v4, %s10026_s25 }
0x115b   :  { %5454 = vrot.lane.b32.xlu1 %v4552_v31, %s10026_s25 }
0x115d   :  { %5721 = vrot.lane.b32.xlu0 %v4550_v18, %s10026_s25 }
0x115f   :  { %5545 = vrot.lane.b32.xlu1 %v4555_v17, %s10026_s25 }
0x1163   :  { %5634 = vrot.lane.b32.xlu1 %v4549_v11, %s10026_s25  ;;  %v9772_v11 = vld [vmem:[#allocation5 + $0x8] sm:$0xff] }
0x1167   :  { %5632 = vrot.lane.b32.xlu1 %v4548_v9, %s10026_s25 }
0x116b   :  { %5812 = vrot.lane.b32.xlu1 %v4557_v24, %s10026_s25 }
0x116f   :  { %5810 = vrot.lane.b32.xlu1 %v4556_v41, %s10026_s25  ;;  %v9773_v41 = vld [vmem:[#allocation5] sm:$0xff] }
0x11a7   :  { %v4573_v5 = vpop.permute.xlu0 %4572 }
0x11a8   :  { %9183 = vmatprep.subr.msk.mxu0 %vm245_vm0, %v4573_v5 }
0x11a9   :  { %9184 = vmatpush3.xpose.msk.msra.mxu0 %vm245_vm0, %v4573_v5  ;;  %v4571_v45 = vpop.permute.xlu1 %4570 }
0x11aa   :  { %9185 = vmatprep.subr.msk.mxu0 %vm245_vm0, %v4571_v45 }
0x11ab   :  { %v4755_v44 = vpop.permute.xlu0 %4754 }
0x11ad   :  { %9186 = vmatpush3.xpose.msk.msra.mxu0 %vm245_vm0, %v4571_v45  ;;  %v4664_v54 = vpop.permute.xlu1 %4663 }
0x11ae   :  { %9190 = vmatprep.subr.msk.mxu1 %vm245_vm0, %v4664_v54  ;;  %9197 = vmatprep.subr.msk.mxu0 %vm245_vm0, %v4755_v44 }
0x11af   :  { %v4840_v32 = vpop.permute.xlu0 %4839  ;;  %9191 = vmatpush3.xpose.msk.msra.mxu1 %vm245_vm0, %v4664_v54  ;;  %v9774_v54 = vld [vmem:[#allocation5 + $0x18] sm:$0xff] }
0x11b0   :  { %9188 = vmatmul.mubr.msk.f32.vlgmr.msra.gmra.mxu0 %vm245_vm0, %v4565_v22 }
0x11b1   :  { %9198 = vmatpush3.xpose.msk.msra.mxu0 %vm245_vm0, %v4755_v44  ;;  %9201 = vmatprep.mubr.msk.f32.mxu0 %vm245_vm0, %v11271_v10  ;;  %v4662_v20 = vpop.permute.xlu1 %4661 }
0x11b2   :  { %9192 = vmatprep.subr.msk.mxu1 %vm245_vm0, %v4662_v20 }
0x11b3   :  { %v4925_v28 = vpop.permute.xlu0 %4924  ;;  %9193 = vmatpush3.xpose.msk.msra.mxu1 %vm245_vm0, %v4662_v20 }
0x11b4   :  { %9204 = vmatprep.subr.msk.mxu1 %vm245_vm0, %v4840_v32 }
0x11b5   :  { %v4753_v56 = vpop.permute.xlu1 %4752 }
0x11b6   :  { %9195 = vmatmul.mubr.msk.f32.vlgmr.msra.gmra.mxu1 %vm245_vm0, %v4567_v39  ;;  %9199 = vmatprep.subr.msk.mxu0 %vm245_vm0, %v4753_v56 }
0x11b7   :  { %v5010_v58 = vpop.permute.xlu0 %5009  ;;  %9200 = vmatpush3.xpose.msk.msra.mxu0 %vm245_vm0, %v4753_v56  ;;  %9205 = vmatpush3.xpose.msk.msra.mxu1 %vm245_vm0, %v4840_v32 }
0x11b8   :  { %9208 = vmatprep.mubr.msk.f32.mxu1 %vm245_vm0, %v11284_v33  ;;  %9211 = vmatprep.subr.msk.mxu0 %vm245_vm0, %v4925_v28 }
0x11b9   :  { %v4838_v63 = vpop.permute.xlu1 %4837 }
0x11ba   :  { %9202 = vmatmul.mubr.msk.f32.vlgmr.msra.gmra.mxu0 %vm245_vm0, %v4565_v22  ;;  %9206 = vmatprep.subr.msk.mxu1 %vm245_vm0, %v4838_v63 }
0x11bb   :  { %v5095_v14 = vpop.permute.xlu0 %5094  ;;  %9207 = vmatpush3.xpose.msk.msra.mxu1 %vm245_vm0, %v4838_v63  ;;  %9212 = vmatpush3.xpose.msk.msra.mxu0 %vm245_vm0, %v4925_v28 }
0x11bc   :  { %9215 = vmatprep.mubr.msk.f32.mxu0 %vm245_vm0, %v11271_v10  ;;  %9218 = vmatprep.subr.msk.mxu1 %vm245_vm0, %v5010_v58 }
0x11bd   :  { %v4923_v38 = vpop.permute.xlu1 %4922 }
0x11be   :  { %9209 = vmatmul.mubr.msk.f32.vlgmr.msra.gmra.mxu1 %vm245_vm0, %v4567_v39  ;;  %9213 = vmatprep.subr.msk.mxu0 %vm245_vm0, %v4923_v38 }
0x11bf   :  { %9214 = vmatpush3.xpose.msk.msra.mxu0 %vm245_vm0, %v4923_v38  ;;  %9219 = vmatpush3.xpose.msk.msra.mxu1 %vm245_vm0, %v5010_v58  ;;  %v5180_v8 = vpop.permute.xlu0 %5179  ;;  %v9776_v58 = vld [vmem:[#allocation5 + $0x28] sm:$0xff] }
0x11c0   :  { %9222 = vmatprep.mubr.msk.f32.mxu1 %vm245_vm0, %v11284_v33  ;;  %9225 = vmatprep.subr.msk.mxu0 %vm245_vm0, %v5095_v14 }
0x11c1   :  { %v5008_v43 = vpop.permute.xlu1 %5007 }
0x11c2   :  { %9216 = vmatmul.mubr.msk.f32.vlgmr.msra.gmra.mxu0 %vm245_vm0, %v4565_v22  ;;  %9220 = vmatprep.subr.msk.mxu1 %vm245_vm0, %v5008_v43 }
0x11c3   :  { %9221 = vmatpush3.xpose.msk.msra.mxu1 %vm245_vm0, %v5008_v43  ;;  %9226 = vmatpush3.xpose.msk.msra.mxu0 %vm245_vm0, %v5095_v14  ;;  %v5457_v21 = vpop.permute.xlu0 %5456 }
0x11c4   :  { %9229 = vmatprep.mubr.msk.f32.mxu0 %vm245_vm0, %v11271_v10  ;;  %9232 = vmatprep.subr.msk.mxu1 %vm245_vm0, %v5180_v8 }
0x11c5   :  { %v5093_v1 = vpop.permute.xlu1 %5092 }
0x11c6   :  { %9223 = vmatmul.mubr.msk.f32.vlgmr.msra.gmra.mxu1 %vm245_vm0, %v4567_v39  ;;  %9227 = vmatprep.subr.msk.mxu0 %vm245_vm0, %v5093_v1 }
0x11c7   :  { %9228 = vmatpush3.xpose.msk.msra.mxu0 %vm245_vm0, %v5093_v1  ;;  %9233 = vmatpush3.xpose.msk.msra.mxu1 %vm245_vm0, %v5180_v8  ;;  %v11410_v10 = vpop.permute.xlu0 %5723  ;;  %v9777_v1 = vld [vmem:[#allocation5 + $0x20] sm:$0xff] }
0x11c8   :  { %9236 = vmatprep.mubr.msk.f32.mxu1 %vm245_vm0, %v11284_v33  ;;  %9239 = vmatprep.subr.mxu0 %v5457_v21 }
0x11c9   :  { %v5178_v13 = vpop.permute.xlu1 %5177 }
0x11ca   :  { %9230 = vmatmul.mubr.msk.f32.vlgmr.msra.gmra.mxu0 %vm245_vm0, %v4565_v22  ;;  %9234 = vmatprep.subr.msk.mxu1 %vm245_vm0, %v5178_v13 }
0x11cb   :  { %9235 = vmatpush3.xpose.msk.msra.mxu1 %vm245_vm0, %v5178_v13  ;;  %9240 = vmatpush3.msra.mxu0 %v5457_v21  ;;  %v5544_v18 = vpop.permute.xlu0 %5543  ;;  %v9778_v13 = vld [vmem:[#allocation5 + $0x38] sm:$0xff] }
0x11cd   :  { %v5455_v4 = vpop.permute.xlu1 %5454 }
0x11ce   :  { %9237 = vmatmul.mubr.msk.f32.vlgmr.msra.gmra.mxu1 %vm245_vm0, %v4567_v39  ;;  %9241 = vmatprep.subr.mxu0 %v5455_v4  ;;  %v9775_v39 = vld [vmem:[#allocation5 + $0x10] sm:$0xff] }
0x11cf   :  { %9242 = vmatpush3.msra.mxu0 %v5455_v4 }
0x11d1   :  { %v5546_v31 = vpop.permute.xlu1 %5545 }
0x11d2   :  { %9246 = vmatprep.subr.mxu1 %v5546_v31 }
0x11d3   :  { %9247 = vmatpush3.msra.mxu1 %v5546_v31 }
0x11d4   :  { %9248 = vmatprep.subr.mxu1 %v5544_v18 }
0x11d5   :  { %9249 = vmatpush3.msra.mxu1 %v5544_v18  ;;  %v11413_v33 = vpop.permute.xlu1 %5634 }
0x11d6   :  { %9253 = vmatprep.subr.mxu0 %v11413_v33  ;;  %9260 = vmatprep.subr.mxu1 %v11410_v10 }
0x1270   :  { %v9189_v17 = vpop.f32.mrf.mxu0 }
0x1271   :  { %v11417_v9 = vadd.f32 %v9772_v11, %v9189_v17 }
0x1272   :  { %v4650_v24 = vpop.f32.mrf.mxu0 }
0x1273   :  { %v11419_v5 = vadd.f32 %v9773_v41, %v4650_v24  ;;  %v5279_v45 = vsel %vm245_vm0, %v11417_v9, -inf  ;;  %v9779_v24 = vld [vmem:[#allocation5 + $0x30] sm:$0xff] }
0x1274   :  { %5280 = vmax.xlane.f32.xlu0 %v5279_v45  ;;  %v9780_v45 = vld [vmem:[#allocation5 + $0x48] sm:$0xff] }
0x1275   :  { %v5276_v32 = vsel %vm245_vm0, %v11419_v5, -inf }
0x1276   :  { %v9196_v44 = vpop.f32.mrf.mxu1 }
0x1277   :  { %v11423_v22 = vadd.f32 %v9774_v54, %v9196_v44 }
0x1278   :  { %5277 = vmax.xlane.f32.xlu0 %v5276_v32  ;;  %v4741_v20 = vpop.f32.mrf.mxu1 }
0x1279   :  { %v11427_v56 = vadd.f32 %v9775_v39, %v4741_v20  ;;  %v5285_v14 = vsel %vm245_vm0, %v11423_v22, -inf  ;;  %v9781_v20 = vld [vmem:[#allocation5 + $0x40] sm:$0xff] }
0x127a   :  { %v9203_v28 = vpop.f32.mrf.mxu0 }
0x127b   :  { %v11429_v63 = vadd.f32 %v9776_v58, %v9203_v28  ;;  %v5282_v31 = vsel %vm245_vm0, %v11427_v56, -inf }
0x127c   :  { %5286 = vmax.xlane.f32.xlu0 %v5285_v14  ;;  %v4826_v38 = vpop.f32.mrf.mxu0  ;;  %v9782_v14 = vld [vmem:[#allocation5 + $0x58] sm:$0xff] }
0x127d   :  { %v5291_v8 = vsel %vm245_vm0, %v11429_v63, -inf  ;;  %v11435_v21 = vadd.f32 %v9777_v1, %v4826_v38 }
0x127e   :  { %5292 = vmax.xlane.f32.xlu1 %v5291_v8  ;;  %v9210_v43 = vpop.f32.mrf.mxu1 }
0x127f   :  { %v11437_v4 = vadd.f32 %v9778_v13, %v9210_v43  ;;  %v5288_v54 = vsel %vm245_vm0, %v11435_v21, -inf }
0x1280   :  { %5283 = vmax.xlane.f32.xlu0 %v5282_v31  ;;  %v4911_v18 = vpop.f32.mrf.mxu1  ;;  %v9783_v31 = vld [vmem:[#allocation5 + $0x50] sm:$0xff] }
0x1281   :  { %v5297_v17 = vsel %vm245_vm0, %v11437_v4, -inf  ;;  %v11443_v41 = vadd.f32 %v9779_v24, %v4911_v18 }
0x1282   :  { %5298 = vmax.xlane.f32.xlu1 %v5297_v17  ;;  %v9217_v11 = vpop.f32.mrf.mxu0  ;;  %v9784_v17 = vld [vmem:[#allocation5 + $0x68] sm:$0xff] }
0x1283   :  { %v11445_v44 = vadd.f32 %v9780_v45, %v9217_v11  ;;  %v5294_v8 = vsel %vm245_vm0, %v11443_v41, -inf }
0x1284   :  { %5289 = vmax.xlane.f32.xlu0 %v5288_v54  ;;  %v4996_v32 = vpop.f32.mrf.mxu0  ;;  %v9785_v54 = vld [vmem:[#allocation5 + $0x60] sm:$0xff] }
0x1285   :  { %v11449_v28 = vadd.f32 %v9781_v20, %v4996_v32  ;;  %v5303_v39 = vsel %vm245_vm0, %v11445_v44, -inf }
0x1286   :  { %5304 = vmax.xlane.f32.xlu1 %v5303_v39  ;;  %v9224_v58 = vpop.f32.mrf.mxu1 }
0x1287   :  { %v11453_v38 = vadd.f32 %v9782_v14, %v9224_v58  ;;  %v5300_v1 = vsel %vm245_vm0, %v11449_v28, -inf }
0x1288   :  { %5295 = vmax.xlane.f32.xlu0 %v5294_v8  ;;  %v5081_v43 = vpop.f32.mrf.mxu1  ;;  %v9786_v8 = vld [vmem:[#allocation5 + $0x78] sm:$0xff] }
0x1289   :  { %v11459_v18 = vadd.f32 %v9783_v31, %v5081_v43  ;;  %v5309_v24 = vsel %vm245_vm0, %v11453_v38, -inf }
0x128a   :  { %5301 = vmax.xlane.f32.xlu1 %v5300_v1  ;;  %v9231_v13 = vpop.f32.mrf.mxu0  ;;  %v9787_v1 = vld [vmem:[#allocation5 + $0x70] sm:$0xff] }
0x128b   :  { %v11461_v11 = vadd.f32 %v9784_v17, %v9231_v13  ;;  %v5306_v58 = vsel %vm245_vm0, %v11459_v18, -inf }
0x128c   :  { %5310 = vmax.xlane.f32.xlu0 %v5309_v24  ;;  %v5166_v45 = vpop.f32.mrf.mxu0 }
0x128d   :  { %v11465_v32 = vadd.f32 %v9785_v54, %v5166_v45  ;;  %v5315_v20 = vsel %vm245_vm0, %v11461_v11, -inf  ;;  %v4561_v45 = vmul.f32 %v11261_v48, %v10418_v60  ;;  %v4559_v54 = vmul.f32 %v11267_v46, %v10393_v47  ;;  %v11495_v48 = vpop.permute.xlu0 %5721 }
0x128e   :  { %5316 = vmax.xlane.f32.xlu1 %v5315_v20  ;;  %v9238_v39 = vpop.f32.mrf.mxu1  ;;  %v4560_v20 = vmul.f32 %v11263_v3, %v10418_v60 }
0x128f   :  { %v11471_v43 = vadd.f32 %v9786_v8, %v9238_v39  ;;  %v5312_v31 = vsel %vm245_vm0, %v11465_v32, -inf  ;;  %v4558_v39 = vmul.f32 %v11275_v42, %v10393_v47 }
0x1290   :  { %5307 = vmax.xlane.f32.xlu0 %v5306_v58  ;;  %v5251_v14 = vpop.f32.mrf.mxu1  ;;  %v11493_v58 = vpop.permute.xlu1 %5632 }
0x1291   :  { %v11473_v13 = vadd.f32 %v9787_v1, %v5251_v14  ;;  %v5321_v24 = vsel %vm245_vm0, %v11471_v43, -inf }
0x1292   :  { %5313 = vmax.xlane.f32.xlu1 %v5312_v31 }
0x1293   :  { %v5318_v17 = vsel %vm245_vm0, %v11473_v13, -inf }
0x1294   :  { %5319 = vmax.xlane.f32.xlu0 %v5318_v17  ;;  %v11497_v14 = vpop.permute.xlu1 %5812 }
0x1296   :  { %5322 = vmax.xlane.f32.xlu1 %v5321_v24 }
0x1298   :  { %v11501_v24 = vpop.permute.xlu1 %5810 }
0x12a7   :  { %5994 = vrot.lane.b32.xlu1 %v4561_v45, %s10026_s25 }
0x12aa   :  { %5901 = vrot.lane.b32.xlu0 %v4559_v54, %s10026_s25 }
0x12ab   :  { %5992 = vrot.lane.b32.xlu1 %v4560_v20, %s10026_s25 }
0x12ae   :  { %5899 = vrot.lane.b32.xlu0 %v4558_v39, %s10026_s25 }
0x12fd   :  { %v5281_v8 = vpop.xlane.xlu0 %5280 }
0x12fe   :  { %v5325_v1 = vsub.f32 %v11417_v9, %v5281_v8 }
0x1300   :  { %v5342_v31 = vmul.f32 1.442695, %v5325_v1 }
0x1301   :  { %v5278_v3 = vpop.xlane.xlu0 %5277 }
0x1302   :  { %9620 = vpow2.f32 %v5342_v31  ;;  %v5324_v17 = vsub.f32 %v11419_v5, %v5278_v3 }
0x1304   :  { %v5340_v45 = vmul.f32 1.442695, %v5324_v17 }
0x1305   :  { %v5287_v47 = vpop.xlane.xlu0 %5286 }
0x1306   :  { %9622 = vpow2.f32 %v5340_v45  ;;  %v5327_v54 = vsub.f32 %v11423_v22, %v5287_v47 }
0x1307   :  { %v5293_v20 = vpop.xlane.xlu1 %5292 }
0x1308   :  { %v5346_v39 = vmul.f32 1.442695, %v5327_v54  ;;  %v5329_v16 = vsub.f32 %v11429_v63, %v5293_v20 }
0x1309   :  { %v5284_v34 = vpop.xlane.xlu0 %5283 }
0x130a   :  { %9624 = vpow2.f32 %v5346_v39  ;;  %v5350_v26 = vmul.f32 1.442695, %v5329_v16  ;;  %v5326_v9 = vsub.f32 %v11427_v56, %v5284_v34 }
0x130b   :  { %v5299_v8 = vpop.xlane.xlu1 %5298 }
0x130c   :  { %9626 = vpow2.f32 %v5350_v26  ;;  %v5344_v1 = vmul.f32 1.442695, %v5326_v9  ;;  %v5331_v5 = vsub.f32 %v11437_v4, %v5299_v8 }
0x130d   :  { %v5290_v31 = vpop.xlane.xlu0 %5289 }
0x130e   :  { %9628 = vpow2.f32 %v5344_v1  ;;  %v5354_v3 = vmul.f32 1.442695, %v5331_v5  ;;  %v5328_v17 = vsub.f32 %v11435_v21, %v5290_v31 }
0x130f   :  { %v11508_v22 = vpop.eup %9620  ;;  %v5305_v45 = vpop.xlane.xlu1 %5304 }
0x1310   :  { %9630 = vpow2.f32 %v5354_v3  ;;  %v5348_v63 = vmul.f32 1.442695, %v5328_v17  ;;  %v5333_v47 = vsub.f32 %v11445_v44, %v5305_v45  ;;  %v5375_v34 = vsel %vm245_vm0, %v11508_v22, 0.0 }
0x1311   :  { %v5296_v16 = vpop.xlane.xlu0 %5295  ;;  %5376 = vadd.xlane.f32.xlu0 %v5375_v34 }
0x1312   :  { %9632 = vpow2.f32 %v5348_v63  ;;  %v5330_v26 = vsub.f32 %v11443_v41, %v5296_v16  ;;  %v5358_v4 = vmul.f32 1.442695, %v5333_v47 }
0x1313   :  { %v11514_v56 = vpop.eup %9622  ;;  %v5302_v54 = vpop.xlane.xlu1 %5301 }
0x1314   :  { %v5352_v21 = vmul.f32 1.442695, %v5330_v26  ;;  %v5332_v20 = vsub.f32 %v11449_v28, %v5302_v54  ;;  %v5372_v39 = vsel %vm245_vm0, %v11514_v56, 0.0 }
0x1315   :  { %v5311_v9 = vpop.xlane.xlu0 %5310  ;;  %5373 = vadd.xlane.f32.xlu0 %v5372_v39 }
0x1316   :  { %9634 = vpow2.f32 %v5352_v21  ;;  %v5335_v44 = vsub.f32 %v11453_v38, %v5311_v9  ;;  %v5356_v41 = vmul.f32 1.442695, %v5332_v20 }
0x1317   :  { %v11520_v8 = vpop.eup %9624  ;;  %9636 = vpow2.f32 %v5358_v4  ;;  %v5317_v1 = vpop.xlane.xlu1 %5316 }
0x1318   :  { %v5362_v5 = vmul.f32 1.442695, %v5335_v44  ;;  %v5337_v31 = vsub.f32 %v11461_v11, %v5317_v1  ;;  %v5381_v3 = vsel %vm245_vm0, %v11520_v8, 0.0 }
0x1319   :  { %v11525_v28 = vpop.eup %9626  ;;  %v5308_v17 = vpop.xlane.xlu0 %5307  ;;  %5382 = vadd.xlane.f32.xlu0 %v5381_v3 }
0x131a   :  { %9638 = vpow2.f32 %v5362_v5  ;;  %v5334_v45 = vsub.f32 %v11459_v18, %v5308_v17  ;;  %v5387_v38 = vsel %vm245_vm0, %v11525_v28, 0.0  ;;  %v5366_v47 = vmul.f32 1.442695, %v5337_v31 }
0x131b   :  { %v11530_v63 = vpop.eup %9628  ;;  %5388 = vadd.xlane.f32.xlu1 %v5387_v38  ;;  %v5314_v34 = vpop.xlane.xlu1 %5313  ;;  %9640 = vpow2.f32 %v5356_v41 }
0x131c   :  { %v5360_v11 = vmul.f32 1.442695, %v5334_v45  ;;  %v5336_v16 = vsub.f32 %v11465_v32, %v5314_v34  ;;  %v5378_v26 = vsel %vm245_vm0, %v11530_v63, 0.0 }
0x131d   :  { %v11535_v4 = vpop.eup %9630  ;;  %5379 = vadd.xlane.f32.xlu0 %v5378_v26  ;;  %v5320_v54 = vpop.xlane.xlu0 %5319 }
0x131e   :  { %9642 = vpow2.f32 %v5360_v11  ;;  %v5338_v18 = vsub.f32 %v11473_v13, %v5320_v54  ;;  %v5393_v21 = vsel %vm245_vm0, %v11535_v4, 0.0  ;;  %v5364_v9 = vmul.f32 1.442695, %v5336_v16 }
0x131f   :  { %v11540_v20 = vpop.eup %9632  ;;  %9644 = vpow2.f32 %v5366_v47  ;;  %5394 = vadd.xlane.f32.xlu1 %v5393_v21  ;;  %v5323_v39 = vpop.xlane.xlu1 %5322 }
0x1320   :  { %v5368_v32 = vmul.f32 1.442695, %v5338_v18  ;;  %v5339_v44 = vsub.f32 %v11471_v43, %v5323_v39  ;;  %v5384_v1 = vsel %vm245_vm0, %v11540_v20, 0.0 }
0x1321   :  { %5385 = vadd.xlane.f32.xlu0 %v5384_v1  ;;  %v11587_v1 = vpop.permute.xlu0 %5901 }
0x1322   :  { %9646 = vpow2.f32 %v5368_v32  ;;  %v5370_v5 = vmul.f32 1.442695, %v5339_v44  ;;  %v4563_v32 = vmul.f32 %v11267_v46, %v10418_v60  ;;  %v4562_v44 = vmul.f32 %v11275_v42, %v10418_v60 }
0x1323   :  { %v11545_v41 = vpop.eup %9634  ;;  %9648 = vpow2.f32 %v5364_v9 }
0x1324   :  { %v11547_v13 = vpop.eup %9636  ;;  %v5390_v31 = vsel %vm245_vm0, %v11545_v41, 0.0  ;;  %9650 = vpow2.f32 %v5370_v5 }
0x1325   :  { %5391 = vadd.xlane.f32.xlu1 %v5390_v31  ;;  %v5399_v17 = vsel %vm245_vm0, %v11547_v13, 0.0  ;;  %v11589_v5 = vpop.permute.xlu0 %5899  ;;  %v11591_v31 = vpop.permute.xlu1 %5994 }
0x1327   :  { %v11551_v3 = vpop.eup %9638 }
0x1328   :  { %v5405_v43 = vsel %vm245_vm0, %v11551_v3, 0.0  ;;  %v11557_v45 = vpop.eup %9640 }
0x1329   :  { %5406 = vadd.xlane.f32.xlu0 %v5405_v43  ;;  %5400 = vadd.xlane.f32.xlu1 %v5399_v17  ;;  %v5396_v11 = vsel %vm245_vm0, %v11557_v45, 0.0 }
0x132b   :  { %v11559_v38 = vpop.eup %9642 }
0x132c   :  { %v11561_v47 = vpop.eup %9644  ;;  %v5402_v34 = vsel %vm245_vm0, %v11559_v38, 0.0 }
0x132d   :  { %5403 = vadd.xlane.f32.xlu0 %v5402_v34  ;;  %5397 = vadd.xlane.f32.xlu1 %v5396_v11  ;;  %v5411_v54 = vsel %vm245_vm0, %v11561_v47, 0.0  ;;  %v11593_v34 = vpop.permute.xlu1 %5992 }
0x132f   :  { %v11567_v16 = vpop.eup %9646 }
0x1330   :  { %v5414_v26 = vsel %vm245_vm0, %v11567_v16, 0.0  ;;  %v11573_v18 = vpop.eup %9648 }
0x1331   :  { %5415 = vadd.xlane.f32.xlu0 %v5414_v26  ;;  %5412 = vadd.xlane.f32.xlu1 %v5411_v54  ;;  %v5408_v21 = vsel %vm245_vm0, %v11573_v18, 0.0  ;;  %v11577_v39 = vpop.eup %9650 }
0x1332   :  { %v5417_v9 = vsel %vm245_vm0, %v11577_v39, 0.0 }
0x1335   :  { %5409 = vadd.xlane.f32.xlu1 %v5408_v21 }
0x1339   :  { %5418 = vadd.xlane.f32.xlu1 %v5417_v9 }
0x1347   :  { %6083 = vrot.lane.b32.xlu0 %v4563_v32, %s10026_s25 }
0x134a   :  { %6081 = vrot.lane.b32.xlu1 %v4562_v44, %s10026_s25 }
0x139a   :  { %v5377_v43 = vpop.xlane.xlu0 %5376 }
0x139e   :  { %v5374_v17 = vpop.xlane.xlu0 %5373 }
0x139f   :  { %9652 = vrcp.f32 %v5374_v17 }
0x13a2   :  { %v5383_v11 = vpop.xlane.xlu0 %5382 }
0x13a4   :  { %v5389_v26 = vpop.xlane.xlu1 %5388 }
0x13a5   :  { %9654 = vrcp.f32 %v5389_v26 }
0x13a6   :  { %v5380_v46 = vpop.xlane.xlu0 %5379 }
0x13a8   :  { %v5395_v54 = vpop.xlane.xlu1 %5394 }
0x13aa   :  { %v5386_v21 = vpop.xlane.xlu0 %5385 }
0x13ab   :  { %9656 = vrcp.f32 %v5386_v21 }
0x13ac   :  { %9658 = vrcp.f32 %v5377_v43  ;;  %v9653_v32 = vpop.eup %9652 }
0x13ad   :  { %9660 = vrcp.f32 %v5395_v54 }
0x13ae   :  { %v5392_v60 = vpop.xlane.xlu1 %5391 }
0x13af   :  { %9662 = vrcp.f32 %v5392_v60 }
0x13b0   :  { %9664 = vrcp.f32 %v5380_v46 }
0x13b1   :  { %9666 = vrcp.f32 %v5383_v11  ;;  %v5436_v11 = vmul.f32 %v9653_v32, %v11514_v56 }
0x13b2   :  { %v5407_v42 = vpop.xlane.xlu0 %5406  ;;  %v5401_v9 = vpop.xlane.xlu1 %5400 }
0x13b3   :  { %9668 = vrcp.f32 %v5407_v42  ;;  %v9655_v50 = vpop.eup %9654 }
0x13b4   :  { %9670 = vrcp.f32 %v5401_v9  ;;  %v5441_v60 = vmul.f32 %v9655_v50, %v11525_v28 }
0x13b6   :  { %v5404_v44 = vpop.xlane.xlu0 %5403  ;;  %v5398_v19 = vpop.xlane.xlu1 %5397 }
0x13b7   :  { %9672 = vrcp.f32 %v5404_v44 }
0x13b8   :  { %v9657_v17 = vpop.eup %9656  ;;  %9674 = vrcp.f32 %v5398_v19 }
0x13b9   :  { %v5440_v26 = vmul.f32 %v9657_v17, %v11540_v20  ;;  %v9659_v21 = vpop.eup %9658  ;;  %v9789_v17 = vld [vmem:[#allocation10 + $0x8] sm:$0xff] }
0x13ba   :  { %v5416_v43 = vpop.xlane.xlu0 %5415  ;;  %v5413_v54 = vpop.xlane.xlu1 %5412  ;;  %v5437_v56 = vmul.f32 %v9659_v21, %v11508_v22 }
0x13bb   :  { %v9661_v46 = vpop.eup %9660  ;;  %9676 = vrcp.f32 %v5416_v43  ;;  %9243 = vmatprep.mubr.msk.f32.mxu0 %vm245_vm0, %v5440_v26 }
0x13bc   :  { %v9663_v42 = vpop.eup %9662  ;;  %9244 = vmatmul.mubr.msk.f32.vlgmr.msra.gmra.mxu0 %vm245_vm0, %v5441_v60  ;;  %9678 = vrcp.f32 %v5413_v54  ;;  %v5443_v28 = vmul.f32 %v9661_v46, %v11535_v4 }
0x13bd   :  { %9254 = vmatpush3.msra.mxu0 %v11413_v33  ;;  %9257 = vmatprep.mubr.msk.f32.mxu0 %vm245_vm0, %v5436_v11  ;;  %v5442_v19 = vmul.f32 %v9663_v42, %v11545_v41  ;;  %v9665_v20 = vpop.eup %9664 }
0x13be   :  { %9255 = vmatprep.subr.mxu0 %v11493_v58  ;;  %v5410_v50 = vpop.xlane.xlu1 %5409  ;;  %v9667_v33 = vpop.eup %9666  ;;  %v5438_v41 = vmul.f32 %v9665_v20, %v11530_v63 }
0x13bf   :  { %9256 = vmatpush3.msra.mxu0 %v11493_v58  ;;  %9680 = vrcp.f32 %v5410_v50  ;;  %9250 = vmatprep.mubr.msk.f32.mxu1 %vm245_vm0, %v5442_v19  ;;  %v6084_v44 = vpop.permute.xlu0 %6083 }
0x13c0   :  { %9267 = vmatprep.subr.mxu0 %v11497_v14  ;;  %9251 = vmatmul.mubr.msk.f32.vlgmr.msra.gmra.mxu1 %vm245_vm0, %v5443_v28  ;;  %v9669_v9 = vpop.eup %9668 }
0x13c1   :  { %9258 = vmatmul.mubr.msk.f32.vlgmr.msra.gmra.mxu0 %vm245_vm0, %v5437_v56  ;;  %9261 = vmatpush3.msra.mxu1 %v11410_v10  ;;  %v9671_v4 = vpop.eup %9670  ;;  %v5439_v10 = vmul.f32 %v9667_v33, %v11520_v8  ;;  %v5447_v8 = vmul.f32 %v9669_v9, %v11551_v3 }
0x13c2   :  { %9268 = vmatpush3.msra.mxu0 %v11497_v14  ;;  %9262 = vmatprep.subr.mxu1 %v11495_v48  ;;  %v5419_v58 = vpop.xlane.xlu1 %5418 }
0x13c3   :  { %9264 = vmatprep.mubr.msk.f32.mxu1 %vm245_vm0, %v5438_v41  ;;  %9269 = vmatprep.subr.mxu0 %v11501_v24  ;;  %9682 = vrcp.f32 %v5419_v58 }
0x13c4   :  { %v9673_v22 = vpop.eup %9672  ;;  %9263 = vmatpush3.msra.mxu1 %v11495_v48  ;;  %9270 = vmatpush3.msra.mxu0 %v11501_v24  ;;  %v5445_v48 = vmul.f32 %v9671_v4, %v11547_v13 }
0x13c5   :  { %v9675_v63 = vpop.eup %9674  ;;  %9274 = vmatprep.subr.mxu1 %v11587_v1  ;;  %9281 = vmatprep.subr.mxu0 %v11591_v31  ;;  %v5446_v14 = vmul.f32 %v9673_v22, %v11559_v38 }
0x13c6   :  { %9265 = vmatmul.mubr.msk.f32.vlgmr.msra.gmra.mxu1 %vm245_vm0, %v5439_v10  ;;  %v5444_v32 = vmul.f32 %v9675_v63, %v11557_v45 }
0x13c7   :  { %9275 = vmatpush3.msra.mxu1 %v11587_v1  ;;  %9278 = vmatprep.mubr.msk.f32.mxu1 %vm245_vm0, %v5446_v14  ;;  %v6082_v1 = vpop.permute.xlu1 %6081 }
0x13c8   :  { %v9677_v24 = vpop.eup %9676  ;;  %9276 = vmatprep.subr.mxu1 %v11589_v5  ;;  %9271 = vmatprep.mubr.msk.f32.mxu0 %vm245_vm0, %v5444_v32 }
0x13c9   :  { %9277 = vmatpush3.msra.mxu1 %v11589_v5  ;;  %9272 = vmatmul.mubr.msk.f32.vlgmr.msra.gmra.mxu0 %vm245_vm0, %v5445_v48  ;;  %v5450_v45 = vmul.f32 %v9677_v24, %v11567_v16  ;;  %v9679_v38 = vpop.eup %9678  ;;  %v9788_v5 = vld [vmem:[#allocation8 + $0x8] sm:$0xff] }
0x13ca   :  { %9288 = vmatprep.subr.mxu1 %v6084_v44  ;;  %9279 = vmatmul.mubr.msk.f32.vlgmr.msra.gmra.mxu1 %vm245_vm0, %v5447_v8  ;;  %v5449_v16 = vmul.f32 %v9679_v38, %v11561_v47  ;;  %v9791_v47 = vld [vmem:[#allocation10] sm:$0xff]  ;;  %v9792_v38 = vld [vmem:[%s12066_s8] ss:$0 sm:$0xff] }
0x13cb   :  { %9282 = vmatpush3.msra.mxu0 %v11591_v31  ;;  %9289 = vmatpush3.msra.mxu1 %v6084_v44 }
0x13cc   :  { %v9681_v13 = vpop.eup %9680  ;;  %9283 = vmatprep.subr.mxu0 %v11593_v34  ;;  %9290 = vmatprep.subr.mxu1 %v6082_v1 }
0x13cd   :  { %9284 = vmatpush3.msra.mxu0 %v11593_v34  ;;  %9291 = vmatpush3.msra.mxu1 %v6082_v1  ;;  %v5448_v3 = vmul.f32 %v9681_v13, %v11573_v18  ;;  %v9790_v34 = vld [vmem:[#allocation8] sm:$0xff] }
0x13ce   :  { %9292 = vmatprep.mubr.msk.f32.mxu1 %vm245_vm0, %v5450_v45  ;;  %9295 = vmatprep.subr.mxu0 %v9788_v5 }
0x13cf   :  { %9285 = vmatprep.mubr.msk.f32.mxu0 %vm245_vm0, %v5448_v3  ;;  %9305 = vmatprep.subr.mxu1 %v9789_v17 }
0x13d0   :  { %v9683_v31 = vpop.eup %9682  ;;  %9286 = vmatmul.mubr.msk.f32.vlgmr.msra.gmra.mxu0 %vm245_vm0, %v5449_v16 }
0x13d1   :  { %9296 = vmatpush3.msra.mxu0 %v9788_v5  ;;  %v5451_v26 = vmul.f32 %v9683_v31, %v11577_v39 }
0x13d2   :  { %9297 = vmatprep.subr.mxu0 %v9790_v34 }
0x13d3   :  { %9298 = vmatpush3.msra.mxu0 %v9790_v34  ;;  %9293 = vmatmul.mubr.msk.f32.vlgmr.msra.gmra.mxu1 %vm245_vm0, %v5451_v26 }
0x13d4   :  { %9306 = vmatpush3.msra.mxu1 %v9789_v17  ;;  %9315 = vmatprep.subr.msk.mxu0 %vm245_vm0, %v10664_v51 }
0x13d5   :  { %9307 = vmatprep.subr.mxu1 %v9791_v47 }
0x13d6   :  { %9308 = vmatpush3.msra.mxu1 %v9791_v47 }
0x13d7   :  { %9322 = vmatprep.subr.msk.mxu1 %vm245_vm0, %v10676_v23 }
0x147c   :  { %v9245_v18 = vpop.f32.mrf.mxu0 }
0x147e   :  { %v5532_v21 = vpop.f32.mrf.mxu0 }
0x1480   :  { %v9252_v43 = vpop.f32.mrf.mxu1 }
0x1481   :  { %v9259_v39 = vpop.f32.mrf.mxu0 }
0x1482   :  { %v5621_v54 = vpop.f32.mrf.mxu1  ;;  %v5716_v28 = vadd.f32 %v9259_v39, %v9245_v18 }
0x1483   :  { %v5710_v46 = vpop.f32.mrf.mxu0 }
0x1484   :  { %v5711_v50 = vadd.f32 %v5710_v46, %v5532_v21 }
0x1486   :  { %v9266_v60 = vpop.f32.mrf.mxu1 }
0x1487   :  { %v5805_v63 = vadd.f32 %v9266_v60, %v9252_v43 }
0x1488   :  { %v5799_v11 = vpop.f32.mrf.mxu1 }
0x1489   :  { %v9273_v42 = vpop.f32.mrf.mxu0  ;;  %v5800_v9 = vadd.f32 %v5799_v11, %v5621_v54 }
0x148a   :  { %v9280_v19 = vpop.f32.mrf.mxu1  ;;  %v5987_v58 = vadd.f32 %v9273_v42, %v5716_v28 }
0x148b   :  { %v5888_v20 = vpop.f32.mrf.mxu0  ;;  %v5989_v24 = vadd.f32 %v9280_v19, %v5805_v63 }
0x148c   :  { %v5986_v33 = vadd.f32 %v5888_v20, %v5711_v50  ;;  %v5977_v41 = vpop.f32.mrf.mxu1 }
0x148d   :  { %v5988_v14 = vadd.f32 %v5977_v41, %v5800_v9 }
0x1490   :  { %v9287_v56 = vpop.f32.mrf.mxu0 }
0x1491   :  { %v6169_v32 = vadd.f32 %v9287_v56, %v5987_v58 }
0x1492   :  { %v6070_v4 = vpop.f32.mrf.mxu0 }
0x1493   :  { %v6168_v22 = vadd.f32 %v6070_v4, %v5986_v33  ;;  %v9294_v10 = vpop.f32.mrf.mxu1 }
0x1494   :  { %v6171_v44 = vadd.f32 %v9294_v10, %v5989_v24 }
0x1495   :  { %v6159_v48 = vpop.f32.mrf.mxu1  ;;  %9299 = vmatprep.mubr.msk.f32.mxu0 %vm245_vm0, %v6168_v22 }
0x1496   :  { %v6170_v8 = vadd.f32 %v6159_v48, %v5988_v14  ;;  %9300 = vmatmul.mubr.msk.f32.vlgmr.msra.gmra.mxu0 %vm245_vm0, %v6169_v32 }
0x1497   :  { %9316 = vmatpush3.xpose.msk.msra.mxu0 %vm245_vm0, %v10664_v51 }
0x1498   :  { %9317 = vmatprep.subr.msk.mxu0 %vm245_vm0, %v10684_v2  ;;  %9302 = vmatprep.mubr.msk.f32.mxu0 %vm245_vm0, %v6170_v8 }
0x149a   :  { %9303 = vmatmul.mubr.msk.f32.gmra.mxu0 %vm245_vm0, %v6171_v44 }
0x149b   :  { %9318 = vmatpush3.xpose.msk.msra.mxu0 %vm245_vm0, %v10684_v2 }
0x149c   :  { %9329 = vmatprep.subr.msk.mxu0 %vm245_vm0, %v10697_v29 }
0x1556   :  { %v9301_v45 = vpop.f32.mrf.mxu0 }
0x1557   :  { %v6256_v51 = vadd.f32 %v9792_v38, %v9301_v45 }
0x1558   :  { %v6250_v1 = vpop.f32.mrf.mxu0 }
0x1559   :  { %v6251_v13 = vadd.f32 %v9792_v38, %v6250_v1  ;;  %v11665_v5 = vadd.f32 %v6256_v51, %v11227_v27 }
0x155a   :  { %v9304_v3 = vpop.f32.mrf.mxu0 }
0x155b   :  { %v6266_v16 = vadd.f32 %v9792_v38, %v9304_v3  ;;  %v11668_v31 = vadd.f32 %v6251_v13, %v11230_v52  ;;  %v6278_v47 = vsel %vm245_vm0, %v11665_v5, 0.0  ;;  %v9793_v13 = vld [vmem:[%s12068_s10] ss:$0 sm:$0xff] }
0x155c   :  { %v6260_v17 = vpop.f32.mrf.mxu0 }
0x155d   :  { %v11671_v2 = vadd.f32 %v6266_v16, %v11233_v25  ;;  %v6261_v26 = vadd.f32 %v9792_v38, %v6260_v17  ;;  %v6273_v21 = vsel %vm245_vm0, %v11668_v31, 0.0 }
0x155f   :  { %v11674_v34 = vadd.f32 %v6261_v26, %v11236_v35  ;;  %v6279_v18 = vsel %vm245_vm0, %v11671_v2, 0.0 }
0x1560   :  { %v6280_v27 = vadd.f32 %v6279_v18, %v6278_v47 }
0x1561   :  { %v6274_v52 = vsel %vm245_vm0, %v11674_v34, 0.0 }
0x1562   :  { %6281 = vadd.xlane.f32.xlu1 %v6280_v27  ;;  %v6275_v25 = vadd.f32 %v6274_v52, %v6273_v21 }
0x1564   :  { %6276 = vadd.xlane.f32.xlu0 %v6275_v25 }
0x15eb   :  { %v6282_v43 = vpop.xlane.xlu1 %6281 }
0x15ec   :  { %v6284_v54 = vmul.f32 0.03125, %v6282_v43 }
0x15ed   :  { %v6277_v35 = vpop.xlane.xlu0 %6276 }
0x15ee   :  { %v6286_v39 = vsub.f32 %v11665_v5, %v6284_v54  ;;  %v6288_v60 = vsub.f32 %v11671_v2, %v6284_v54  ;;  %v6283_v46 = vmul.f32 0.03125, %v6277_v35  ;;  %v9795_v54 = vld [vmem:[#allocation7] sm:$0xff] }
0x15f0   :  { %v6285_v11 = vsub.f32 %v11668_v31, %v6283_v46  ;;  %v6287_v42 = vsub.f32 %v11674_v34, %v6283_v46  ;;  %v6290_v19 = vmul.f32 %v6286_v39, %v6286_v39  ;;  %v6292_v20 = vmul.f32 %v6288_v60, %v6288_v60 }
0x15f2   :  { %v6289_v50 = vmul.f32 %v6285_v11, %v6285_v11  ;;  %v6291_v28 = vmul.f32 %v6287_v42, %v6287_v42  ;;  %v6298_v9 = vsel %vm245_vm0, %v6290_v19, 0.0  ;;  %v6299_v58 = vsel %vm245_vm0, %v6292_v20, 0.0 }
0x15f3   :  { %v6300_v4 = vadd.f32 %v6299_v58, %v6298_v9 }
0x15f4   :  { %v6293_v56 = vsel %vm245_vm0, %v6289_v50, 0.0  ;;  %v6294_v33 = vsel %vm245_vm0, %v6291_v28, 0.0  ;;  %v9797_v50 = vld [vmem:[#allocation7 + $0x28] sm:$0xff] }
0x15f5   :  { %v6295_v41 = vadd.f32 %v6294_v33, %v6293_v56  ;;  %v9798_v33 = vld [vmem:[#allocation7 + $0x20] sm:$0xff] }
0x15f7   :  { %6296 = vadd.xlane.f32.xlu0 %v6295_v41 }
0x15fb   :  { %6301 = vadd.xlane.f32.xlu0 %v6300_v4 }
0x1680   :  { %v6297_v22 = vpop.xlane.xlu0 %6296 }
0x1681   :  { %v6303_v10 = vmul.f32 0.03125, %v6297_v22  ;;  %v9799_v22 = vld [vmem:[#allocation7 + $0x38] sm:$0xff] }
0x1683   :  { %v6305_v63 = vadd.f32 1e-05, %v6303_v10 }
0x1684   :  { %v6302_v14 = vpop.xlane.xlu0 %6301 }
0x1685   :  { %9684 = vrsqrt.f32 %v6305_v63  ;;  %v6304_v32 = vmul.f32 0.03125, %v6302_v14  ;;  %v9800_v14 = vld [vmem:[#allocation7 + $0x18] sm:$0xff] }
0x1687   :  { %v6306_v48 = vadd.f32 1e-05, %v6304_v32 }
0x1689   :  { %9686 = vrsqrt.f32 %v6306_v48  ;;  %v9801_v48 = vld [vmem:[#allocation7 + $0x30] sm:$0xff] }
0x1692   :  { %v9685_v24 = vpop.eup %9684 }
0x1693   :  { %v6309_v8 = vmul.f32 %v9685_v24, %v6285_v11  ;;  %v6311_v38 = vmul.f32 %v9685_v24, %v6287_v42  ;;  %v9796_v11 = vld [vmem:[#allocation7 + $0x10] sm:$0xff] }
0x1695   :  { %9309 = vmatprep.mubr.msk.f32.mxu1 %vm245_vm0, %v6309_v8 }
0x1696   :  { %v9687_v44 = vpop.eup %9686 }
0x1697   :  { %v6310_v45 = vmul.f32 %v9687_v44, %v6286_v39  ;;  %v6312_v51 = vmul.f32 %v9687_v44, %v6288_v60 }
0x1699   :  { %9310 = vmatmul.mubr.msk.f32.vlgmr.msra.gmra.mxu1 %vm245_vm0, %v6310_v45 }
0x169a   :  { %9323 = vmatpush3.xpose.msk.msra.mxu1 %vm245_vm0, %v10676_v23  ;;  %9312 = vmatprep.mubr.msk.f32.mxu1 %vm245_vm0, %v6311_v38  ;;  %v9802_v38 = vld [vmem:[#allocation7 + $0x48] sm:$0xff] }
0x169b   :  { %9324 = vmatprep.subr.msk.mxu1 %vm245_vm0, %v10778_v0 }
0x169d   :  { %9313 = vmatmul.mubr.msk.f32.gmra.mxu1 %vm245_vm0, %v6312_v51 }
0x169e   :  { %9325 = vmatpush3.xpose.msk.msra.mxu1 %vm245_vm0, %v10778_v0 }
0x169f   :  { %9336 = vmatprep.subr.msk.mxu1 %vm245_vm0, %v10788_v53 }
0x1759   :  { %v9311_v1 = vpop.f32.mrf.mxu1 }
0x175a   :  { %v6397_v23 = vadd.f32 %v9793_v13, %v9311_v1 }
0x175b   :  { %v6391_v3 = vpop.f32.mrf.mxu1 }
0x175c   :  { %v6392_v16 = vadd.f32 %v9793_v13, %v6391_v3  ;;  %v6411_v47 = vmul.f32 0.5, %v6397_v23 }
0x175d   :  { %v9314_v17 = vpop.f32.mrf.mxu1 }
0x175e   :  { %v6410_v26 = vmul.f32 0.5, %v6392_v16  ;;  %v6407_v18 = vadd.f32 %v9793_v13, %v9314_v17  ;;  %v9803_v16 = vld [vmem:[#allocation7 + $0x58] sm:$0xff] }
0x175f   :  { %v6401_v27 = vpop.f32.mrf.mxu1 }
0x1760   :  { %v6402_v21 = vadd.f32 %v9793_v13, %v6401_v27  ;;  %9319 = vmatprep.mubr.msk.f32.mxu0 %vm245_vm0, %v6410_v26  ;;  %v6413_v52 = vmul.f32 0.5, %v6407_v18  ;;  %v9805_v27 = vld [vmem:[#allocation7 + $0x50] sm:$0xff] }
0x1761   :  { %9320 = vmatmul.mubr.msk.f32.vlgmr.msra.gmra.mxu0 %vm245_vm0, %v6411_v47 }
0x1762   :  { %v6412_v0 = vmul.f32 0.5, %v6402_v21  ;;  %9330 = vmatpush3.xpose.msk.msra.mxu0 %vm245_vm0, %v10697_v29  ;;  %9333 = vmatprep.mubr.msk.f32.mxu0 %vm245_vm0, %v6410_v26  ;;  %v12123_v29 = vld [vmem:[#allocation24_spill] sm:$0xff] }
0x1763   :  { %9331 = vmatprep.subr.msk.mxu0 %vm245_vm0, %v10801_v37 }
0x1764   :  { %9326 = vmatprep.mubr.msk.f32.mxu1 %vm245_vm0, %v6412_v0 }
0x1765   :  { %9327 = vmatmul.mubr.msk.f32.vlgmr.msra.gmra.mxu1 %vm245_vm0, %v6413_v52 }
0x1766   :  { %9332 = vmatpush3.xpose.msk.msra.mxu0 %vm245_vm0, %v10801_v37  ;;  %9337 = vmatpush3.xpose.msk.msra.mxu1 %vm245_vm0, %v10788_v53  ;;  %v12124_v53 = vld [vmem:[#allocation25_spill] sm:$0xff]  ;;  %v12125_v37 = vld [vmem:[#allocation27_spill] sm:$0xff] }
0x1767   :  { %9338 = vmatprep.subr.msk.mxu1 %vm245_vm0, %v10812_v59  ;;  %9340 = vmatprep.mubr.msk.f32.mxu1 %vm245_vm0, %v6412_v0 }
0x1768   :  { %9343 = vmatprep.subr.msk.mxu0 %vm245_vm0, %v10822_v49 }
0x1769   :  { %9334 = vmatmul.mubr.msk.f32.vlgmr.msra.gmra.mxu0 %vm245_vm0, %v6411_v47 }
0x176a   :  { %9339 = vmatpush3.xpose.msk.msra.mxu1 %vm245_vm0, %v10812_v59  ;;  %9344 = vmatpush3.xpose.msk.msra.mxu0 %vm245_vm0, %v10822_v49  ;;  %v12126_v59 = vld [vmem:[#allocation26_spill] sm:$0xff]  ;;  %v12127_v49 = vld [vmem:[#allocation23_spill] sm:$0xff] }
0x176b   :  { %9347 = vmatprep.mubr.msk.f32.mxu0 %vm245_vm0, %v6410_v26  ;;  %9345 = vmatprep.subr.msk.mxu0 %vm245_vm0, %v10831_v30 }
0x176c   :  { %9350 = vmatprep.subr.msk.mxu1 %vm245_vm0, %v10838_v61 }
0x176d   :  { %9341 = vmatmul.mubr.msk.f32.vlgmr.msra.gmra.mxu1 %vm245_vm0, %v6413_v52 }
0x176e   :  { %9346 = vmatpush3.xpose.msk.msra.mxu0 %vm245_vm0, %v10831_v30  ;;  %9351 = vmatpush3.xpose.msk.msra.mxu1 %vm245_vm0, %v10838_v61  ;;  %v12128_v30 = vld [vmem:[#allocation28_spill] sm:$0xff]  ;;  %v12129_v61 = vld [vmem:[#allocation29_spill] sm:$0xff] }
0x176f   :  { %9354 = vmatprep.mubr.msk.f32.mxu1 %vm245_vm0, %v6412_v0  ;;  %9352 = vmatprep.subr.msk.mxu1 %vm245_vm0, %v10847_v57 }
0x1770   :  { %9357 = vmatprep.subr.msk.mxu0 %vm245_vm0, %v10857_v62 }
0x1771   :  { %9348 = vmatmul.mubr.msk.f32.vlgmr.msra.gmra.mxu0 %vm245_vm0, %v6411_v47 }
0x1772   :  { %9353 = vmatpush3.xpose.msk.msra.mxu1 %vm245_vm0, %v10847_v57  ;;  %9358 = vmatpush3.xpose.msk.msra.mxu0 %vm245_vm0, %v10857_v62  ;;  %v9794_v62 = vld [vmem:[#allocation7 + $0x8] sm:$0xff] }
0x1773   :  { %9361 = vmatprep.mubr.msk.f32.mxu0 %vm245_vm0, %v6410_v26  ;;  %9359 = vmatprep.subr.msk.mxu0 %vm245_vm0, %v12123_v29 }
0x1774   :  { %9364 = vmatprep.subr.msk.mxu1 %vm245_vm0, %v12124_v53 }
0x1775   :  { %9355 = vmatmul.mubr.msk.f32.vlgmr.msra.gmra.mxu1 %vm245_vm0, %v6413_v52 }
0x1776   :  { %9360 = vmatpush3.xpose.msk.msra.mxu0 %vm245_vm0, %v12123_v29  ;;  %9365 = vmatpush3.xpose.msk.msra.mxu1 %vm245_vm0, %v12124_v53 }
0x1777   :  { %9368 = vmatprep.mubr.msk.f32.mxu1 %vm245_vm0, %v6412_v0  ;;  %9366 = vmatprep.subr.msk.mxu1 %vm245_vm0, %v12125_v37 }
0x1778   :  { %9371 = vmatprep.subr.mxu0 %v12126_v59 }
0x1779   :  { %9362 = vmatmul.mubr.msk.f32.vlgmr.msra.gmra.mxu0 %vm245_vm0, %v6411_v47  ;;  %v9804_v47 = vld [vmem:[#allocation7 + $0x40] sm:$0xff] }
0x177a   :  { %9367 = vmatpush3.xpose.msk.msra.mxu1 %vm245_vm0, %v12125_v37  ;;  %9372 = vmatpush3.msra.mxu0 %v12126_v59  ;;  %v9806_v37 = vld [vmem:[#allocation7 + $0x60] sm:$0xff] }
0x177b   :  { %9373 = vmatprep.subr.mxu0 %v12127_v49  ;;  %9378 = vmatprep.subr.mxu1 %v12128_v30 }
0x177c   :  { %9374 = vmatpush3.msra.mxu0 %v12127_v49 }
0x177d   :  { %9369 = vmatmul.mubr.msk.f32.vlgmr.msra.gmra.mxu1 %vm245_vm0, %v6413_v52  ;;  %9385 = vmatprep.subr.mxu0 %v10906_v12 }
0x177e   :  { %9379 = vmatpush3.msra.mxu1 %v12128_v30 }
0x177f   :  { %9380 = vmatprep.subr.mxu1 %v12129_v61 }
0x1780   :  { %9381 = vmatpush3.msra.mxu1 %v12129_v61 }
0x1781   :  { %9392 = vmatprep.subr.mxu1 %v10913_v40 }
0x1821   :  { %v9321_v57 = vpop.f32.mrf.mxu0 }
0x1822   :  { %v11777_v25 = vadd.f32 %v9794_v62, %v9321_v57  ;;  %v9807_v62 = vld [vmem:[#allocation7 + $0x68] sm:$0xff] }
0x1823   :  { %v6486_v43 = vpop.f32.mrf.mxu0 }
0x1824   :  { %v11779_v35 = vadd.f32 %v9795_v54, %v6486_v43  ;;  %v7045_v39 = vsel %vm245_vm0, %v11777_v25, -inf  ;;  %v9808_v54 = vld [vmem:[#allocation7 + $0x70] sm:$0xff] }
0x1825   :  { %v9328_v60 = vpop.f32.mrf.mxu1  ;;  %7046 = vmax.xlane.f32.xlu0 %v7045_v39 }
0x1826   :  { %v7042_v19 = vsel %vm245_vm0, %v11779_v35, -inf  ;;  %v11797_v32 = vadd.f32 %v9800_v14, %v9328_v60 }
0x1827   :  { %v6567_v46 = vpop.f32.mrf.mxu1 }
0x1828   :  { %v11783_v42 = vadd.f32 %v9796_v11, %v6567_v46  ;;  %v7051_v13 = vsel %vm245_vm0, %v11797_v32, -inf  ;;  %v9809_v11 = vld [vmem:[#allocation7 + $0x78] sm:$0xff] }
0x1829   :  { %v9335_v20 = vpop.f32.mrf.mxu0  ;;  %7043 = vmax.xlane.f32.xlu0 %v7042_v19 }
0x182a   :  { %v11787_v28 = vadd.f32 %v9797_v50, %v9335_v20  ;;  %v7048_v58 = vsel %vm245_vm0, %v11783_v42, -inf }
0x182b   :  { %v6642_v56 = vpop.f32.mrf.mxu0 }
0x182c   :  { %v11789_v41 = vadd.f32 %v9798_v33, %v6642_v56  ;;  %v7057_v9 = vsel %vm245_vm0, %v11787_v28, -inf }
0x182d   :  { %v9342_v4 = vpop.f32.mrf.mxu1  ;;  %7058 = vmax.xlane.f32.xlu1 %v7057_v9  ;;  %7049 = vmax.xlane.f32.xlu0 %v7048_v58 }
0x182e   :  { %v11795_v10 = vadd.f32 %v9799_v22, %v9342_v4  ;;  %v7054_v44 = vsel %vm245_vm0, %v11789_v41, -inf }
0x182f   :  { %v6717_v63 = vpop.f32.mrf.mxu1 }
0x1830   :  { %v11799_v24 = vadd.f32 %v9801_v48, %v6717_v63  ;;  %v7063_v8 = vsel %vm245_vm0, %v11795_v10, -inf }
0x1831   :  { %7064 = vmax.xlane.f32.xlu1 %v7063_v8  ;;  %v9349_v45 = vpop.f32.mrf.mxu0  ;;  %7055 = vmax.xlane.f32.xlu0 %v7054_v44 }
0x1832   :  { %v11805_v51 = vadd.f32 %v9802_v38, %v9349_v45  ;;  %v7060_v1 = vsel %vm245_vm0, %v11799_v24, -inf }
0x1833   :  { %v6792_v23 = vpop.f32.mrf.mxu0 }
0x1834   :  { %v11813_v18 = vadd.f32 %v9804_v47, %v6792_v23  ;;  %v7069_v0 = vsel %vm245_vm0, %v11805_v51, -inf }
0x1835   :  { %v9356_v3 = vpop.f32.mrf.mxu1  ;;  %7061 = vmax.xlane.f32.xlu1 %v7060_v1  ;;  %7052 = vmax.xlane.f32.xlu0 %v7051_v13 }
0x1836   :  { %v11811_v17 = vadd.f32 %v9803_v16, %v9356_v3  ;;  %v7066_v49 = vsel %vm245_vm0, %v11813_v18, -inf }
0x1837   :  { %v6867_v26 = vpop.f32.mrf.mxu1 }
0x1838   :  { %v11815_v21 = vadd.f32 %v9805_v27, %v6867_v26  ;;  %v7075_v52 = vsel %vm245_vm0, %v11811_v17, -inf }
0x1839   :  { %7070 = vmax.xlane.f32.xlu1 %v7069_v0  ;;  %v9363_v29 = vpop.f32.mrf.mxu0  ;;  %7076 = vmax.xlane.f32.xlu0 %v7075_v52 }
0x183a   :  { %v7072_v30 = vsel %vm245_vm0, %v11815_v21, -inf  ;;  %v11827_v43 = vadd.f32 %v9807_v62, %v9363_v29 }
0x183b   :  { %v6942_v53 = vpop.f32.mrf.mxu0 }
0x183c   :  { %v11821_v59 = vadd.f32 %v9806_v37, %v6942_v53  ;;  %v7081_v20 = vsel %vm245_vm0, %v11827_v43, -inf }
0x183d   :  { %v9370_v61 = vpop.f32.mrf.mxu1  ;;  %7067 = vmax.xlane.f32.xlu1 %v7066_v49  ;;  %7073 = vmax.xlane.f32.xlu0 %v7072_v30 }
0x183e   :  { %v7078_v60 = vsel %vm245_vm0, %v11821_v59, -inf  ;;  %v11835_v19 = vadd.f32 %v9809_v11, %v9370_v61 }
0x183f   :  { %v7017_v57 = vpop.f32.mrf.mxu1 }
0x1840   :  { %v11829_v39 = vadd.f32 %v9808_v54, %v7017_v57  ;;  %v7087_v50 = vsel %vm245_vm0, %v11835_v19, -inf }
0x1841   :  { %7079 = vmax.xlane.f32.xlu1 %v7078_v60 }
0x1842   :  { %v7084_v46 = vsel %vm245_vm0, %v11829_v39, -inf }
0x1843   :  { %7085 = vmax.xlane.f32.xlu0 %v7084_v46 }
0x1845   :  { %7082 = vmax.xlane.f32.xlu1 %v7081_v20 }
0x1849   :  { %7088 = vmax.xlane.f32.xlu1 %v7087_v50 }
0x18ae   :  { %v7047_v56 = vpop.xlane.xlu0 %7046 }
0x18af   :  { %v7091_v33 = vsub.f32 %v11777_v25, %v7047_v56 }
0x18b1   :  { %v7108_v9 = vmul.f32 1.442695, %v7091_v33 }
0x18b2   :  { %v7044_v58 = vpop.xlane.xlu0 %7043 }
0x18b3   :  { %9688 = vpow2.f32 %v7108_v9  ;;  %v7090_v4 = vsub.f32 %v11779_v35, %v7044_v58 }
0x18b5   :  { %v7106_v22 = vmul.f32 1.442695, %v7090_v4 }
0x18b6   :  { %v7059_v63 = vpop.xlane.xlu1 %7058  ;;  %v7050_v14 = vpop.xlane.xlu0 %7049 }
0x18b7   :  { %9690 = vpow2.f32 %v7106_v22  ;;  %v7095_v48 = vsub.f32 %v11787_v28, %v7059_v63  ;;  %v7092_v8 = vsub.f32 %v11783_v42, %v7050_v14 }
0x18b9   :  { %v7116_v44 = vmul.f32 1.442695, %v7095_v48  ;;  %v7110_v45 = vmul.f32 1.442695, %v7092_v8 }
0x18ba   :  { %v7065_v38 = vpop.xlane.xlu1 %7064  ;;  %v7056_v1 = vpop.xlane.xlu0 %7055 }
0x18bb   :  { %9692 = vpow2.f32 %v7116_v44  ;;  %v7097_v25 = vsub.f32 %v11795_v10, %v7065_v38  ;;  %v7094_v13 = vsub.f32 %v11789_v41, %v7056_v1 }
0x18bc   :  { %9694 = vpow2.f32 %v7110_v45 }
0x18bd   :  { %v7120_v23 = vmul.f32 1.442695, %v7097_v25  ;;  %v7114_v35 = vmul.f32 1.442695, %v7094_v13 }
0x18be   :  { %v7062_v3 = vpop.xlane.xlu1 %7061  ;;  %v7053_v16 = vpop.xlane.xlu0 %7052 }
0x18bf   :  { %9696 = vpow2.f32 %v7120_v23  ;;  %v7096_v26 = vsub.f32 %v11799_v24, %v7062_v3  ;;  %v7093_v28 = vsub.f32 %v11797_v32, %v7053_v16 }
0x18c0   :  { %v11849_v42 = vpop.eup %9688  ;;  %9698 = vpow2.f32 %v7114_v35 }
0x18c1   :  { %v7118_v47 = vmul.f32 1.442695, %v7096_v26  ;;  %v7112_v27 = vmul.f32 1.442695, %v7093_v28  ;;  %v7141_v10 = vsel %vm245_vm0, %v11849_v42, 0.0 }
0x18c2   :  { %v7071_v0 = vpop.xlane.xlu1 %7070  ;;  %7142 = vadd.xlane.f32.xlu0 %v7141_v10  ;;  %v7077_v41 = vpop.xlane.xlu0 %7076 }
0x18c3   :  { %9700 = vpow2.f32 %v7118_v47  ;;  %v7099_v52 = vsub.f32 %v11805_v51, %v7071_v0  ;;  %v7101_v29 = vsub.f32 %v11811_v17, %v7077_v41 }
0x18c4   :  { %v11855_v53 = vpop.eup %9690  ;;  %9702 = vpow2.f32 %v7112_v27 }
0x18c5   :  { %v7124_v32 = vmul.f32 1.442695, %v7099_v52  ;;  %v7128_v24 = vmul.f32 1.442695, %v7101_v29  ;;  %v7138_v37 = vsel %vm245_vm0, %v11855_v53, 0.0 }
0x18c6   :  { %v7068_v49 = vpop.xlane.xlu1 %7067  ;;  %7139 = vadd.xlane.f32.xlu0 %v7138_v37  ;;  %v7074_v30 = vpop.xlane.xlu0 %7073 }
0x18c7   :  { %9704 = vpow2.f32 %v7124_v32  ;;  %v7098_v61 = vsub.f32 %v11813_v18, %v7068_v49  ;;  %v7100_v57 = vsub.f32 %v11815_v21, %v7074_v30 }
0x18c8   :  { %v11861_v62 = vpop.eup %9692  ;;  %9706 = vpow2.f32 %v7128_v24 }
0x18c9   :  { %v11863_v51 = vpop.eup %9694  ;;  %v7122_v17 = vmul.f32 1.442695, %v7098_v61  ;;  %v7126_v54 = vmul.f32 1.442695, %v7100_v57  ;;  %v7153_v60 = vsel %vm245_vm0, %v11861_v62, 0.0 }
0x18ca   :  { %7154 = vadd.xlane.f32.xlu1 %v7153_v60  ;;  %v7080_v46 = vpop.xlane.xlu1 %7079  ;;  %v7144_v11 = vsel %vm245_vm0, %v11863_v51, 0.0 }
0x18cb   :  { %9708 = vpow2.f32 %v7122_v17  ;;  %v7102_v18 = vsub.f32 %v11821_v59, %v7080_v46  ;;  %7145 = vadd.xlane.f32.xlu0 %v7144_v11 }
0x18cc   :  { %v11870_v21 = vpop.eup %9696  ;;  %9710 = vpow2.f32 %v7126_v54  ;;  %v7086_v20 = vpop.xlane.xlu0 %7085 }
0x18cd   :  { %v11872_v50 = vpop.eup %9698  ;;  %v7130_v56 = vmul.f32 1.442695, %v7102_v18  ;;  %v7104_v33 = vsub.f32 %v11829_v39, %v7086_v20  ;;  %v7159_v9 = vsel %vm245_vm0, %v11870_v21, 0.0 }
0x18ce   :  { %7160 = vadd.xlane.f32.xlu1 %v7159_v9  ;;  %v7083_v58 = vpop.xlane.xlu1 %7082  ;;  %v7150_v4 = vsel %vm245_vm0, %v11872_v50, 0.0 }
0x18cf   :  { %9712 = vpow2.f32 %v7130_v56  ;;  %v7134_v59 = vmul.f32 1.442695, %v7104_v33  ;;  %v7103_v22 = vsub.f32 %v11827_v43, %v7083_v58  ;;  %7151 = vadd.xlane.f32.xlu0 %v7150_v4 }
0x18d0   :  { %v11880_v63 = vpop.eup %9700 }
0x18d1   :  { %v11882_v14 = vpop.eup %9702  ;;  %9714 = vpow2.f32 %v7134_v59  ;;  %v7132_v48 = vmul.f32 1.442695, %v7103_v22  ;;  %v7156_v39 = vsel %vm245_vm0, %v11880_v63, 0.0 }
0x18d2   :  { %7157 = vadd.xlane.f32.xlu1 %v7156_v39  ;;  %v7089_v8 = vpop.xlane.xlu1 %7088  ;;  %v7147_v44 = vsel %vm245_vm0, %v11882_v14, 0.0 }
0x18d3   :  { %9716 = vpow2.f32 %v7132_v48  ;;  %v7105_v45 = vsub.f32 %v11835_v19, %v7089_v8  ;;  %7148 = vadd.xlane.f32.xlu0 %v7147_v44 }
0x18d4   :  { %v11889_v43 = vpop.eup %9704 }
0x18d5   :  { %v11891_v38 = vpop.eup %9706  ;;  %v7136_v1 = vmul.f32 1.442695, %v7105_v45  ;;  %v7165_v25 = vsel %vm245_vm0, %v11889_v43, 0.0  ;;  %v12130_v45 = vld [vmem:[#allocation31_spill] sm:$0xff] }
0x18d6   :  { %7166 = vadd.xlane.f32.xlu1 %v7165_v25  ;;  %v7171_v13 = vsel %vm245_vm0, %v11891_v38, 0.0 }
0x18d7   :  { %9718 = vpow2.f32 %v7136_v1  ;;  %7172 = vadd.xlane.f32.xlu0 %v7171_v13  ;;  %v12131_v1 = vld [vmem:[#allocation30_spill] sm:$0xff]  ;;  %v12132_v13 = vld [vmem:[#allocation33_spill] sm:$0xff] }
0x18d8   :  { %v11897_v23 = vpop.eup %9708 }
0x18d9   :  { %v11899_v35 = vpop.eup %9710  ;;  %v7162_v19 = vsel %vm245_vm0, %v11897_v23, 0.0 }
0x18da   :  { %7163 = vadd.xlane.f32.xlu1 %v7162_v19  ;;  %v7168_v3 = vsel %vm245_vm0, %v11899_v35, 0.0  ;;  %v12134_v19 = vld [vmem:[#allocation34_spill] sm:$0xff] }
0x18db   :  { %7169 = vadd.xlane.f32.xlu0 %v7168_v3  ;;  %v9810_v3 = vld [vmem:[#allocation13 + $0x8] sm:$0xff] }
0x18dc   :  { %v11905_v16 = vpop.eup %9712 }
0x18dd   :  { %v7174_v26 = vsel %vm245_vm0, %v11905_v16, 0.0 }
0x18de   :  { %v11909_v28 = vpop.eup %9714  ;;  %7175 = vadd.xlane.f32.xlu1 %v7174_v26  ;;  %v9811_v26 = vld [vmem:[#allocation14 + $0x8] sm:$0xff] }
0x18df   :  { %v7180_v47 = vsel %vm245_vm0, %v11909_v28, 0.0 }
0x18e0   :  { %v11913_v27 = vpop.eup %9716  ;;  %7181 = vadd.xlane.f32.xlu0 %v7180_v47  ;;  %v9812_v47 = vld [vmem:[#allocation13] sm:$0xff] }
0x18e1   :  { %v7177_v10 = vsel %vm245_vm0, %v11913_v27, 0.0 }
0x18e2   :  { %7178 = vadd.xlane.f32.xlu1 %v7177_v10  ;;  %v9814_v10 = vld [vmem:[#allocation14] sm:$0xff] }
0x18e4   :  { %v11917_v0 = vpop.eup %9718 }
0x18e5   :  { %v7183_v41 = vsel %vm245_vm0, %v11917_v0, 0.0 }
0x18e6   :  { %7184 = vadd.xlane.f32.xlu1 %v7183_v41 }
0x194b   :  { %v7143_v52 = vpop.xlane.xlu0 %7142 }
0x194f   :  { %v7140_v29 = vpop.xlane.xlu0 %7139 }
0x1950   :  { %9720 = vrcp.f32 %v7140_v29 }
0x1953   :  { %v7155_v32 = vpop.xlane.xlu1 %7154 }
0x1954   :  { %v7146_v24 = vpop.xlane.xlu0 %7145  ;;  %9722 = vrcp.f32 %v7155_v32 }
0x1957   :  { %v7161_v37 = vpop.xlane.xlu1 %7160 }
0x1958   :  { %v7152_v49 = vpop.xlane.xlu0 %7151 }
0x1959   :  { %9724 = vrcp.f32 %v7152_v49 }
0x195a   :  { %9726 = vrcp.f32 %v7161_v37 }
0x195b   :  { %v7158_v30 = vpop.xlane.xlu1 %7157 }
0x195c   :  { %9728 = vrcp.f32 %v7158_v30  ;;  %v7149_v61 = vpop.xlane.xlu0 %7148 }
0x195d   :  { %9730 = vrcp.f32 %v7143_v52  ;;  %v9721_v60 = vpop.eup %9720 }
0x195e   :  { %9732 = vrcp.f32 %v7146_v24  ;;  %v7202_v59 = vmul.f32 %v9721_v60, %v11855_v53 }
0x195f   :  { %v7167_v57 = vpop.xlane.xlu1 %7166  ;;  %9734 = vrcp.f32 %v7149_v61 }
0x1960   :  { %v7173_v17 = vpop.xlane.xlu0 %7172  ;;  %9736 = vrcp.f32 %v7167_v57 }
0x1961   :  { %v9723_v11 = vpop.eup %9722 }
0x1962   :  { %v7207_v9 = vmul.f32 %v9723_v11, %v11861_v62 }
0x1963   :  { %v7164_v54 = vpop.xlane.xlu1 %7163 }
0x1964   :  { %9738 = vrcp.f32 %v7164_v54  ;;  %v7170_v46 = vpop.xlane.xlu0 %7169 }
0x1965   :  { %9740 = vrcp.f32 %v7170_v46 }
0x1966   :  { %v9725_v18 = vpop.eup %9724  ;;  %9742 = vrcp.f32 %v7173_v17 }
0x1967   :  { %v7176_v20 = vpop.xlane.xlu1 %7175  ;;  %v7206_v56 = vmul.f32 %v9725_v18, %v11872_v50  ;;  %v9727_v33 = vpop.eup %9726 }
0x1968   :  { %9744 = vrcp.f32 %v7176_v20  ;;  %v7209_v62 = vmul.f32 %v9727_v33, %v11870_v21 }
0x1969   :  { %v9729_v58 = vpop.eup %9728  ;;  %9375 = vmatprep.mubr.msk.f32.mxu0 %vm245_vm0, %v7206_v56  ;;  %v7182_v4 = vpop.xlane.xlu0 %7181 }
0x196a   :  { %v9731_v22 = vpop.eup %9730  ;;  %9746 = vrcp.f32 %v7182_v4  ;;  %9376 = vmatmul.mubr.msk.f32.vlgmr.msra.gmra.mxu0 %vm245_vm0, %v7207_v9  ;;  %v7208_v48 = vmul.f32 %v9729_v58, %v11880_v63 }
0x196b   :  { %v9733_v39 = vpop.eup %9732  ;;  %9386 = vmatpush3.msra.mxu0 %v10906_v12  ;;  %9389 = vmatprep.mubr.msk.f32.mxu0 %vm245_vm0, %v7202_v59  ;;  %v7179_v50 = vpop.xlane.xlu1 %7178  ;;  %v7203_v53 = vmul.f32 %v9731_v22, %v11849_v42 }
0x196c   :  { %9387 = vmatprep.subr.mxu0 %v10999_v36  ;;  %9748 = vrcp.f32 %v7179_v50  ;;  %9382 = vmatprep.mubr.msk.f32.mxu1 %vm245_vm0, %v7208_v48  ;;  %v9735_v63 = vpop.eup %9734  ;;  %v7204_v12 = vmul.f32 %v9733_v39, %v11863_v51 }
0x196d   :  { %9388 = vmatpush3.msra.mxu0 %v10999_v36  ;;  %9383 = vmatmul.mubr.msk.f32.vlgmr.msra.gmra.mxu1 %vm245_vm0, %v7209_v62  ;;  %v9737_v8 = vpop.eup %9736  ;;  %v9815_v62 = vld [vmem:[%s12075_s17 + $0x10] sm:$0xff] }
0x196e   :  { %9393 = vmatpush3.msra.mxu1 %v10913_v40  ;;  %9399 = vmatprep.subr.mxu0 %v11002_v15  ;;  %v7205_v40 = vmul.f32 %v9735_v63, %v11882_v14  ;;  %v9817_v63 = vld [vmem:[%s12075_s17] sm:$0xff] }
0x196f   :  { %9390 = vmatmul.mubr.msk.f32.vlgmr.msra.gmra.mxu0 %vm245_vm0, %v7203_v53  ;;  %9394 = vmatprep.subr.mxu1 %v11036_v7  ;;  %v7185_v21 = vpop.xlane.xlu1 %7184  ;;  %v9816_v53 = vld [vmem:[%s12075_s17 + $0x8] sm:$0xff] }
0x1970   :  { %9396 = vmatprep.mubr.msk.f32.mxu1 %vm245_vm0, %v7204_v12  ;;  %9400 = vmatpush3.msra.mxu0 %v11002_v15  ;;  %9750 = vrcp.f32 %v7185_v21  ;;  %v7211_v15 = vmul.f32 %v9737_v8, %v11889_v43  ;;  %v9818_v21 = vld [vmem:[%s12072_s14] ss:$0 sm:$0xff] }
0x1971   :  { %v9739_v36 = vpop.eup %9738  ;;  %9395 = vmatpush3.msra.mxu1 %v11036_v7  ;;  %9401 = vmatprep.subr.mxu0 %v11033_v55 }
0x1972   :  { %v9741_v42 = vpop.eup %9740  ;;  %9402 = vmatpush3.msra.mxu0 %v11033_v55  ;;  %9406 = vmatprep.subr.mxu1 %v11093_v6  ;;  %v7210_v51 = vmul.f32 %v9739_v36, %v11897_v23 }
0x1973   :  { %v9743_v44 = vpop.eup %9742  ;;  %9397 = vmatmul.mubr.msk.f32.vlgmr.msra.gmra.mxu1 %vm245_vm0, %v7205_v40  ;;  %9413 = vmatprep.subr.mxu0 %v12130_v45  ;;  %v7212_v7 = vmul.f32 %v9741_v42, %v11899_v35 }
0x1974   :  { %9407 = vmatpush3.msra.mxu1 %v11093_v6  ;;  %9403 = vmatprep.mubr.msk.f32.mxu0 %vm245_vm0, %v7210_v51  ;;  %v7213_v55 = vmul.f32 %v9743_v44, %v11891_v38  ;;  %v12133_v6 = vld [vmem:[#allocation32_spill] sm:$0xff] }
0x1975   :  { %v9745_v14 = vpop.eup %9744  ;;  %9408 = vmatprep.subr.mxu1 %v12131_v1  ;;  %9404 = vmatmul.mubr.msk.f32.vlgmr.msra.gmra.mxu0 %vm245_vm0, %v7211_v15 }
0x1976   :  { %9409 = vmatpush3.msra.mxu1 %v12131_v1  ;;  %9410 = vmatprep.mubr.msk.f32.mxu1 %vm245_vm0, %v7212_v7  ;;  %v7214_v25 = vmul.f32 %v9745_v14, %v11905_v16 }
0x1977   :  { %v9747_v43 = vpop.eup %9746  ;;  %9420 = vmatprep.subr.mxu1 %v12132_v13  ;;  %9414 = vmatpush3.msra.mxu0 %v12130_v45 }
0x1978   :  { %9411 = vmatmul.mubr.msk.f32.vlgmr.msra.gmra.mxu1 %vm245_vm0, %v7213_v55  ;;  %9415 = vmatprep.subr.mxu0 %v12133_v6  ;;  %v7216_v23 = vmul.f32 %v9747_v43, %v11909_v28 }
0x1979   :  { %v9749_v35 = vpop.eup %9748  ;;  %9421 = vmatpush3.msra.mxu1 %v12132_v13  ;;  %9416 = vmatpush3.msra.mxu0 %v12133_v6 }
0x197a   :  { %9422 = vmatprep.subr.mxu1 %v12134_v19  ;;  %9417 = vmatprep.mubr.msk.f32.mxu0 %vm245_vm0, %v7214_v25  ;;  %v7215_v38 = vmul.f32 %v9749_v35, %v11913_v27  ;;  %v9813_v27 = vld [vmem:[%s12075_s17 + $0x18] sm:$0xff] }
0x197b   :  { %9423 = vmatpush3.msra.mxu1 %v12134_v19  ;;  %9424 = vmatprep.mubr.msk.f32.mxu1 %vm245_vm0, %v7216_v23 }
0x197c   :  { %9418 = vmatmul.mubr.msk.f32.vlgmr.msra.gmra.mxu0 %vm245_vm0, %v7215_v38  ;;  %9427 = vmatprep.subr.mxu0 %v9810_v3 }
0x197d   :  { %v9751_v16 = vpop.eup %9750  ;;  %9428 = vmatpush3.msra.mxu0 %v9810_v3  ;;  %9437 = vmatprep.subr.mxu1 %v9811_v26 }
0x197e   :  { %v7217_v28 = vmul.f32 %v9751_v16, %v11917_v0  ;;  %9429 = vmatprep.subr.mxu0 %v9812_v47 }
0x197f   :  { %9430 = vmatpush3.msra.mxu0 %v9812_v47 }
0x1980   :  { %9425 = vmatmul.mubr.msk.f32.vlgmr.msra.gmra.mxu1 %vm245_vm0, %v7217_v28  ;;  %9447 = vmatprep.subr.mxu0 %v9813_v27 }
0x1981   :  { %9438 = vmatpush3.msra.mxu1 %v9811_v26 }
0x1982   :  { %9439 = vmatprep.subr.mxu1 %v9814_v10 }
0x1983   :  { %9440 = vmatpush3.msra.mxu1 %v9814_v10 }
0x1a2a   :  { %v9377_v41 = vpop.f32.mrf.mxu0 }
0x1a2c   :  { %v7290_v52 = vpop.f32.mrf.mxu0 }
0x1a2d   :  { %v9384_v29 = vpop.f32.mrf.mxu1 }
0x1a2f   :  { %v7371_v32 = vpop.f32.mrf.mxu1  ;;  %v9391_v24 = vpop.f32.mrf.mxu0 }
0x1a30   :  { %v7458_v54 = vadd.f32 %v9391_v24, %v9377_v41 }
0x1a31   :  { %v7452_v37 = vpop.f32.mrf.mxu0 }
0x1a32   :  { %v7453_v17 = vadd.f32 %v7452_v37, %v7290_v52 }
0x1a33   :  { %v9398_v0 = vpop.f32.mrf.mxu1 }
0x1a34   :  { %v7539_v9 = vadd.f32 %v9398_v0, %v9384_v29 }
0x1a35   :  { %v7533_v49 = vpop.f32.mrf.mxu1  ;;  %v9405_v30 = vpop.f32.mrf.mxu0 }
0x1a36   :  { %v7705_v11 = vadd.f32 %v9405_v30, %v7458_v54  ;;  %v7534_v56 = vadd.f32 %v7533_v49, %v7371_v32 }
0x1a37   :  { %v7614_v57 = vpop.f32.mrf.mxu0 }
0x1a38   :  { %v9412_v61 = vpop.f32.mrf.mxu1  ;;  %v7704_v46 = vadd.f32 %v7614_v57, %v7453_v17 }
0x1a39   :  { %v7707_v22 = vadd.f32 %v9412_v61, %v7539_v9 }
0x1a3a   :  { %v7695_v18 = vpop.f32.mrf.mxu1 }
0x1a3b   :  { %v7706_v59 = vadd.f32 %v7695_v18, %v7534_v56 }
0x1a3c   :  { %v9419_v60 = vpop.f32.mrf.mxu0 }
0x1a3d   :  { %v7871_v58 = vadd.f32 %v9419_v60, %v7705_v11 }
0x1a3e   :  { %v7780_v20 = vpop.f32.mrf.mxu0 }
0x1a3f   :  { %v7870_v33 = vadd.f32 %v7780_v20, %v7704_v46  ;;  %v9819_v20 = vld [vmem:[%s12074_s16] ss:$0 sm:$0xff] }
0x1a40   :  { %v9426_v4 = vpop.f32.mrf.mxu1 }
0x1a41   :  { %9431 = vmatprep.mubr.msk.f32.mxu0 %vm245_vm0, %v7870_v33  ;;  %v7873_v50 = vadd.f32 %v9426_v4, %v7707_v22 }
0x1a42   :  { %v7861_v48 = vpop.f32.mrf.mxu1  ;;  %9432 = vmatmul.mubr.msk.f32.vlgmr.msra.gmra.mxu0 %vm245_vm0, %v7871_v58 }
0x1a43   :  { %v7872_v39 = vadd.f32 %v7861_v48, %v7706_v59  ;;  %9448 = vmatpush3.msra.mxu0 %v9813_v27 }
0x1a44   :  { %9449 = vmatprep.subr.mxu0 %v9815_v62 }
0x1a45   :  { %9434 = vmatprep.mubr.msk.f32.mxu0 %vm245_vm0, %v7872_v39  ;;  %9450 = vmatpush3.msra.mxu0 %v9815_v62 }
0x1a46   :  { %9435 = vmatmul.mubr.msk.f32.gmra.mxu0 %vm245_vm0, %v7873_v50  ;;  %9451 = vmatprep.subr.mxu0 %v9816_v53 }
0x1a47   :  { %9452 = vmatpush3.msra.mxu0 %v9816_v53 }
0x1a48   :  { %9453 = vmatprep.subr.mxu0 %v9817_v63 }
0x1a49   :  { %9454 = vmatpush3.msra.mxu0 %v9817_v63  ;;  %v9820_v63 = vld [vmem:[%s12076_s18] ss:$0 sm:$0xff]  ;;  %s10027_s18 = smov [#allocation16]  }
0x1a4a   :  { %s8266_s24 = sshll.u32 %s10027_s18, 4  ;;  %s8267_s24 = int_to_ptr.vmem [resolvable:$true] %s8266_s24 }
0x1a4b   :  { %s9981_s5 = scalar_lea.vmem %s8267_s24, 512  ;;  %p9986_p13 = scmp.lt.s32.totalorder %s8267_s24, %s8267_s24 }
0x1a4c   :  { %p9982_p12 = scmp.ne.s32.totalorder %s8267_s24, %s9981_s5  ;;  %p9987_p0 = scmp.lt.s32.totalorder %s9981_s5, %s9981_s5 }
0x1a4e   :  { %p9988_p1 = por %p9987_p0, %p9986_p13 }
0x1a50   :  { %p9989_p2 = pnand %p9988_p1, %p9982_p12 }
0x1b02   :  { %v9433_v12 = vpop.f32.mrf.mxu0 }
0x1b03   :  { %v7958_v8 = vadd.f32 %v9818_v21, %v9433_v12 }
0x1b04   :  { %v7952_v36 = vpop.f32.mrf.mxu0 }
0x1b05   :  { %v7953_v40 = vadd.f32 %v9818_v21, %v7952_v36  ;;  %v11995_v51 = vadd.f32 %v7958_v8, %v11665_v5 }
0x1b06   :  { %v9436_v42 = vpop.f32.mrf.mxu0 }
0x1b07   :  { %v7968_v44 = vadd.f32 %v9818_v21, %v9436_v42  ;;  %v11998_v15 = vadd.f32 %v7953_v40, %v11668_v31  ;;  %v7980_v55 = vsel %vm245_vm0, %v11995_v51, 0.0 }
0x1b08   :  { %v7962_v45 = vpop.f32.mrf.mxu0 }
0x1b09   :  { %v12001_v7 = vadd.f32 %v7968_v44, %v11671_v2  ;;  %v7963_v14 = vadd.f32 %v9818_v21, %v7962_v45  ;;  %v7975_v43 = vsel %vm245_vm0, %v11998_v15, 0.0 }
0x1b0b   :  { %v12004_v1 = vadd.f32 %v7963_v14, %v11674_v34  ;;  %v7981_v25 = vsel %vm245_vm0, %v12001_v7, 0.0 }
0x1b0c   :  { %v7982_v5 = vadd.f32 %v7981_v25, %v7980_v55 }
0x1b0d   :  { %v7976_v31 = vsel %vm245_vm0, %v12004_v1, 0.0 }
0x1b0e   :  { %7983 = vadd.xlane.f32.xlu1 %v7982_v5  ;;  %v7977_v2 = vadd.f32 %v7976_v31, %v7975_v43 }
0x1b10   :  { %7978 = vadd.xlane.f32.xlu0 %v7977_v2 }
0x1b97   :  { %v7984_v13 = vpop.xlane.xlu1 %7983 }
0x1b98   :  { %v7986_v6 = vmul.f32 0.03125, %v7984_v13 }
0x1b99   :  { %v7979_v34 = vpop.xlane.xlu0 %7978 }
0x1b9a   :  { %v7988_v23 = vsub.f32 %v11995_v51, %v7986_v6  ;;  %v7990_v35 = vsub.f32 %v12001_v7, %v7986_v6  ;;  %v7985_v19 = vmul.f32 0.03125, %v7979_v34 }
0x1b9c   :  { %v7992_v38 = vmul.f32 %v7988_v23, %v7988_v23  ;;  %v7994_v3 = vmul.f32 %v7990_v35, %v7990_v35  ;;  %v7987_v16 = vsub.f32 %v11998_v15, %v7985_v19  ;;  %v7989_v26 = vsub.f32 %v12004_v1, %v7985_v19 }
0x1b9e   :  { %v7991_v28 = vmul.f32 %v7987_v16, %v7987_v16  ;;  %v7993_v47 = vmul.f32 %v7989_v26, %v7989_v26  ;;  %v8000_v27 = vsel %vm245_vm0, %v7992_v38, 0.0  ;;  %v8001_v10 = vsel %vm245_vm0, %v7994_v3, 0.0 }
0x1b9f   :  { %v8002_v41 = vadd.f32 %v8001_v10, %v8000_v27 }
0x1ba0   :  { %v7995_v52 = vsel %vm245_vm0, %v7991_v28, 0.0  ;;  %v7996_v29 = vsel %vm245_vm0, %v7993_v47, 0.0 }
0x1ba1   :  { %8003 = vadd.xlane.f32.xlu1 %v8002_v41  ;;  %v7997_v32 = vadd.f32 %v7996_v29, %v7995_v52 }
0x1ba3   :  { %7998 = vadd.xlane.f32.xlu0 %v7997_v32 }
0x1c2a   :  { %v8004_v24 = vpop.xlane.xlu1 %8003 }
0x1c2b   :  { %v8006_v0 = vmul.f32 0.03125, %v8004_v24 }
0x1c2c   :  { %v7999_v37 = vpop.xlane.xlu0 %7998 }
0x1c2d   :  { %v8008_v49 = vadd.f32 1e-05, %v8006_v0  ;;  %v8005_v30 = vmul.f32 0.03125, %v7999_v37 }
0x1c2f   :  { %v8007_v61 = vadd.f32 1e-05, %v8005_v30  ;;  %9752 = vrsqrt.f32 %v8008_v49 }
0x1c31   :  { %9754 = vrsqrt.f32 %v8007_v61 }
0x1c3c   :  { %v9753_v57 = vpop.eup %9752 }
0x1c3d   :  { %v8012_v60 = vmul.f32 %v9753_v57, %v7988_v23  ;;  %v8014_v11 = vmul.f32 %v9753_v57, %v7990_v35 }
0x1c3e   :  { %v9755_v17 = vpop.eup %9754 }
0x1c3f   :  { %v8011_v54 = vmul.f32 %v9755_v17, %v7987_v16  ;;  %v8013_v46 = vmul.f32 %v9755_v17, %v7989_v26 }
0x1c41   :  { %9441 = vmatprep.mubr.msk.f32.mxu1 %vm245_vm0, %v8011_v54 }
0x1c42   :  { %9442 = vmatmul.mubr.msk.f32.vlgmr.msra.gmra.mxu1 %vm245_vm0, %v8012_v60 }
0x1c43   :  { %9444 = vmatprep.mubr.msk.f32.mxu1 %vm245_vm0, %v8013_v46 }
0x1c46   :  { %9445 = vmatmul.mubr.msk.f32.gmra.mxu1 %vm245_vm0, %v8014_v11 }
0x1d02   :  { %v9443_v18 = vpop.f32.mrf.mxu1 }
0x1d03   :  { %v8099_v56 = vadd.f32 %v9819_v20, %v9443_v18 }
0x1d04   :  { %v8093_v33 = vpop.f32.mrf.mxu1 }
0x1d05   :  { %v8094_v9 = vadd.f32 %v9819_v20, %v8093_v33  ;;  %v8113_v59 = vmax.f32 %v8099_v56, 0.0 }
0x1d06   :  { %v9446_v58 = vpop.f32.mrf.mxu1 }
0x1d07   :  { %v8112_v4 = vmax.f32 %v8094_v9, 0.0  ;;  %v8109_v22 = vadd.f32 %v9819_v20, %v9446_v58 }
0x1d08   :  { %v8103_v48 = vpop.f32.mrf.mxu1 }
0x1d09   :  { %v8104_v39 = vadd.f32 %v9819_v20, %v8103_v48  ;;  %9455 = vmatprep.mubr.msk.f32.mxu0 %vm4293_vm1, %v8112_v4  ;;  %v8115_v62 = vmax.f32 %v8109_v22, 0.0 }
0x1d0a   :  { %9456 = vmatmul.mubr.msk.f32.vlgmr.msra.gmra.mxu0 %vm4293_vm1, %v8113_v59 }
0x1d0b   :  { %v8114_v50 = vmax.f32 %v8104_v39, 0.0 }
0x1d0d   :  { %9458 = vmatprep.mubr.msk.f32.mxu0 %vm4293_vm1, %v8114_v50 }
0x1d0e   :  { %9459 = vmatmul.mubr.msk.f32.gmra.mxu0 %vm4293_vm1, %v8115_v62 }
0x1dca   :  { %v9457_v53 = vpop.f32.mrf.mxu0 }
0x1dcb   :  { %v8200_v12 = vadd.f32 %v9820_v63, %v9457_v53 }
0x1dcc   :  { %v8194_v21 = vpop.f32.mrf.mxu0 }
0x1dcd   :  { %v8195_v8 = vadd.f32 %v9820_v63, %v8194_v21  ;;  %v8214_v40 = vadd.f32 %v8200_v12, %v11995_v51 }
0x1dce   :  { %v9460_v36 = vpop.f32.mrf.mxu0 }
0x1dcf   :  { %v8210_v42 = vadd.f32 %v9820_v63, %v9460_v36  ;;  %v8213_v45 = vadd.f32 %v8195_v8, %v11998_v15  ;;  %v8222_v25 = vsel %vm245_vm0, %v8214_v40, 0.0 }
0x1dd0   :  { %v8204_v44 = vpop.f32.mrf.mxu0 }
0x1dd1   :  { %v8216_v14 = vadd.f32 %v8210_v42, %v12001_v7  ;;  %v8205_v55 = vadd.f32 %v9820_v63, %v8204_v44  ;;  %v8217_v2 = vsel %vm245_vm0, %v8213_v45, 0.0 }
0x1dd3   :  { %v8223_v5 = vsel %vm245_vm0, %v8216_v14, 0.0  ;;  %v8215_v43 = vadd.f32 %v8205_v55, %v12004_v1 }
0x1dd4   :  { %v8224_v31 = vadd.f32 %v8223_v5, %v8222_v25 }
0x1dd5   :  { %v8218_v13 = vsel %vm245_vm0, %v8215_v43, 0.0 }
0x1dd6   :  { %8225 = vadd.xlane.f32.xlu1 %v8224_v31  ;;  %v8219_v51 = vadd.f32 %v8218_v13, %v8217_v2 }
0x1dd8   :  { %8220 = vadd.xlane.f32.xlu0 %v8219_v51 }
0x1e5f   :  { %v8226_v6 = vpop.xlane.xlu1 %8225 }
0x1e60   :  { %v8228_v34 = vmul.f32 0.03125, %v8226_v6 }
0x1e61   :  { %v8221_v15 = vpop.xlane.xlu0 %8220 }
0x1e62   :  { %v8230_v23 = vsub.f32 %v8214_v40, %v8228_v34  ;;  %v8232_v7 = vsub.f32 %v8216_v14, %v8228_v34  ;;  %v8227_v35 = vmul.f32 0.03125, %v8221_v15 }
0x1e64   :  { %v8234_v19 = vmul.f32 %v8230_v23, %v8230_v23  ;;  %v8236_v38 = vmul.f32 %v8232_v7, %v8232_v7  ;;  %v8229_v3 = vsub.f32 %v8213_v45, %v8227_v35  ;;  %v8231_v16 = vsub.f32 %v8215_v43, %v8227_v35 }
0x1e66   :  { %v8233_v26 = vmul.f32 %v8229_v3, %v8229_v3  ;;  %v8235_v1 = vmul.f32 %v8231_v16, %v8231_v16  ;;  %v8242_v28 = vsel %vm245_vm0, %v8234_v19, 0.0  ;;  %v8243_v47 = vsel %vm245_vm0, %v8236_v38, 0.0 }
0x1e67   :  { %v8244_v27 = vadd.f32 %v8243_v47, %v8242_v28 }
0x1e68   :  { %v8237_v10 = vsel %vm245_vm0, %v8233_v26, 0.0  ;;  %v8238_v41 = vsel %vm245_vm0, %v8235_v1, 0.0 }
0x1e69   :  { %8245 = vadd.xlane.f32.xlu1 %v8244_v27  ;;  %v8239_v52 = vadd.f32 %v8238_v41, %v8237_v10 }
0x1e6b   :  { %8240 = vadd.xlane.f32.xlu0 %v8239_v52 }
0x1ef2   :  { %v8246_v29 = vpop.xlane.xlu1 %8245 }
0x1ef3   :  { %v8248_v32 = vmul.f32 0.03125, %v8246_v29 }
0x1ef4   :  { %v8241_v24 = vpop.xlane.xlu0 %8240 }
0x1ef5   :  { %v8250_v0 = vadd.f32 1e-05, %v8248_v32  ;;  %v8247_v37 = vmul.f32 0.03125, %v8241_v24 }
0x1ef7   :  { %9756 = vrsqrt.f32 %v8250_v0  ;;  %v8249_v49 = vadd.f32 1e-05, %v8247_v37 }
0x1ef9   :  { %9758 = vrsqrt.f32 %v8249_v49 }
0x1f04   :  { %v9757_v30 = vpop.eup %9756 }
0x1f05   :  { %v8254_v61 = vmul.f32 %v9757_v30, %v8230_v23  ;;  %v8256_v57 = vmul.f32 %v9757_v30, %v8232_v7 }
0x1f06   :  { %v9759_v17 = vpop.eup %9758 }
0x1f07   :  { %v8253_v54 = vmul.f32 %v9759_v17, %v8229_v3  ;;  %v8255_v60 = vmul.f32 %v9759_v17, %v8231_v16  ;;  %8258 = vst.msk [vmem:[#allocation16 + $0x8] sm:$0xff] %vm245_vm0, %v8254_v61  ;;  %8260 = vst.msk [vmem:[#allocation16 + $0x18] sm:$0xff] %vm245_vm0, %v8256_v57 }
0x1f09   :  { %8257 = vst.msk [vmem:[#allocation16] sm:$0xff] %vm245_vm0, %v8253_v54  ;;  %8259 = vst.msk [vmem:[#allocation16 + $0x10] sm:$0xff] %vm245_vm0, %v8255_v60 }
0x1f0a   :  { %9992 = shalt.err (!%p9989_p2)
}
0x1f0b   :  { %8272 = dma.vmem_to_hbm [thread:$0]  %s8267_s24, 512, %s12077_s19, [#allocation4], %s10015_s22, %s10015_s22, %s10016_s2  }
0x1f0c   :  { %10011 = dma.done.wait [#allocation4], 512  }
0x1f0d   :  { %10012 = vsyncadd [#allocation4], 4294966784 }
0x1f0e   :  { %8276 = vsyncpa [#allocation3], 1 }
0x1f0f   :  { %8277 = vsyncpa [#allocation6], 1 }
0x1f10   :  { %8278 = vsyncpa [#allocation9], 1 }
0x1f11   :  { %8279 = vsyncpa [#allocation12], 1 }
0x1f12   :  { %8280 = vsyncpa [#allocation15], 1 }
0x1f13   :  { %8281 = vsyncpa [#allocation4], 1 }

</bundles_post_ra>
